<compile_context>
chip_gen: v7x
topology: tpu7x:2x2x1
jax: 0.10.0
libtpu: 0.0.40
codegen_flags: <defaults>
</compile_context>

<pallas_src>
import functools
import math

import jax
import jax.numpy as jnp
from jax import lax
from jax.experimental import pallas as pl
from jax.experimental.pallas import tpu as pltpu


def _round_up(x, m):
  return ((x + m - 1) // m) * m


# ---------------------------------------------------------------------------
# Fused kernel: all KANLinear layers + final log_softmax for one batch tile.
# ---------------------------------------------------------------------------
def fused_kan_kernel(*refs, num_layers, grid_size, spline_order, out_valid,
                     matmul_dtype):
  """refs = (x_ref, [grid_ref, recip_ref, w_ref] * num_layers, out_ref).

  x_ref:     (Bt, Inp_0)             padded input activations (f32)
  grid_ref:  (G,  Inp_l)             spline knots, transposed & lane-padded
  recip_ref: (R,  Inp_l)             1/(g[j+k]-g[j]) rows, ordered k-major
  w_ref:     ((K+1)*Inp_l, Outp_l)   [base_w^T ; spline_w^T (k-major)]  (bf16)
  out_ref:   (Bt, Outp_last)         log_softmax(logits) (f32)
  """
  x_ref = refs[0]
  out_ref = refs[-1]
  layer_refs = refs[1:-1]

  G = grid_size + 2 * spline_order + 1      # knots per feature
  K = grid_size + spline_order              # order-p bases per feature

  # Static row offsets of each recursion order k inside the reciprocal table.
  recip_off = {1: 0}
  for k in range(2, spline_order + 1):
    recip_off[k] = recip_off[k - 1] + (G - (k - 1))

  h = x_ref[...].astype(jnp.float32)        # (Bt, Inp_0)

  for l in range(num_layers):
    grid_ref, recip_ref, w_ref = layer_refs[3 * l:3 * l + 3]
    grid_t = grid_ref[...]                  # (G, Inp)
    recip_t = recip_ref[...]                # (R, Inp)

    # Hoist knot / reciprocal row slices once (avoid re-slicing in hot loops).
    knot = [grid_t[j:j + 1, :] for j in range(G)]                   # (1, Inp)
    rrow = [recip_t[j:j + 1, :] for j in range(recip_t.shape[0])]   # (1, Inp)

    x = h
    # Order-0 indicators from step functions: G compares instead of 2*(G-1).
    ge = [(x >= knot[j]).astype(jnp.float32) for j in range(G)]
    bases = [ge[j] - ge[j + 1] for j in range(G - 1)]

    # Cox-de Boor recursion; divides replaced by reciprocal multiplies (VPU).
    for k in range(1, spline_order + 1):
      off_k = recip_off[k]
      bases = [
          (x - knot[j]) * rrow[off_k + j] * bases[j]
          + (knot[j + k + 1] - x) * rrow[off_k + j + 1] * bases[j + 1]
          for j in range(G - 1 - k)
      ]
    # len(bases) == K, each (Bt, Inp)

    is_last = l == num_layers - 1
    # base_activation: ReLU on hidden layers, Identity on the last layer.
    act = x if is_last else jnp.maximum(x, 0.0)

    # One wide-contraction MXU matmul instead of 1 + K narrow ones.
    stacked = jnp.concatenate([act] + bases, axis=-1)     # (Bt, (K+1)*Inp)
    h = jnp.dot(stacked.astype(matmul_dtype), w_ref[...],
                preferred_element_type=jnp.float32)       # (Bt, Outp) f32

  # Final log_softmax over the valid (unpadded) output columns only.
  col = lax.broadcasted_iota(jnp.int32, h.shape, 1)
  h = jnp.where(col < out_valid, h, -jnp.inf)
  m = jnp.max(h, axis=-1, keepdims=True)
  z = h - m
  lse = jnp.log(jnp.sum(jnp.exp(z), axis=-1, keepdims=True))
  out_ref[...] = (z - lse).astype(out_ref.dtype)


# ---------------------------------------------------------------------------
# Wrapper: padding, batch tiling, pallas_call.
# ---------------------------------------------------------------------------
def kan_fully_connected_forward(x, kernel_params, *, grid_size, spline_order,
                                out_features, batch_tile=512):
  """Fused forward of KANLinearFullyConnected (update_grid=False)."""
  B, in_features = x.shape
  in_pad0 = kernel_params[0]["grid"].shape[1]
  out_pad_last = kernel_params[-1]["w"].shape[1]
  matmul_dtype = kernel_params[0]["w"].dtype

  bp = _round_up(B, 8)
  bt = min(batch_tile, bp)          # batch tile (multiple of 8 sublanes)
  bp = _round_up(bp, bt)

  x_p = jnp.zeros((bp, in_pad0), jnp.float32).at[:B, :in_features].set(
      x.astype(jnp.float32))

  flat_inputs = [x_p]
  in_specs = [pl.BlockSpec((bt, in_pad0), lambda i: (i, 0))]
  for p in kernel_params:
    flat_inputs += [p["grid"], p["recip"], p["w"]]
    # Parameters are whole-array blocks with a constant index_map, so Pallas
    # keeps them VMEM-resident across batch tiles (no per-tile re-DMA).
    # TODO(synk): for very large layers on v7x (64 MiB VMEM), also tile Out
    # and/or use pipeline_mode=pl.Buffered(1) on the weight spec.
    in_specs += [
        pl.BlockSpec(p["grid"].shape, lambda i: (0, 0)),
        pl.BlockSpec(p["recip"].shape, lambda i: (0, 0)),
        pl.BlockSpec(p["w"].shape, lambda i: (0, 0)),
    ]

  kernel = functools.partial(
      fused_kan_kernel,
      num_layers=len(kernel_params),
      grid_size=grid_size,
      spline_order=spline_order,
      out_valid=out_features,
      matmul_dtype=matmul_dtype,
  )

  out_p = pl.pallas_call(
      kernel,
      out_shape=jax.ShapeDtypeStruct((bp, out_pad_last), jnp.float32),
      grid=(bp // bt,),
      in_specs=in_specs,
      out_specs=pl.BlockSpec((bt, out_pad_last), lambda i: (i, 0)),
      compiler_params=pltpu.CompilerParams(
          # Batch tiles are independent -> v7x megacore can split them.
          dimension_semantics=("parallel",)),
  )(*flat_inputs)

  return out_p[:B, :out_features]


# ---------------------------------------------------------------------------
# Parameter construction (synthetic, shapes match KANLinear.__init__).
# ---------------------------------------------------------------------------
def init_kan_raw_params(key, layers_hidden, *, grid_size, spline_order,
                        grid_range, scale_noise, scale_base, scale_spline):
  params = []
  h = (grid_range[1] - grid_range[0]) / grid_size
  K = grid_size + spline_order
  grid_1d = (jnp.arange(-spline_order, grid_size + spline_order + 1,
                        dtype=jnp.float32) * h + grid_range[0])     # (G,)
  for fin, fout in zip(layers_hidden[:-1], layers_hidden[1:]):
    key, k1, k2, k3 = jax.random.split(key, 4)
    grid = jnp.tile(grid_1d[None, :], (fin, 1))                     # (fin, G)
    base_weight = (jax.random.uniform(k1, (fout, fin), minval=-1.0, maxval=1.0)
                   * (scale_base * math.sqrt(3.0 / fin)))
    spline_weight = (jax.random.normal(k2, (fout, fin, K))
                     * (scale_noise / grid_size))
    spline_scaler = (jax.random.uniform(k3, (fout, fin), minval=-1.0, maxval=1.0)
                     * (scale_spline * math.sqrt(3.0 / fin)))
    scaled_spline = spline_weight * spline_scaler[:, :, None]       # (fout,fin,K)
    params.append(dict(grid=grid, base_weight=base_weight,
                       scaled_spline=scaled_spline))
  return params


def prepare_kernel_params(raw_params, *, grid_size, spline_order,
                          matmul_dtype=jnp.bfloat16, lane=128):
  """Lane-pad, fuse base+spline weights, precompute reciprocal knot spans."""
  K = grid_size + spline_order
  G = grid_size + 2 * spline_order + 1
  prepared = []
  for p in raw_params:
    fout, fin = p["base_weight"].shape
    inp = _round_up(fin, lane)
    outp = _round_up(fout, lane)

    # Knots transposed to (G, In_pad); padded lanes copy a real (monotone)
    # knot vector so the recursion stays finite there (their fused-weight rows
    # are zero, so they contribute nothing).
    grid_t = jnp.pad(p["grid"].T, ((0, 0), (0, inp - fin)), mode="edge")

    # Reciprocal knot spans 1/(g[j+k]-g[j]); rows ordered k=1..p, j=0..G-1-k.
    rows = []
    for k in range(1, spline_order + 1):
      for j in range(G - k):
        denom = grid_t[j + k] - grid_t[j]
        rows.append(jnp.where(denom != 0, 1.0 / denom, 0.0))  # repeated-knot guard
    recip = jnp.stack(rows, axis=0)                           # (R, In_pad)

    # Fused weight: rows [0:In_pad] = base_weight^T, then K blocks of
    # scaled_spline[:, :, k]^T  -- matches the [act, bases_0..K-1] stacking.
    base_w_t = jnp.zeros((inp, outp), jnp.float32).at[:fin, :fout].set(
        p["base_weight"].T)
    spline_t = jnp.zeros((K, inp, outp), jnp.float32).at[:, :fin, :fout].set(
        jnp.transpose(p["scaled_spline"], (2, 1, 0)))
    w_fused = jnp.concatenate([base_w_t[None], spline_t], axis=0)
    w_fused = w_fused.reshape((K + 1) * inp, outp).astype(matmul_dtype)

    prepared.append(dict(grid=grid_t.astype(jnp.float32),
                         recip=recip.astype(jnp.float32),
                         w=w_fused))
  return prepared


# ---------------------------------------------------------------------------
# Pure-JAX f32 reference (mirrors the PyTorch module) for validation.
# ---------------------------------------------------------------------------
def kan_reference(x, raw_params, *, spline_order):
  n = len(raw_params)
  for li, p in enumerate(raw_params):
    g = p["grid"][None, :, :]                                # (1, in, G)
    xe = x[:, :, None]                                       # (B, in, 1)
    bases = ((xe >= g[..., :-1]) & (xe < g[..., 1:])).astype(x.dtype)
    for k in range(1, spline_order + 1):
      bases = ((xe - g[..., :-(k + 1)])
               / (g[..., k:-1] - g[..., :-(k + 1)]) * bases[..., :-1]
               + (g[..., k + 1:] - xe)
               / (g[..., k + 1:] - g[..., 1:-k]) * bases[..., 1:])
    act = x if li == n - 1 else jax.nn.relu(x)               # ReLU / Identity
    base_out = act @ p["base_weight"].T
    spline_out = (bases.reshape(x.shape[0], -1)
                  @ p["scaled_spline"].reshape(p["scaled_spline"].shape[0], -1).T)
    x = base_out + spline_out
  return jax.nn.log_softmax(x, axis=1)


if __name__ == "__main__":
  grid_size = 3
  spline_order = 5
  layers_hidden = [32, 64, 16]
  batch = 8

  key = jax.random.PRNGKey(0)
  key, kx = jax.random.split(key)
  x = jax.random.normal(kx, (batch, layers_hidden[0]), dtype=jnp.float32)

  raw_params = init_kan_raw_params(
      key, layers_hidden, grid_size=grid_size, spline_order=spline_order,
      grid_range=(-1.0, 1.0), scale_noise=0.1, scale_base=1.0, scale_spline=1.0)
  kernel_params = prepare_kernel_params(
      raw_params, grid_size=grid_size, spline_order=spline_order,
      matmul_dtype=jnp.bfloat16)

  fwd = jax.jit(functools.partial(
      kan_fully_connected_forward,
      grid_size=grid_size, spline_order=spline_order,
      out_features=layers_hidden[-1]))
  out = fwd(x, kernel_params)
  jax.block_until_ready(out)

  assert out.shape == (batch, layers_hidden[-1])
  # log_softmax rows must sum (in prob space) to ~1.
  assert bool(jnp.all(jnp.abs(jnp.sum(jnp.exp(out), axis=1) - 1.0) < 1e-4))
  # Validate against the pure-JAX f32 reference. bf16 matmul operands in the
  # kernel give ~1e-2-level absolute differences on the log-probs.
  ref = kan_reference(x, raw_params, spline_order=spline_order)
  assert bool(jnp.max(jnp.abs(out - ref)) < 0.1)
  print("KERNEL_OK")
</pallas_src>

<mosaic_0001>
module attributes {stable_mosaic.version = 11 : i64} {
  func.func @fused_kan_kernel(%arg0: i32, %arg1: memref<8x128xf32, #tpu.memory_space<vmem>>, %arg2: memref<14x128xf32, #tpu.memory_space<vmem>>, %arg3: memref<55x128xf32, #tpu.memory_space<vmem>>, %arg4: memref<1152x128xbf16, #tpu.memory_space<vmem>>, %arg5: memref<14x128xf32, #tpu.memory_space<vmem>>, %arg6: memref<55x128xf32, #tpu.memory_space<vmem>>, %arg7: memref<1152x128xbf16, #tpu.memory_space<vmem>>, %arg8: memref<8x128xf32, #tpu.memory_space<vmem>>) attributes {dimension_semantics = [#tpu.dimension_semantics<parallel>], iteration_bounds = array<i64: 1>, scalar_prefetch = 0 : i64, scratch_operands = 0 : i64, tpu.core_type = #tpu.core_type<tc>, window_params = [{transform_indices = @transform_0, window_bounds = array<i64: 8, 128>}, {pipeline_mode = #tpu.pipeline_mode<synchronous>, transform_indices = @transform_1, window_bounds = array<i64: 14, 128>}, {pipeline_mode = #tpu.pipeline_mode<synchronous>, transform_indices = @transform_2, window_bounds = array<i64: 55, 128>}, {pipeline_mode = #tpu.pipeline_mode<synchronous>, transform_indices = @transform_3, window_bounds = array<i64: 1152, 128>}, {pipeline_mode = #tpu.pipeline_mode<synchronous>, transform_indices = @transform_4, window_bounds = array<i64: 14, 128>}, {pipeline_mode = #tpu.pipeline_mode<synchronous>, transform_indices = @transform_5, window_bounds = array<i64: 55, 128>}, {pipeline_mode = #tpu.pipeline_mode<synchronous>, transform_indices = @transform_6, window_bounds = array<i64: 1152, 128>}, {transform_indices = @transform_7, window_bounds = array<i64: 8, 128>}]} {
    %c0 = arith.constant 0 : index
    %c0_0 = arith.constant 0 : index
    %0 = vector.load %arg1[%c0, %c0_0] : memref<8x128xf32, #tpu.memory_space<vmem>>, vector<8x128xf32>
    %c0_1 = arith.constant 0 : index
    %c0_2 = arith.constant 0 : index
    %1 = vector.load %arg2[%c0_1, %c0_2] : memref<14x128xf32, #tpu.memory_space<vmem>>, vector<14x128xf32>
    %c0_3 = arith.constant 0 : index
    %c0_4 = arith.constant 0 : index
    %2 = vector.load %arg3[%c0_3, %c0_4] : memref<55x128xf32, #tpu.memory_space<vmem>>, vector<55x128xf32>
    %3 = vector.extract_strided_slice %1 {offsets = [0, 0], sizes = [1, 128], strides = [1, 1]} : vector<14x128xf32> to vector<1x128xf32>
    %4 = vector.extract_strided_slice %1 {offsets = [1, 0], sizes = [1, 128], strides = [1, 1]} : vector<14x128xf32> to vector<1x128xf32>
    %5 = vector.extract_strided_slice %1 {offsets = [2, 0], sizes = [1, 128], strides = [1, 1]} : vector<14x128xf32> to vector<1x128xf32>
    %6 = vector.extract_strided_slice %1 {offsets = [3, 0], sizes = [1, 128], strides = [1, 1]} : vector<14x128xf32> to vector<1x128xf32>
    %7 = vector.extract_strided_slice %1 {offsets = [4, 0], sizes = [1, 128], strides = [1, 1]} : vector<14x128xf32> to vector<1x128xf32>
    %8 = vector.extract_strided_slice %1 {offsets = [5, 0], sizes = [1, 128], strides = [1, 1]} : vector<14x128xf32> to vector<1x128xf32>
    %9 = vector.extract_strided_slice %1 {offsets = [6, 0], sizes = [1, 128], strides = [1, 1]} : vector<14x128xf32> to vector<1x128xf32>
    %10 = vector.extract_strided_slice %1 {offsets = [7, 0], sizes = [1, 128], strides = [1, 1]} : vector<14x128xf32> to vector<1x128xf32>
    %11 = vector.extract_strided_slice %1 {offsets = [8, 0], sizes = [1, 128], strides = [1, 1]} : vector<14x128xf32> to vector<1x128xf32>
    %12 = vector.extract_strided_slice %1 {offsets = [9, 0], sizes = [1, 128], strides = [1, 1]} : vector<14x128xf32> to vector<1x128xf32>
    %13 = vector.extract_strided_slice %1 {offsets = [10, 0], sizes = [1, 128], strides = [1, 1]} : vector<14x128xf32> to vector<1x128xf32>
    %14 = vector.extract_strided_slice %1 {offsets = [11, 0], sizes = [1, 128], strides = [1, 1]} : vector<14x128xf32> to vector<1x128xf32>
    %15 = vector.extract_strided_slice %1 {offsets = [12, 0], sizes = [1, 128], strides = [1, 1]} : vector<14x128xf32> to vector<1x128xf32>
    %16 = vector.extract_strided_slice %1 {offsets = [13, 0], sizes = [1, 128], strides = [1, 1]} : vector<14x128xf32> to vector<1x128xf32>
    %17 = vector.extract_strided_slice %2 {offsets = [0, 0], sizes = [1, 128], strides = [1, 1]} : vector<55x128xf32> to vector<1x128xf32>
    %18 = vector.extract_strided_slice %2 {offsets = [1, 0], sizes = [1, 128], strides = [1, 1]} : vector<55x128xf32> to vector<1x128xf32>
    %19 = vector.extract_strided_slice %2 {offsets = [2, 0], sizes = [1, 128], strides = [1, 1]} : vector<55x128xf32> to vector<1x128xf32>
    %20 = vector.extract_strided_slice %2 {offsets = [3, 0], sizes = [1, 128], strides = [1, 1]} : vector<55x128xf32> to vector<1x128xf32>
    %21 = vector.extract_strided_slice %2 {offsets = [4, 0], sizes = [1, 128], strides = [1, 1]} : vector<55x128xf32> to vector<1x128xf32>
    %22 = vector.extract_strided_slice %2 {offsets = [5, 0], sizes = [1, 128], strides = [1, 1]} : vector<55x128xf32> to vector<1x128xf32>
    %23 = vector.extract_strided_slice %2 {offsets = [6, 0], sizes = [1, 128], strides = [1, 1]} : vector<55x128xf32> to vector<1x128xf32>
    %24 = vector.extract_strided_slice %2 {offsets = [7, 0], sizes = [1, 128], strides = [1, 1]} : vector<55x128xf32> to vector<1x128xf32>
    %25 = vector.extract_strided_slice %2 {offsets = [8, 0], sizes = [1, 128], strides = [1, 1]} : vector<55x128xf32> to vector<1x128xf32>
    %26 = vector.extract_strided_slice %2 {offsets = [9, 0], sizes = [1, 128], strides = [1, 1]} : vector<55x128xf32> to vector<1x128xf32>
    %27 = vector.extract_strided_slice %2 {offsets = [10, 0], sizes = [1, 128], strides = [1, 1]} : vector<55x128xf32> to vector<1x128xf32>
    %28 = vector.extract_strided_slice %2 {offsets = [11, 0], sizes = [1, 128], strides = [1, 1]} : vector<55x128xf32> to vector<1x128xf32>
    %29 = vector.extract_strided_slice %2 {offsets = [12, 0], sizes = [1, 128], strides = [1, 1]} : vector<55x128xf32> to vector<1x128xf32>
    %30 = vector.extract_strided_slice %2 {offsets = [13, 0], sizes = [1, 128], strides = [1, 1]} : vector<55x128xf32> to vector<1x128xf32>
    %31 = vector.extract_strided_slice %2 {offsets = [14, 0], sizes = [1, 128], strides = [1, 1]} : vector<55x128xf32> to vector<1x128xf32>
    %32 = vector.extract_strided_slice %2 {offsets = [15, 0], sizes = [1, 128], strides = [1, 1]} : vector<55x128xf32> to vector<1x128xf32>
    %33 = vector.extract_strided_slice %2 {offsets = [16, 0], sizes = [1, 128], strides = [1, 1]} : vector<55x128xf32> to vector<1x128xf32>
    %34 = vector.extract_strided_slice %2 {offsets = [17, 0], sizes = [1, 128], strides = [1, 1]} : vector<55x128xf32> to vector<1x128xf32>
    %35 = vector.extract_strided_slice %2 {offsets = [18, 0], sizes = [1, 128], strides = [1, 1]} : vector<55x128xf32> to vector<1x128xf32>
    %36 = vector.extract_strided_slice %2 {offsets = [19, 0], sizes = [1, 128], strides = [1, 1]} : vector<55x128xf32> to vector<1x128xf32>
    %37 = vector.extract_strided_slice %2 {offsets = [20, 0], sizes = [1, 128], strides = [1, 1]} : vector<55x128xf32> to vector<1x128xf32>
    %38 = vector.extract_strided_slice %2 {offsets = [21, 0], sizes = [1, 128], strides = [1, 1]} : vector<55x128xf32> to vector<1x128xf32>
    %39 = vector.extract_strided_slice %2 {offsets = [22, 0], sizes = [1, 128], strides = [1, 1]} : vector<55x128xf32> to vector<1x128xf32>
    %40 = vector.extract_strided_slice %2 {offsets = [23, 0], sizes = [1, 128], strides = [1, 1]} : vector<55x128xf32> to vector<1x128xf32>
    %41 = vector.extract_strided_slice %2 {offsets = [24, 0], sizes = [1, 128], strides = [1, 1]} : vector<55x128xf32> to vector<1x128xf32>
    %42 = vector.extract_strided_slice %2 {offsets = [25, 0], sizes = [1, 128], strides = [1, 1]} : vector<55x128xf32> to vector<1x128xf32>
    %43 = vector.extract_strided_slice %2 {offsets = [26, 0], sizes = [1, 128], strides = [1, 1]} : vector<55x128xf32> to vector<1x128xf32>
    %44 = vector.extract_strided_slice %2 {offsets = [27, 0], sizes = [1, 128], strides = [1, 1]} : vector<55x128xf32> to vector<1x128xf32>
    %45 = vector.extract_strided_slice %2 {offsets = [28, 0], sizes = [1, 128], strides = [1, 1]} : vector<55x128xf32> to vector<1x128xf32>
    %46 = vector.extract_strided_slice %2 {offsets = [29, 0], sizes = [1, 128], strides = [1, 1]} : vector<55x128xf32> to vector<1x128xf32>
    %47 = vector.extract_strided_slice %2 {offsets = [30, 0], sizes = [1, 128], strides = [1, 1]} : vector<55x128xf32> to vector<1x128xf32>
    %48 = vector.extract_strided_slice %2 {offsets = [31, 0], sizes = [1, 128], strides = [1, 1]} : vector<55x128xf32> to vector<1x128xf32>
    %49 = vector.extract_strided_slice %2 {offsets = [32, 0], sizes = [1, 128], strides = [1, 1]} : vector<55x128xf32> to vector<1x128xf32>
    %50 = vector.extract_strided_slice %2 {offsets = [33, 0], sizes = [1, 128], strides = [1, 1]} : vector<55x128xf32> to vector<1x128xf32>
    %51 = vector.extract_strided_slice %2 {offsets = [34, 0], sizes = [1, 128], strides = [1, 1]} : vector<55x128xf32> to vector<1x128xf32>
    %52 = vector.extract_strided_slice %2 {offsets = [35, 0], sizes = [1, 128], strides = [1, 1]} : vector<55x128xf32> to vector<1x128xf32>
    %53 = vector.extract_strided_slice %2 {offsets = [36, 0], sizes = [1, 128], strides = [1, 1]} : vector<55x128xf32> to vector<1x128xf32>
    %54 = vector.extract_strided_slice %2 {offsets = [37, 0], sizes = [1, 128], strides = [1, 1]} : vector<55x128xf32> to vector<1x128xf32>
    %55 = vector.extract_strided_slice %2 {offsets = [38, 0], sizes = [1, 128], strides = [1, 1]} : vector<55x128xf32> to vector<1x128xf32>
    %56 = vector.extract_strided_slice %2 {offsets = [39, 0], sizes = [1, 128], strides = [1, 1]} : vector<55x128xf32> to vector<1x128xf32>
    %57 = vector.extract_strided_slice %2 {offsets = [40, 0], sizes = [1, 128], strides = [1, 1]} : vector<55x128xf32> to vector<1x128xf32>
    %58 = vector.extract_strided_slice %2 {offsets = [41, 0], sizes = [1, 128], strides = [1, 1]} : vector<55x128xf32> to vector<1x128xf32>
    %59 = vector.extract_strided_slice %2 {offsets = [42, 0], sizes = [1, 128], strides = [1, 1]} : vector<55x128xf32> to vector<1x128xf32>
    %60 = vector.extract_strided_slice %2 {offsets = [43, 0], sizes = [1, 128], strides = [1, 1]} : vector<55x128xf32> to vector<1x128xf32>
    %61 = vector.extract_strided_slice %2 {offsets = [44, 0], sizes = [1, 128], strides = [1, 1]} : vector<55x128xf32> to vector<1x128xf32>
    %62 = vector.extract_strided_slice %2 {offsets = [45, 0], sizes = [1, 128], strides = [1, 1]} : vector<55x128xf32> to vector<1x128xf32>
    %63 = vector.extract_strided_slice %2 {offsets = [46, 0], sizes = [1, 128], strides = [1, 1]} : vector<55x128xf32> to vector<1x128xf32>
    %64 = vector.extract_strided_slice %2 {offsets = [47, 0], sizes = [1, 128], strides = [1, 1]} : vector<55x128xf32> to vector<1x128xf32>
    %65 = vector.extract_strided_slice %2 {offsets = [48, 0], sizes = [1, 128], strides = [1, 1]} : vector<55x128xf32> to vector<1x128xf32>
    %66 = vector.extract_strided_slice %2 {offsets = [49, 0], sizes = [1, 128], strides = [1, 1]} : vector<55x128xf32> to vector<1x128xf32>
    %67 = vector.extract_strided_slice %2 {offsets = [50, 0], sizes = [1, 128], strides = [1, 1]} : vector<55x128xf32> to vector<1x128xf32>
    %68 = vector.extract_strided_slice %2 {offsets = [51, 0], sizes = [1, 128], strides = [1, 1]} : vector<55x128xf32> to vector<1x128xf32>
    %69 = vector.extract_strided_slice %2 {offsets = [52, 0], sizes = [1, 128], strides = [1, 1]} : vector<55x128xf32> to vector<1x128xf32>
    %70 = vector.extract_strided_slice %2 {offsets = [53, 0], sizes = [1, 128], strides = [1, 1]} : vector<55x128xf32> to vector<1x128xf32>
    %71 = vector.extract_strided_slice %2 {offsets = [54, 0], sizes = [1, 128], strides = [1, 1]} : vector<55x128xf32> to vector<1x128xf32>
    %72 = vector.broadcast %3 : vector<1x128xf32> to vector<8x128xf32>
    %73 = arith.cmpf oge, %0, %72 : vector<8x128xf32>
    %74 = arith.extui %73 : vector<8x128xi1> to vector<8x128xi32>
    %75 = arith.sitofp %74 : vector<8x128xi32> to vector<8x128xf32>
    %76 = vector.broadcast %4 : vector<1x128xf32> to vector<8x128xf32>
    %77 = arith.cmpf oge, %0, %76 : vector<8x128xf32>
    %78 = arith.extui %77 : vector<8x128xi1> to vector<8x128xi32>
    %79 = arith.sitofp %78 : vector<8x128xi32> to vector<8x128xf32>
    %80 = vector.broadcast %5 : vector<1x128xf32> to vector<8x128xf32>
    %81 = arith.cmpf oge, %0, %80 : vector<8x128xf32>
    %82 = arith.extui %81 : vector<8x128xi1> to vector<8x128xi32>
    %83 = arith.sitofp %82 : vector<8x128xi32> to vector<8x128xf32>
    %84 = vector.broadcast %6 : vector<1x128xf32> to vector<8x128xf32>
    %85 = arith.cmpf oge, %0, %84 : vector<8x128xf32>
    %86 = arith.extui %85 : vector<8x128xi1> to vector<8x128xi32>
    %87 = arith.sitofp %86 : vector<8x128xi32> to vector<8x128xf32>
    %88 = vector.broadcast %7 : vector<1x128xf32> to vector<8x128xf32>
    %89 = arith.cmpf oge, %0, %88 : vector<8x128xf32>
    %90 = arith.extui %89 : vector<8x128xi1> to vector<8x128xi32>
    %91 = arith.sitofp %90 : vector<8x128xi32> to vector<8x128xf32>
    %92 = vector.broadcast %8 : vector<1x128xf32> to vector<8x128xf32>
    %93 = arith.cmpf oge, %0, %92 : vector<8x128xf32>
    %94 = arith.extui %93 : vector<8x128xi1> to vector<8x128xi32>
    %95 = arith.sitofp %94 : vector<8x128xi32> to vector<8x128xf32>
    %96 = vector.broadcast %9 : vector<1x128xf32> to vector<8x128xf32>
    %97 = arith.cmpf oge, %0, %96 : vector<8x128xf32>
    %98 = arith.extui %97 : vector<8x128xi1> to vector<8x128xi32>
    %99 = arith.sitofp %98 : vector<8x128xi32> to vector<8x128xf32>
    %100 = vector.broadcast %10 : vector<1x128xf32> to vector<8x128xf32>
    %101 = arith.cmpf oge, %0, %100 : vector<8x128xf32>
    %102 = arith.extui %101 : vector<8x128xi1> to vector<8x128xi32>
    %103 = arith.sitofp %102 : vector<8x128xi32> to vector<8x128xf32>
    %104 = vector.broadcast %11 : vector<1x128xf32> to vector<8x128xf32>
    %105 = arith.cmpf oge, %0, %104 : vector<8x128xf32>
    %106 = arith.extui %105 : vector<8x128xi1> to vector<8x128xi32>
    %107 = arith.sitofp %106 : vector<8x128xi32> to vector<8x128xf32>
    %108 = vector.broadcast %12 : vector<1x128xf32> to vector<8x128xf32>
    %109 = arith.cmpf oge, %0, %108 : vector<8x128xf32>
    %110 = arith.extui %109 : vector<8x128xi1> to vector<8x128xi32>
    %111 = arith.sitofp %110 : vector<8x128xi32> to vector<8x128xf32>
    %112 = vector.broadcast %13 : vector<1x128xf32> to vector<8x128xf32>
    %113 = arith.cmpf oge, %0, %112 : vector<8x128xf32>
    %114 = arith.extui %113 : vector<8x128xi1> to vector<8x128xi32>
    %115 = arith.sitofp %114 : vector<8x128xi32> to vector<8x128xf32>
    %116 = vector.broadcast %14 : vector<1x128xf32> to vector<8x128xf32>
    %117 = arith.cmpf oge, %0, %116 : vector<8x128xf32>
    %118 = arith.extui %117 : vector<8x128xi1> to vector<8x128xi32>
    %119 = arith.sitofp %118 : vector<8x128xi32> to vector<8x128xf32>
    %120 = vector.broadcast %15 : vector<1x128xf32> to vector<8x128xf32>
    %121 = arith.cmpf oge, %0, %120 : vector<8x128xf32>
    %122 = arith.extui %121 : vector<8x128xi1> to vector<8x128xi32>
    %123 = arith.sitofp %122 : vector<8x128xi32> to vector<8x128xf32>
    %124 = vector.broadcast %16 : vector<1x128xf32> to vector<8x128xf32>
    %125 = arith.cmpf oge, %0, %124 : vector<8x128xf32>
    %126 = arith.extui %125 : vector<8x128xi1> to vector<8x128xi32>
    %127 = arith.sitofp %126 : vector<8x128xi32> to vector<8x128xf32>
    %128 = arith.subf %75, %79 : vector<8x128xf32>
    %129 = arith.subf %79, %83 : vector<8x128xf32>
    %130 = arith.subf %83, %87 : vector<8x128xf32>
    %131 = arith.subf %87, %91 : vector<8x128xf32>
    %132 = arith.subf %91, %95 : vector<8x128xf32>
    %133 = arith.subf %95, %99 : vector<8x128xf32>
    %134 = arith.subf %99, %103 : vector<8x128xf32>
    %135 = arith.subf %103, %107 : vector<8x128xf32>
    %136 = arith.subf %107, %111 : vector<8x128xf32>
    %137 = arith.subf %111, %115 : vector<8x128xf32>
    %138 = arith.subf %115, %119 : vector<8x128xf32>
    %139 = arith.subf %119, %123 : vector<8x128xf32>
    %140 = arith.subf %123, %127 : vector<8x128xf32>
    %141 = vector.broadcast %3 : vector<1x128xf32> to vector<8x128xf32>
    %142 = arith.subf %0, %141 : vector<8x128xf32>
    %143 = vector.broadcast %17 : vector<1x128xf32> to vector<8x128xf32>
    %144 = arith.mulf %142, %143 : vector<8x128xf32>
    %145 = arith.mulf %144, %128 : vector<8x128xf32>
    %146 = vector.broadcast %5 : vector<1x128xf32> to vector<8x128xf32>
    %147 = arith.subf %146, %0 : vector<8x128xf32>
    %148 = vector.broadcast %18 : vector<1x128xf32> to vector<8x128xf32>
    %149 = arith.mulf %147, %148 : vector<8x128xf32>
    %150 = arith.mulf %149, %129 : vector<8x128xf32>
    %151 = arith.addf %145, %150 : vector<8x128xf32>
    %152 = vector.broadcast %4 : vector<1x128xf32> to vector<8x128xf32>
    %153 = arith.subf %0, %152 : vector<8x128xf32>
    %154 = vector.broadcast %18 : vector<1x128xf32> to vector<8x128xf32>
    %155 = arith.mulf %153, %154 : vector<8x128xf32>
    %156 = arith.mulf %155, %129 : vector<8x128xf32>
    %157 = vector.broadcast %6 : vector<1x128xf32> to vector<8x128xf32>
    %158 = arith.subf %157, %0 : vector<8x128xf32>
    %159 = vector.broadcast %19 : vector<1x128xf32> to vector<8x128xf32>
    %160 = arith.mulf %158, %159 : vector<8x128xf32>
    %161 = arith.mulf %160, %130 : vector<8x128xf32>
    %162 = arith.addf %156, %161 : vector<8x128xf32>
    %163 = vector.broadcast %5 : vector<1x128xf32> to vector<8x128xf32>
    %164 = arith.subf %0, %163 : vector<8x128xf32>
    %165 = vector.broadcast %19 : vector<1x128xf32> to vector<8x128xf32>
    %166 = arith.mulf %164, %165 : vector<8x128xf32>
    %167 = arith.mulf %166, %130 : vector<8x128xf32>
    %168 = vector.broadcast %7 : vector<1x128xf32> to vector<8x128xf32>
    %169 = arith.subf %168, %0 : vector<8x128xf32>
    %170 = vector.broadcast %20 : vector<1x128xf32> to vector<8x128xf32>
    %171 = arith.mulf %169, %170 : vector<8x128xf32>
    %172 = arith.mulf %171, %131 : vector<8x128xf32>
    %173 = arith.addf %167, %172 : vector<8x128xf32>
    %174 = vector.broadcast %6 : vector<1x128xf32> to vector<8x128xf32>
    %175 = arith.subf %0, %174 : vector<8x128xf32>
    %176 = vector.broadcast %20 : vector<1x128xf32> to vector<8x128xf32>
    %177 = arith.mulf %175, %176 : vector<8x128xf32>
    %178 = arith.mulf %177, %131 : vector<8x128xf32>
    %179 = vector.broadcast %8 : vector<1x128xf32> to vector<8x128xf32>
    %180 = arith.subf %179, %0 : vector<8x128xf32>
    %181 = vector.broadcast %21 : vector<1x128xf32> to vector<8x128xf32>
    %182 = arith.mulf %180, %181 : vector<8x128xf32>
    %183 = arith.mulf %182, %132 : vector<8x128xf32>
    %184 = arith.addf %178, %183 : vector<8x128xf32>
    %185 = vector.broadcast %7 : vector<1x128xf32> to vector<8x128xf32>
    %186 = arith.subf %0, %185 : vector<8x128xf32>
    %187 = vector.broadcast %21 : vector<1x128xf32> to vector<8x128xf32>
    %188 = arith.mulf %186, %187 : vector<8x128xf32>
    %189 = arith.mulf %188, %132 : vector<8x128xf32>
    %190 = vector.broadcast %9 : vector<1x128xf32> to vector<8x128xf32>
    %191 = arith.subf %190, %0 : vector<8x128xf32>
    %192 = vector.broadcast %22 : vector<1x128xf32> to vector<8x128xf32>
    %193 = arith.mulf %191, %192 : vector<8x128xf32>
    %194 = arith.mulf %193, %133 : vector<8x128xf32>
    %195 = arith.addf %189, %194 : vector<8x128xf32>
    %196 = vector.broadcast %8 : vector<1x128xf32> to vector<8x128xf32>
    %197 = arith.subf %0, %196 : vector<8x128xf32>
    %198 = vector.broadcast %22 : vector<1x128xf32> to vector<8x128xf32>
    %199 = arith.mulf %197, %198 : vector<8x128xf32>
    %200 = arith.mulf %199, %133 : vector<8x128xf32>
    %201 = vector.broadcast %10 : vector<1x128xf32> to vector<8x128xf32>
    %202 = arith.subf %201, %0 : vector<8x128xf32>
    %203 = vector.broadcast %23 : vector<1x128xf32> to vector<8x128xf32>
    %204 = arith.mulf %202, %203 : vector<8x128xf32>
    %205 = arith.mulf %204, %134 : vector<8x128xf32>
    %206 = arith.addf %200, %205 : vector<8x128xf32>
    %207 = vector.broadcast %9 : vector<1x128xf32> to vector<8x128xf32>
    %208 = arith.subf %0, %207 : vector<8x128xf32>
    %209 = vector.broadcast %23 : vector<1x128xf32> to vector<8x128xf32>
    %210 = arith.mulf %208, %209 : vector<8x128xf32>
    %211 = arith.mulf %210, %134 : vector<8x128xf32>
    %212 = vector.broadcast %11 : vector<1x128xf32> to vector<8x128xf32>
    %213 = arith.subf %212, %0 : vector<8x128xf32>
    %214 = vector.broadcast %24 : vector<1x128xf32> to vector<8x128xf32>
    %215 = arith.mulf %213, %214 : vector<8x128xf32>
    %216 = arith.mulf %215, %135 : vector<8x128xf32>
    %217 = arith.addf %211, %216 : vector<8x128xf32>
    %218 = vector.broadcast %10 : vector<1x128xf32> to vector<8x128xf32>
    %219 = arith.subf %0, %218 : vector<8x128xf32>
    %220 = vector.broadcast %24 : vector<1x128xf32> to vector<8x128xf32>
    %221 = arith.mulf %219, %220 : vector<8x128xf32>
    %222 = arith.mulf %221, %135 : vector<8x128xf32>
    %223 = vector.broadcast %12 : vector<1x128xf32> to vector<8x128xf32>
    %224 = arith.subf %223, %0 : vector<8x128xf32>
    %225 = vector.broadcast %25 : vector<1x128xf32> to vector<8x128xf32>
    %226 = arith.mulf %224, %225 : vector<8x128xf32>
    %227 = arith.mulf %226, %136 : vector<8x128xf32>
    %228 = arith.addf %222, %227 : vector<8x128xf32>
    %229 = vector.broadcast %11 : vector<1x128xf32> to vector<8x128xf32>
    %230 = arith.subf %0, %229 : vector<8x128xf32>
    %231 = vector.broadcast %25 : vector<1x128xf32> to vector<8x128xf32>
    %232 = arith.mulf %230, %231 : vector<8x128xf32>
    %233 = arith.mulf %232, %136 : vector<8x128xf32>
    %234 = vector.broadcast %13 : vector<1x128xf32> to vector<8x128xf32>
    %235 = arith.subf %234, %0 : vector<8x128xf32>
    %236 = vector.broadcast %26 : vector<1x128xf32> to vector<8x128xf32>
    %237 = arith.mulf %235, %236 : vector<8x128xf32>
    %238 = arith.mulf %237, %137 : vector<8x128xf32>
    %239 = arith.addf %233, %238 : vector<8x128xf32>
    %240 = vector.broadcast %12 : vector<1x128xf32> to vector<8x128xf32>
    %241 = arith.subf %0, %240 : vector<8x128xf32>
    %242 = vector.broadcast %26 : vector<1x128xf32> to vector<8x128xf32>
    %243 = arith.mulf %241, %242 : vector<8x128xf32>
    %244 = arith.mulf %243, %137 : vector<8x128xf32>
    %245 = vector.broadcast %14 : vector<1x128xf32> to vector<8x128xf32>
    %246 = arith.subf %245, %0 : vector<8x128xf32>
    %247 = vector.broadcast %27 : vector<1x128xf32> to vector<8x128xf32>
    %248 = arith.mulf %246, %247 : vector<8x128xf32>
    %249 = arith.mulf %248, %138 : vector<8x128xf32>
    %250 = arith.addf %244, %249 : vector<8x128xf32>
    %251 = vector.broadcast %13 : vector<1x128xf32> to vector<8x128xf32>
    %252 = arith.subf %0, %251 : vector<8x128xf32>
    %253 = vector.broadcast %27 : vector<1x128xf32> to vector<8x128xf32>
    %254 = arith.mulf %252, %253 : vector<8x128xf32>
    %255 = arith.mulf %254, %138 : vector<8x128xf32>
    %256 = vector.broadcast %15 : vector<1x128xf32> to vector<8x128xf32>
    %257 = arith.subf %256, %0 : vector<8x128xf32>
    %258 = vector.broadcast %28 : vector<1x128xf32> to vector<8x128xf32>
    %259 = arith.mulf %257, %258 : vector<8x128xf32>
    %260 = arith.mulf %259, %139 : vector<8x128xf32>
    %261 = arith.addf %255, %260 : vector<8x128xf32>
    %262 = vector.broadcast %14 : vector<1x128xf32> to vector<8x128xf32>
    %263 = arith.subf %0, %262 : vector<8x128xf32>
    %264 = vector.broadcast %28 : vector<1x128xf32> to vector<8x128xf32>
    %265 = arith.mulf %263, %264 : vector<8x128xf32>
    %266 = arith.mulf %265, %139 : vector<8x128xf32>
    %267 = vector.broadcast %16 : vector<1x128xf32> to vector<8x128xf32>
    %268 = arith.subf %267, %0 : vector<8x128xf32>
    %269 = vector.broadcast %29 : vector<1x128xf32> to vector<8x128xf32>
    %270 = arith.mulf %268, %269 : vector<8x128xf32>
    %271 = arith.mulf %270, %140 : vector<8x128xf32>
    %272 = arith.addf %266, %271 : vector<8x128xf32>
    %273 = vector.broadcast %3 : vector<1x128xf32> to vector<8x128xf32>
    %274 = arith.subf %0, %273 : vector<8x128xf32>
    %275 = vector.broadcast %30 : vector<1x128xf32> to vector<8x128xf32>
    %276 = arith.mulf %274, %275 : vector<8x128xf32>
    %277 = arith.mulf %276, %151 : vector<8x128xf32>
    %278 = vector.broadcast %6 : vector<1x128xf32> to vector<8x128xf32>
    %279 = arith.subf %278, %0 : vector<8x128xf32>
    %280 = vector.broadcast %31 : vector<1x128xf32> to vector<8x128xf32>
    %281 = arith.mulf %279, %280 : vector<8x128xf32>
    %282 = arith.mulf %281, %162 : vector<8x128xf32>
    %283 = arith.addf %277, %282 : vector<8x128xf32>
    %284 = vector.broadcast %4 : vector<1x128xf32> to vector<8x128xf32>
    %285 = arith.subf %0, %284 : vector<8x128xf32>
    %286 = vector.broadcast %31 : vector<1x128xf32> to vector<8x128xf32>
    %287 = arith.mulf %285, %286 : vector<8x128xf32>
    %288 = arith.mulf %287, %162 : vector<8x128xf32>
    %289 = vector.broadcast %7 : vector<1x128xf32> to vector<8x128xf32>
    %290 = arith.subf %289, %0 : vector<8x128xf32>
    %291 = vector.broadcast %32 : vector<1x128xf32> to vector<8x128xf32>
    %292 = arith.mulf %290, %291 : vector<8x128xf32>
    %293 = arith.mulf %292, %173 : vector<8x128xf32>
    %294 = arith.addf %288, %293 : vector<8x128xf32>
    %295 = vector.broadcast %5 : vector<1x128xf32> to vector<8x128xf32>
    %296 = arith.subf %0, %295 : vector<8x128xf32>
    %297 = vector.broadcast %32 : vector<1x128xf32> to vector<8x128xf32>
    %298 = arith.mulf %296, %297 : vector<8x128xf32>
    %299 = arith.mulf %298, %173 : vector<8x128xf32>
    %300 = vector.broadcast %8 : vector<1x128xf32> to vector<8x128xf32>
    %301 = arith.subf %300, %0 : vector<8x128xf32>
    %302 = vector.broadcast %33 : vector<1x128xf32> to vector<8x128xf32>
    %303 = arith.mulf %301, %302 : vector<8x128xf32>
    %304 = arith.mulf %303, %184 : vector<8x128xf32>
    %305 = arith.addf %299, %304 : vector<8x128xf32>
    %306 = vector.broadcast %6 : vector<1x128xf32> to vector<8x128xf32>
    %307 = arith.subf %0, %306 : vector<8x128xf32>
    %308 = vector.broadcast %33 : vector<1x128xf32> to vector<8x128xf32>
    %309 = arith.mulf %307, %308 : vector<8x128xf32>
    %310 = arith.mulf %309, %184 : vector<8x128xf32>
    %311 = vector.broadcast %9 : vector<1x128xf32> to vector<8x128xf32>
    %312 = arith.subf %311, %0 : vector<8x128xf32>
    %313 = vector.broadcast %34 : vector<1x128xf32> to vector<8x128xf32>
    %314 = arith.mulf %312, %313 : vector<8x128xf32>
    %315 = arith.mulf %314, %195 : vector<8x128xf32>
    %316 = arith.addf %310, %315 : vector<8x128xf32>
    %317 = vector.broadcast %7 : vector<1x128xf32> to vector<8x128xf32>
    %318 = arith.subf %0, %317 : vector<8x128xf32>
    %319 = vector.broadcast %34 : vector<1x128xf32> to vector<8x128xf32>
    %320 = arith.mulf %318, %319 : vector<8x128xf32>
    %321 = arith.mulf %320, %195 : vector<8x128xf32>
    %322 = vector.broadcast %10 : vector<1x128xf32> to vector<8x128xf32>
    %323 = arith.subf %322, %0 : vector<8x128xf32>
    %324 = vector.broadcast %35 : vector<1x128xf32> to vector<8x128xf32>
    %325 = arith.mulf %323, %324 : vector<8x128xf32>
    %326 = arith.mulf %325, %206 : vector<8x128xf32>
    %327 = arith.addf %321, %326 : vector<8x128xf32>
    %328 = vector.broadcast %8 : vector<1x128xf32> to vector<8x128xf32>
    %329 = arith.subf %0, %328 : vector<8x128xf32>
    %330 = vector.broadcast %35 : vector<1x128xf32> to vector<8x128xf32>
    %331 = arith.mulf %329, %330 : vector<8x128xf32>
    %332 = arith.mulf %331, %206 : vector<8x128xf32>
    %333 = vector.broadcast %11 : vector<1x128xf32> to vector<8x128xf32>
    %334 = arith.subf %333, %0 : vector<8x128xf32>
    %335 = vector.broadcast %36 : vector<1x128xf32> to vector<8x128xf32>
    %336 = arith.mulf %334, %335 : vector<8x128xf32>
    %337 = arith.mulf %336, %217 : vector<8x128xf32>
    %338 = arith.addf %332, %337 : vector<8x128xf32>
    %339 = vector.broadcast %9 : vector<1x128xf32> to vector<8x128xf32>
    %340 = arith.subf %0, %339 : vector<8x128xf32>
    %341 = vector.broadcast %36 : vector<1x128xf32> to vector<8x128xf32>
    %342 = arith.mulf %340, %341 : vector<8x128xf32>
    %343 = arith.mulf %342, %217 : vector<8x128xf32>
    %344 = vector.broadcast %12 : vector<1x128xf32> to vector<8x128xf32>
    %345 = arith.subf %344, %0 : vector<8x128xf32>
    %346 = vector.broadcast %37 : vector<1x128xf32> to vector<8x128xf32>
    %347 = arith.mulf %345, %346 : vector<8x128xf32>
    %348 = arith.mulf %347, %228 : vector<8x128xf32>
    %349 = arith.addf %343, %348 : vector<8x128xf32>
    %350 = vector.broadcast %10 : vector<1x128xf32> to vector<8x128xf32>
    %351 = arith.subf %0, %350 : vector<8x128xf32>
    %352 = vector.broadcast %37 : vector<1x128xf32> to vector<8x128xf32>
    %353 = arith.mulf %351, %352 : vector<8x128xf32>
    %354 = arith.mulf %353, %228 : vector<8x128xf32>
    %355 = vector.broadcast %13 : vector<1x128xf32> to vector<8x128xf32>
    %356 = arith.subf %355, %0 : vector<8x128xf32>
    %357 = vector.broadcast %38 : vector<1x128xf32> to vector<8x128xf32>
    %358 = arith.mulf %356, %357 : vector<8x128xf32>
    %359 = arith.mulf %358, %239 : vector<8x128xf32>
    %360 = arith.addf %354, %359 : vector<8x128xf32>
    %361 = vector.broadcast %11 : vector<1x128xf32> to vector<8x128xf32>
    %362 = arith.subf %0, %361 : vector<8x128xf32>
    %363 = vector.broadcast %38 : vector<1x128xf32> to vector<8x128xf32>
    %364 = arith.mulf %362, %363 : vector<8x128xf32>
    %365 = arith.mulf %364, %239 : vector<8x128xf32>
    %366 = vector.broadcast %14 : vector<1x128xf32> to vector<8x128xf32>
    %367 = arith.subf %366, %0 : vector<8x128xf32>
    %368 = vector.broadcast %39 : vector<1x128xf32> to vector<8x128xf32>
    %369 = arith.mulf %367, %368 : vector<8x128xf32>
    %370 = arith.mulf %369, %250 : vector<8x128xf32>
    %371 = arith.addf %365, %370 : vector<8x128xf32>
    %372 = vector.broadcast %12 : vector<1x128xf32> to vector<8x128xf32>
    %373 = arith.subf %0, %372 : vector<8x128xf32>
    %374 = vector.broadcast %39 : vector<1x128xf32> to vector<8x128xf32>
    %375 = arith.mulf %373, %374 : vector<8x128xf32>
    %376 = arith.mulf %375, %250 : vector<8x128xf32>
    %377 = vector.broadcast %15 : vector<1x128xf32> to vector<8x128xf32>
    %378 = arith.subf %377, %0 : vector<8x128xf32>
    %379 = vector.broadcast %40 : vector<1x128xf32> to vector<8x128xf32>
    %380 = arith.mulf %378, %379 : vector<8x128xf32>
    %381 = arith.mulf %380, %261 : vector<8x128xf32>
    %382 = arith.addf %376, %381 : vector<8x128xf32>
    %383 = vector.broadcast %13 : vector<1x128xf32> to vector<8x128xf32>
    %384 = arith.subf %0, %383 : vector<8x128xf32>
    %385 = vector.broadcast %40 : vector<1x128xf32> to vector<8x128xf32>
    %386 = arith.mulf %384, %385 : vector<8x128xf32>
    %387 = arith.mulf %386, %261 : vector<8x128xf32>
    %388 = vector.broadcast %16 : vector<1x128xf32> to vector<8x128xf32>
    %389 = arith.subf %388, %0 : vector<8x128xf32>
    %390 = vector.broadcast %41 : vector<1x128xf32> to vector<8x128xf32>
    %391 = arith.mulf %389, %390 : vector<8x128xf32>
    %392 = arith.mulf %391, %272 : vector<8x128xf32>
    %393 = arith.addf %387, %392 : vector<8x128xf32>
    %394 = vector.broadcast %3 : vector<1x128xf32> to vector<8x128xf32>
    %395 = arith.subf %0, %394 : vector<8x128xf32>
    %396 = vector.broadcast %42 : vector<1x128xf32> to vector<8x128xf32>
    %397 = arith.mulf %395, %396 : vector<8x128xf32>
    %398 = arith.mulf %397, %283 : vector<8x128xf32>
    %399 = vector.broadcast %7 : vector<1x128xf32> to vector<8x128xf32>
    %400 = arith.subf %399, %0 : vector<8x128xf32>
    %401 = vector.broadcast %43 : vector<1x128xf32> to vector<8x128xf32>
    %402 = arith.mulf %400, %401 : vector<8x128xf32>
    %403 = arith.mulf %402, %294 : vector<8x128xf32>
    %404 = arith.addf %398, %403 : vector<8x128xf32>
    %405 = vector.broadcast %4 : vector<1x128xf32> to vector<8x128xf32>
    %406 = arith.subf %0, %405 : vector<8x128xf32>
    %407 = vector.broadcast %43 : vector<1x128xf32> to vector<8x128xf32>
    %408 = arith.mulf %406, %407 : vector<8x128xf32>
    %409 = arith.mulf %408, %294 : vector<8x128xf32>
    %410 = vector.broadcast %8 : vector<1x128xf32> to vector<8x128xf32>
    %411 = arith.subf %410, %0 : vector<8x128xf32>
    %412 = vector.broadcast %44 : vector<1x128xf32> to vector<8x128xf32>
    %413 = arith.mulf %411, %412 : vector<8x128xf32>
    %414 = arith.mulf %413, %305 : vector<8x128xf32>
    %415 = arith.addf %409, %414 : vector<8x128xf32>
    %416 = vector.broadcast %5 : vector<1x128xf32> to vector<8x128xf32>
    %417 = arith.subf %0, %416 : vector<8x128xf32>
    %418 = vector.broadcast %44 : vector<1x128xf32> to vector<8x128xf32>
    %419 = arith.mulf %417, %418 : vector<8x128xf32>
    %420 = arith.mulf %419, %305 : vector<8x128xf32>
    %421 = vector.broadcast %9 : vector<1x128xf32> to vector<8x128xf32>
    %422 = arith.subf %421, %0 : vector<8x128xf32>
    %423 = vector.broadcast %45 : vector<1x128xf32> to vector<8x128xf32>
    %424 = arith.mulf %422, %423 : vector<8x128xf32>
    %425 = arith.mulf %424, %316 : vector<8x128xf32>
    %426 = arith.addf %420, %425 : vector<8x128xf32>
    %427 = vector.broadcast %6 : vector<1x128xf32> to vector<8x128xf32>
    %428 = arith.subf %0, %427 : vector<8x128xf32>
    %429 = vector.broadcast %45 : vector<1x128xf32> to vector<8x128xf32>
    %430 = arith.mulf %428, %429 : vector<8x128xf32>
    %431 = arith.mulf %430, %316 : vector<8x128xf32>
    %432 = vector.broadcast %10 : vector<1x128xf32> to vector<8x128xf32>
    %433 = arith.subf %432, %0 : vector<8x128xf32>
    %434 = vector.broadcast %46 : vector<1x128xf32> to vector<8x128xf32>
    %435 = arith.mulf %433, %434 : vector<8x128xf32>
    %436 = arith.mulf %435, %327 : vector<8x128xf32>
    %437 = arith.addf %431, %436 : vector<8x128xf32>
    %438 = vector.broadcast %7 : vector<1x128xf32> to vector<8x128xf32>
    %439 = arith.subf %0, %438 : vector<8x128xf32>
    %440 = vector.broadcast %46 : vector<1x128xf32> to vector<8x128xf32>
    %441 = arith.mulf %439, %440 : vector<8x128xf32>
    %442 = arith.mulf %441, %327 : vector<8x128xf32>
    %443 = vector.broadcast %11 : vector<1x128xf32> to vector<8x128xf32>
    %444 = arith.subf %443, %0 : vector<8x128xf32>
    %445 = vector.broadcast %47 : vector<1x128xf32> to vector<8x128xf32>
    %446 = arith.mulf %444, %445 : vector<8x128xf32>
    %447 = arith.mulf %446, %338 : vector<8x128xf32>
    %448 = arith.addf %442, %447 : vector<8x128xf32>
    %449 = vector.broadcast %8 : vector<1x128xf32> to vector<8x128xf32>
    %450 = arith.subf %0, %449 : vector<8x128xf32>
    %451 = vector.broadcast %47 : vector<1x128xf32> to vector<8x128xf32>
    %452 = arith.mulf %450, %451 : vector<8x128xf32>
    %453 = arith.mulf %452, %338 : vector<8x128xf32>
    %454 = vector.broadcast %12 : vector<1x128xf32> to vector<8x128xf32>
    %455 = arith.subf %454, %0 : vector<8x128xf32>
    %456 = vector.broadcast %48 : vector<1x128xf32> to vector<8x128xf32>
    %457 = arith.mulf %455, %456 : vector<8x128xf32>
    %458 = arith.mulf %457, %349 : vector<8x128xf32>
    %459 = arith.addf %453, %458 : vector<8x128xf32>
    %460 = vector.broadcast %9 : vector<1x128xf32> to vector<8x128xf32>
    %461 = arith.subf %0, %460 : vector<8x128xf32>
    %462 = vector.broadcast %48 : vector<1x128xf32> to vector<8x128xf32>
    %463 = arith.mulf %461, %462 : vector<8x128xf32>
    %464 = arith.mulf %463, %349 : vector<8x128xf32>
    %465 = vector.broadcast %13 : vector<1x128xf32> to vector<8x128xf32>
    %466 = arith.subf %465, %0 : vector<8x128xf32>
    %467 = vector.broadcast %49 : vector<1x128xf32> to vector<8x128xf32>
    %468 = arith.mulf %466, %467 : vector<8x128xf32>
    %469 = arith.mulf %468, %360 : vector<8x128xf32>
    %470 = arith.addf %464, %469 : vector<8x128xf32>
    %471 = vector.broadcast %10 : vector<1x128xf32> to vector<8x128xf32>
    %472 = arith.subf %0, %471 : vector<8x128xf32>
    %473 = vector.broadcast %49 : vector<1x128xf32> to vector<8x128xf32>
    %474 = arith.mulf %472, %473 : vector<8x128xf32>
    %475 = arith.mulf %474, %360 : vector<8x128xf32>
    %476 = vector.broadcast %14 : vector<1x128xf32> to vector<8x128xf32>
    %477 = arith.subf %476, %0 : vector<8x128xf32>
    %478 = vector.broadcast %50 : vector<1x128xf32> to vector<8x128xf32>
    %479 = arith.mulf %477, %478 : vector<8x128xf32>
    %480 = arith.mulf %479, %371 : vector<8x128xf32>
    %481 = arith.addf %475, %480 : vector<8x128xf32>
    %482 = vector.broadcast %11 : vector<1x128xf32> to vector<8x128xf32>
    %483 = arith.subf %0, %482 : vector<8x128xf32>
    %484 = vector.broadcast %50 : vector<1x128xf32> to vector<8x128xf32>
    %485 = arith.mulf %483, %484 : vector<8x128xf32>
    %486 = arith.mulf %485, %371 : vector<8x128xf32>
    %487 = vector.broadcast %15 : vector<1x128xf32> to vector<8x128xf32>
    %488 = arith.subf %487, %0 : vector<8x128xf32>
    %489 = vector.broadcast %51 : vector<1x128xf32> to vector<8x128xf32>
    %490 = arith.mulf %488, %489 : vector<8x128xf32>
    %491 = arith.mulf %490, %382 : vector<8x128xf32>
    %492 = arith.addf %486, %491 : vector<8x128xf32>
    %493 = vector.broadcast %12 : vector<1x128xf32> to vector<8x128xf32>
    %494 = arith.subf %0, %493 : vector<8x128xf32>
    %495 = vector.broadcast %51 : vector<1x128xf32> to vector<8x128xf32>
    %496 = arith.mulf %494, %495 : vector<8x128xf32>
    %497 = arith.mulf %496, %382 : vector<8x128xf32>
    %498 = vector.broadcast %16 : vector<1x128xf32> to vector<8x128xf32>
    %499 = arith.subf %498, %0 : vector<8x128xf32>
    %500 = vector.broadcast %52 : vector<1x128xf32> to vector<8x128xf32>
    %501 = arith.mulf %499, %500 : vector<8x128xf32>
    %502 = arith.mulf %501, %393 : vector<8x128xf32>
    %503 = arith.addf %497, %502 : vector<8x128xf32>
    %504 = vector.broadcast %3 : vector<1x128xf32> to vector<8x128xf32>
    %505 = arith.subf %0, %504 : vector<8x128xf32>
    %506 = vector.broadcast %53 : vector<1x128xf32> to vector<8x128xf32>
    %507 = arith.mulf %505, %506 : vector<8x128xf32>
    %508 = arith.mulf %507, %404 : vector<8x128xf32>
    %509 = vector.broadcast %8 : vector<1x128xf32> to vector<8x128xf32>
    %510 = arith.subf %509, %0 : vector<8x128xf32>
    %511 = vector.broadcast %54 : vector<1x128xf32> to vector<8x128xf32>
    %512 = arith.mulf %510, %511 : vector<8x128xf32>
    %513 = arith.mulf %512, %415 : vector<8x128xf32>
    %514 = arith.addf %508, %513 : vector<8x128xf32>
    %515 = vector.broadcast %4 : vector<1x128xf32> to vector<8x128xf32>
    %516 = arith.subf %0, %515 : vector<8x128xf32>
    %517 = vector.broadcast %54 : vector<1x128xf32> to vector<8x128xf32>
    %518 = arith.mulf %516, %517 : vector<8x128xf32>
    %519 = arith.mulf %518, %415 : vector<8x128xf32>
    %520 = vector.broadcast %9 : vector<1x128xf32> to vector<8x128xf32>
    %521 = arith.subf %520, %0 : vector<8x128xf32>
    %522 = vector.broadcast %55 : vector<1x128xf32> to vector<8x128xf32>
    %523 = arith.mulf %521, %522 : vector<8x128xf32>
    %524 = arith.mulf %523, %426 : vector<8x128xf32>
    %525 = arith.addf %519, %524 : vector<8x128xf32>
    %526 = vector.broadcast %5 : vector<1x128xf32> to vector<8x128xf32>
    %527 = arith.subf %0, %526 : vector<8x128xf32>
    %528 = vector.broadcast %55 : vector<1x128xf32> to vector<8x128xf32>
    %529 = arith.mulf %527, %528 : vector<8x128xf32>
    %530 = arith.mulf %529, %426 : vector<8x128xf32>
    %531 = vector.broadcast %10 : vector<1x128xf32> to vector<8x128xf32>
    %532 = arith.subf %531, %0 : vector<8x128xf32>
    %533 = vector.broadcast %56 : vector<1x128xf32> to vector<8x128xf32>
    %534 = arith.mulf %532, %533 : vector<8x128xf32>
    %535 = arith.mulf %534, %437 : vector<8x128xf32>
    %536 = arith.addf %530, %535 : vector<8x128xf32>
    %537 = vector.broadcast %6 : vector<1x128xf32> to vector<8x128xf32>
    %538 = arith.subf %0, %537 : vector<8x128xf32>
    %539 = vector.broadcast %56 : vector<1x128xf32> to vector<8x128xf32>
    %540 = arith.mulf %538, %539 : vector<8x128xf32>
    %541 = arith.mulf %540, %437 : vector<8x128xf32>
    %542 = vector.broadcast %11 : vector<1x128xf32> to vector<8x128xf32>
    %543 = arith.subf %542, %0 : vector<8x128xf32>
    %544 = vector.broadcast %57 : vector<1x128xf32> to vector<8x128xf32>
    %545 = arith.mulf %543, %544 : vector<8x128xf32>
    %546 = arith.mulf %545, %448 : vector<8x128xf32>
    %547 = arith.addf %541, %546 : vector<8x128xf32>
    %548 = vector.broadcast %7 : vector<1x128xf32> to vector<8x128xf32>
    %549 = arith.subf %0, %548 : vector<8x128xf32>
    %550 = vector.broadcast %57 : vector<1x128xf32> to vector<8x128xf32>
    %551 = arith.mulf %549, %550 : vector<8x128xf32>
    %552 = arith.mulf %551, %448 : vector<8x128xf32>
    %553 = vector.broadcast %12 : vector<1x128xf32> to vector<8x128xf32>
    %554 = arith.subf %553, %0 : vector<8x128xf32>
    %555 = vector.broadcast %58 : vector<1x128xf32> to vector<8x128xf32>
    %556 = arith.mulf %554, %555 : vector<8x128xf32>
    %557 = arith.mulf %556, %459 : vector<8x128xf32>
    %558 = arith.addf %552, %557 : vector<8x128xf32>
    %559 = vector.broadcast %8 : vector<1x128xf32> to vector<8x128xf32>
    %560 = arith.subf %0, %559 : vector<8x128xf32>
    %561 = vector.broadcast %58 : vector<1x128xf32> to vector<8x128xf32>
    %562 = arith.mulf %560, %561 : vector<8x128xf32>
    %563 = arith.mulf %562, %459 : vector<8x128xf32>
    %564 = vector.broadcast %13 : vector<1x128xf32> to vector<8x128xf32>
    %565 = arith.subf %564, %0 : vector<8x128xf32>
    %566 = vector.broadcast %59 : vector<1x128xf32> to vector<8x128xf32>
    %567 = arith.mulf %565, %566 : vector<8x128xf32>
    %568 = arith.mulf %567, %470 : vector<8x128xf32>
    %569 = arith.addf %563, %568 : vector<8x128xf32>
    %570 = vector.broadcast %9 : vector<1x128xf32> to vector<8x128xf32>
    %571 = arith.subf %0, %570 : vector<8x128xf32>
    %572 = vector.broadcast %59 : vector<1x128xf32> to vector<8x128xf32>
    %573 = arith.mulf %571, %572 : vector<8x128xf32>
    %574 = arith.mulf %573, %470 : vector<8x128xf32>
    %575 = vector.broadcast %14 : vector<1x128xf32> to vector<8x128xf32>
    %576 = arith.subf %575, %0 : vector<8x128xf32>
    %577 = vector.broadcast %60 : vector<1x128xf32> to vector<8x128xf32>
    %578 = arith.mulf %576, %577 : vector<8x128xf32>
    %579 = arith.mulf %578, %481 : vector<8x128xf32>
    %580 = arith.addf %574, %579 : vector<8x128xf32>
    %581 = vector.broadcast %10 : vector<1x128xf32> to vector<8x128xf32>
    %582 = arith.subf %0, %581 : vector<8x128xf32>
    %583 = vector.broadcast %60 : vector<1x128xf32> to vector<8x128xf32>
    %584 = arith.mulf %582, %583 : vector<8x128xf32>
    %585 = arith.mulf %584, %481 : vector<8x128xf32>
    %586 = vector.broadcast %15 : vector<1x128xf32> to vector<8x128xf32>
    %587 = arith.subf %586, %0 : vector<8x128xf32>
    %588 = vector.broadcast %61 : vector<1x128xf32> to vector<8x128xf32>
    %589 = arith.mulf %587, %588 : vector<8x128xf32>
    %590 = arith.mulf %589, %492 : vector<8x128xf32>
    %591 = arith.addf %585, %590 : vector<8x128xf32>
    %592 = vector.broadcast %11 : vector<1x128xf32> to vector<8x128xf32>
    %593 = arith.subf %0, %592 : vector<8x128xf32>
    %594 = vector.broadcast %61 : vector<1x128xf32> to vector<8x128xf32>
    %595 = arith.mulf %593, %594 : vector<8x128xf32>
    %596 = arith.mulf %595, %492 : vector<8x128xf32>
    %597 = vector.broadcast %16 : vector<1x128xf32> to vector<8x128xf32>
    %598 = arith.subf %597, %0 : vector<8x128xf32>
    %599 = vector.broadcast %62 : vector<1x128xf32> to vector<8x128xf32>
    %600 = arith.mulf %598, %599 : vector<8x128xf32>
    %601 = arith.mulf %600, %503 : vector<8x128xf32>
    %602 = arith.addf %596, %601 : vector<8x128xf32>
    %603 = vector.broadcast %3 : vector<1x128xf32> to vector<8x128xf32>
    %604 = arith.subf %0, %603 : vector<8x128xf32>
    %605 = vector.broadcast %63 : vector<1x128xf32> to vector<8x128xf32>
    %606 = arith.mulf %604, %605 : vector<8x128xf32>
    %607 = arith.mulf %606, %514 : vector<8x128xf32>
    %608 = vector.broadcast %9 : vector<1x128xf32> to vector<8x128xf32>
    %609 = arith.subf %608, %0 : vector<8x128xf32>
    %610 = vector.broadcast %64 : vector<1x128xf32> to vector<8x128xf32>
    %611 = arith.mulf %609, %610 : vector<8x128xf32>
    %612 = arith.mulf %611, %525 : vector<8x128xf32>
    %613 = arith.addf %607, %612 : vector<8x128xf32>
    %614 = vector.broadcast %4 : vector<1x128xf32> to vector<8x128xf32>
    %615 = arith.subf %0, %614 : vector<8x128xf32>
    %616 = vector.broadcast %64 : vector<1x128xf32> to vector<8x128xf32>
    %617 = arith.mulf %615, %616 : vector<8x128xf32>
    %618 = arith.mulf %617, %525 : vector<8x128xf32>
    %619 = vector.broadcast %10 : vector<1x128xf32> to vector<8x128xf32>
    %620 = arith.subf %619, %0 : vector<8x128xf32>
    %621 = vector.broadcast %65 : vector<1x128xf32> to vector<8x128xf32>
    %622 = arith.mulf %620, %621 : vector<8x128xf32>
    %623 = arith.mulf %622, %536 : vector<8x128xf32>
    %624 = arith.addf %618, %623 : vector<8x128xf32>
    %625 = vector.broadcast %5 : vector<1x128xf32> to vector<8x128xf32>
    %626 = arith.subf %0, %625 : vector<8x128xf32>
    %627 = vector.broadcast %65 : vector<1x128xf32> to vector<8x128xf32>
    %628 = arith.mulf %626, %627 : vector<8x128xf32>
    %629 = arith.mulf %628, %536 : vector<8x128xf32>
    %630 = vector.broadcast %11 : vector<1x128xf32> to vector<8x128xf32>
    %631 = arith.subf %630, %0 : vector<8x128xf32>
    %632 = vector.broadcast %66 : vector<1x128xf32> to vector<8x128xf32>
    %633 = arith.mulf %631, %632 : vector<8x128xf32>
    %634 = arith.mulf %633, %547 : vector<8x128xf32>
    %635 = arith.addf %629, %634 : vector<8x128xf32>
    %636 = vector.broadcast %6 : vector<1x128xf32> to vector<8x128xf32>
    %637 = arith.subf %0, %636 : vector<8x128xf32>
    %638 = vector.broadcast %66 : vector<1x128xf32> to vector<8x128xf32>
    %639 = arith.mulf %637, %638 : vector<8x128xf32>
    %640 = arith.mulf %639, %547 : vector<8x128xf32>
    %641 = vector.broadcast %12 : vector<1x128xf32> to vector<8x128xf32>
    %642 = arith.subf %641, %0 : vector<8x128xf32>
    %643 = vector.broadcast %67 : vector<1x128xf32> to vector<8x128xf32>
    %644 = arith.mulf %642, %643 : vector<8x128xf32>
    %645 = arith.mulf %644, %558 : vector<8x128xf32>
    %646 = arith.addf %640, %645 : vector<8x128xf32>
    %647 = vector.broadcast %7 : vector<1x128xf32> to vector<8x128xf32>
    %648 = arith.subf %0, %647 : vector<8x128xf32>
    %649 = vector.broadcast %67 : vector<1x128xf32> to vector<8x128xf32>
    %650 = arith.mulf %648, %649 : vector<8x128xf32>
    %651 = arith.mulf %650, %558 : vector<8x128xf32>
    %652 = vector.broadcast %13 : vector<1x128xf32> to vector<8x128xf32>
    %653 = arith.subf %652, %0 : vector<8x128xf32>
    %654 = vector.broadcast %68 : vector<1x128xf32> to vector<8x128xf32>
    %655 = arith.mulf %653, %654 : vector<8x128xf32>
    %656 = arith.mulf %655, %569 : vector<8x128xf32>
    %657 = arith.addf %651, %656 : vector<8x128xf32>
    %658 = vector.broadcast %8 : vector<1x128xf32> to vector<8x128xf32>
    %659 = arith.subf %0, %658 : vector<8x128xf32>
    %660 = vector.broadcast %68 : vector<1x128xf32> to vector<8x128xf32>
    %661 = arith.mulf %659, %660 : vector<8x128xf32>
    %662 = arith.mulf %661, %569 : vector<8x128xf32>
    %663 = vector.broadcast %14 : vector<1x128xf32> to vector<8x128xf32>
    %664 = arith.subf %663, %0 : vector<8x128xf32>
    %665 = vector.broadcast %69 : vector<1x128xf32> to vector<8x128xf32>
    %666 = arith.mulf %664, %665 : vector<8x128xf32>
    %667 = arith.mulf %666, %580 : vector<8x128xf32>
    %668 = arith.addf %662, %667 : vector<8x128xf32>
    %669 = vector.broadcast %9 : vector<1x128xf32> to vector<8x128xf32>
    %670 = arith.subf %0, %669 : vector<8x128xf32>
    %671 = vector.broadcast %69 : vector<1x128xf32> to vector<8x128xf32>
    %672 = arith.mulf %670, %671 : vector<8x128xf32>
    %673 = arith.mulf %672, %580 : vector<8x128xf32>
    %674 = vector.broadcast %15 : vector<1x128xf32> to vector<8x128xf32>
    %675 = arith.subf %674, %0 : vector<8x128xf32>
    %676 = vector.broadcast %70 : vector<1x128xf32> to vector<8x128xf32>
    %677 = arith.mulf %675, %676 : vector<8x128xf32>
    %678 = arith.mulf %677, %591 : vector<8x128xf32>
    %679 = arith.addf %673, %678 : vector<8x128xf32>
    %680 = vector.broadcast %10 : vector<1x128xf32> to vector<8x128xf32>
    %681 = arith.subf %0, %680 : vector<8x128xf32>
    %682 = vector.broadcast %70 : vector<1x128xf32> to vector<8x128xf32>
    %683 = arith.mulf %681, %682 : vector<8x128xf32>
    %684 = arith.mulf %683, %591 : vector<8x128xf32>
    %685 = vector.broadcast %16 : vector<1x128xf32> to vector<8x128xf32>
    %686 = arith.subf %685, %0 : vector<8x128xf32>
    %687 = vector.broadcast %71 : vector<1x128xf32> to vector<8x128xf32>
    %688 = arith.mulf %686, %687 : vector<8x128xf32>
    %689 = arith.mulf %688, %602 : vector<8x128xf32>
    %690 = arith.addf %684, %689 : vector<8x128xf32>
    %cst = arith.constant 0.000000e+00 : f32
    %691 = vector.broadcast %cst : f32 to vector<8x128xf32>
    %692 = arith.maximumf %0, %691 : vector<8x128xf32>
    %693 = tpu.concatenate %692, %613, %624, %635, %646, %657, %668, %679, %690 in 1 : vector<8x128xf32>, vector<8x128xf32>, vector<8x128xf32>, vector<8x128xf32>, vector<8x128xf32>, vector<8x128xf32>, vector<8x128xf32>, vector<8x128xf32>, vector<8x128xf32> -> vector<8x1152xf32>
    %694 = arith.truncf %693 : vector<8x1152xf32> to vector<8x1152xbf16>
    %c0_5 = arith.constant 0 : index
    %c0_6 = arith.constant 0 : index
    %695 = vector.load %arg4[%c0_5, %c0_6] : memref<1152x128xbf16, #tpu.memory_space<vmem>>, vector<1152x128xbf16>
    %cst_7 = arith.constant dense<0.000000e+00> : vector<8x128xf32>
    %696 = tpu.matmul %694, %695, %cst_7 {dimension_numbers = #tpu.dot_dimension_numbers<[1], [0], [0], [1], [0, 0, 1, 1], [], []>} : vector<8x1152xbf16>, vector<1152x128xbf16>, vector<8x128xf32> -> vector<8x128xf32>
    %c0_8 = arith.constant 0 : index
    %c0_9 = arith.constant 0 : index
    %697 = vector.load %arg5[%c0_8, %c0_9] : memref<14x128xf32, #tpu.memory_space<vmem>>, vector<14x128xf32>
    %c0_10 = arith.constant 0 : index
    %c0_11 = arith.constant 0 : index
    %698 = vector.load %arg6[%c0_10, %c0_11] : memref<55x128xf32, #tpu.memory_space<vmem>>, vector<55x128xf32>
    %699 = vector.extract_strided_slice %697 {offsets = [0, 0], sizes = [1, 128], strides = [1, 1]} : vector<14x128xf32> to vector<1x128xf32>
    %700 = vector.extract_strided_slice %697 {offsets = [1, 0], sizes = [1, 128], strides = [1, 1]} : vector<14x128xf32> to vector<1x128xf32>
    %701 = vector.extract_strided_slice %697 {offsets = [2, 0], sizes = [1, 128], strides = [1, 1]} : vector<14x128xf32> to vector<1x128xf32>
    %702 = vector.extract_strided_slice %697 {offsets = [3, 0], sizes = [1, 128], strides = [1, 1]} : vector<14x128xf32> to vector<1x128xf32>
    %703 = vector.extract_strided_slice %697 {offsets = [4, 0], sizes = [1, 128], strides = [1, 1]} : vector<14x128xf32> to vector<1x128xf32>
    %704 = vector.extract_strided_slice %697 {offsets = [5, 0], sizes = [1, 128], strides = [1, 1]} : vector<14x128xf32> to vector<1x128xf32>
    %705 = vector.extract_strided_slice %697 {offsets = [6, 0], sizes = [1, 128], strides = [1, 1]} : vector<14x128xf32> to vector<1x128xf32>
    %706 = vector.extract_strided_slice %697 {offsets = [7, 0], sizes = [1, 128], strides = [1, 1]} : vector<14x128xf32> to vector<1x128xf32>
    %707 = vector.extract_strided_slice %697 {offsets = [8, 0], sizes = [1, 128], strides = [1, 1]} : vector<14x128xf32> to vector<1x128xf32>
    %708 = vector.extract_strided_slice %697 {offsets = [9, 0], sizes = [1, 128], strides = [1, 1]} : vector<14x128xf32> to vector<1x128xf32>
    %709 = vector.extract_strided_slice %697 {offsets = [10, 0], sizes = [1, 128], strides = [1, 1]} : vector<14x128xf32> to vector<1x128xf32>
    %710 = vector.extract_strided_slice %697 {offsets = [11, 0], sizes = [1, 128], strides = [1, 1]} : vector<14x128xf32> to vector<1x128xf32>
    %711 = vector.extract_strided_slice %697 {offsets = [12, 0], sizes = [1, 128], strides = [1, 1]} : vector<14x128xf32> to vector<1x128xf32>
    %712 = vector.extract_strided_slice %697 {offsets = [13, 0], sizes = [1, 128], strides = [1, 1]} : vector<14x128xf32> to vector<1x128xf32>
    %713 = vector.extract_strided_slice %698 {offsets = [0, 0], sizes = [1, 128], strides = [1, 1]} : vector<55x128xf32> to vector<1x128xf32>
    %714 = vector.extract_strided_slice %698 {offsets = [1, 0], sizes = [1, 128], strides = [1, 1]} : vector<55x128xf32> to vector<1x128xf32>
    %715 = vector.extract_strided_slice %698 {offsets = [2, 0], sizes = [1, 128], strides = [1, 1]} : vector<55x128xf32> to vector<1x128xf32>
    %716 = vector.extract_strided_slice %698 {offsets = [3, 0], sizes = [1, 128], strides = [1, 1]} : vector<55x128xf32> to vector<1x128xf32>
    %717 = vector.extract_strided_slice %698 {offsets = [4, 0], sizes = [1, 128], strides = [1, 1]} : vector<55x128xf32> to vector<1x128xf32>
    %718 = vector.extract_strided_slice %698 {offsets = [5, 0], sizes = [1, 128], strides = [1, 1]} : vector<55x128xf32> to vector<1x128xf32>
    %719 = vector.extract_strided_slice %698 {offsets = [6, 0], sizes = [1, 128], strides = [1, 1]} : vector<55x128xf32> to vector<1x128xf32>
    %720 = vector.extract_strided_slice %698 {offsets = [7, 0], sizes = [1, 128], strides = [1, 1]} : vector<55x128xf32> to vector<1x128xf32>
    %721 = vector.extract_strided_slice %698 {offsets = [8, 0], sizes = [1, 128], strides = [1, 1]} : vector<55x128xf32> to vector<1x128xf32>
    %722 = vector.extract_strided_slice %698 {offsets = [9, 0], sizes = [1, 128], strides = [1, 1]} : vector<55x128xf32> to vector<1x128xf32>
    %723 = vector.extract_strided_slice %698 {offsets = [10, 0], sizes = [1, 128], strides = [1, 1]} : vector<55x128xf32> to vector<1x128xf32>
    %724 = vector.extract_strided_slice %698 {offsets = [11, 0], sizes = [1, 128], strides = [1, 1]} : vector<55x128xf32> to vector<1x128xf32>
    %725 = vector.extract_strided_slice %698 {offsets = [12, 0], sizes = [1, 128], strides = [1, 1]} : vector<55x128xf32> to vector<1x128xf32>
    %726 = vector.extract_strided_slice %698 {offsets = [13, 0], sizes = [1, 128], strides = [1, 1]} : vector<55x128xf32> to vector<1x128xf32>
    %727 = vector.extract_strided_slice %698 {offsets = [14, 0], sizes = [1, 128], strides = [1, 1]} : vector<55x128xf32> to vector<1x128xf32>
    %728 = vector.extract_strided_slice %698 {offsets = [15, 0], sizes = [1, 128], strides = [1, 1]} : vector<55x128xf32> to vector<1x128xf32>
    %729 = vector.extract_strided_slice %698 {offsets = [16, 0], sizes = [1, 128], strides = [1, 1]} : vector<55x128xf32> to vector<1x128xf32>
    %730 = vector.extract_strided_slice %698 {offsets = [17, 0], sizes = [1, 128], strides = [1, 1]} : vector<55x128xf32> to vector<1x128xf32>
    %731 = vector.extract_strided_slice %698 {offsets = [18, 0], sizes = [1, 128], strides = [1, 1]} : vector<55x128xf32> to vector<1x128xf32>
    %732 = vector.extract_strided_slice %698 {offsets = [19, 0], sizes = [1, 128], strides = [1, 1]} : vector<55x128xf32> to vector<1x128xf32>
    %733 = vector.extract_strided_slice %698 {offsets = [20, 0], sizes = [1, 128], strides = [1, 1]} : vector<55x128xf32> to vector<1x128xf32>
    %734 = vector.extract_strided_slice %698 {offsets = [21, 0], sizes = [1, 128], strides = [1, 1]} : vector<55x128xf32> to vector<1x128xf32>
    %735 = vector.extract_strided_slice %698 {offsets = [22, 0], sizes = [1, 128], strides = [1, 1]} : vector<55x128xf32> to vector<1x128xf32>
    %736 = vector.extract_strided_slice %698 {offsets = [23, 0], sizes = [1, 128], strides = [1, 1]} : vector<55x128xf32> to vector<1x128xf32>
    %737 = vector.extract_strided_slice %698 {offsets = [24, 0], sizes = [1, 128], strides = [1, 1]} : vector<55x128xf32> to vector<1x128xf32>
    %738 = vector.extract_strided_slice %698 {offsets = [25, 0], sizes = [1, 128], strides = [1, 1]} : vector<55x128xf32> to vector<1x128xf32>
    %739 = vector.extract_strided_slice %698 {offsets = [26, 0], sizes = [1, 128], strides = [1, 1]} : vector<55x128xf32> to vector<1x128xf32>
    %740 = vector.extract_strided_slice %698 {offsets = [27, 0], sizes = [1, 128], strides = [1, 1]} : vector<55x128xf32> to vector<1x128xf32>
    %741 = vector.extract_strided_slice %698 {offsets = [28, 0], sizes = [1, 128], strides = [1, 1]} : vector<55x128xf32> to vector<1x128xf32>
    %742 = vector.extract_strided_slice %698 {offsets = [29, 0], sizes = [1, 128], strides = [1, 1]} : vector<55x128xf32> to vector<1x128xf32>
    %743 = vector.extract_strided_slice %698 {offsets = [30, 0], sizes = [1, 128], strides = [1, 1]} : vector<55x128xf32> to vector<1x128xf32>
    %744 = vector.extract_strided_slice %698 {offsets = [31, 0], sizes = [1, 128], strides = [1, 1]} : vector<55x128xf32> to vector<1x128xf32>
    %745 = vector.extract_strided_slice %698 {offsets = [32, 0], sizes = [1, 128], strides = [1, 1]} : vector<55x128xf32> to vector<1x128xf32>
    %746 = vector.extract_strided_slice %698 {offsets = [33, 0], sizes = [1, 128], strides = [1, 1]} : vector<55x128xf32> to vector<1x128xf32>
    %747 = vector.extract_strided_slice %698 {offsets = [34, 0], sizes = [1, 128], strides = [1, 1]} : vector<55x128xf32> to vector<1x128xf32>
    %748 = vector.extract_strided_slice %698 {offsets = [35, 0], sizes = [1, 128], strides = [1, 1]} : vector<55x128xf32> to vector<1x128xf32>
    %749 = vector.extract_strided_slice %698 {offsets = [36, 0], sizes = [1, 128], strides = [1, 1]} : vector<55x128xf32> to vector<1x128xf32>
    %750 = vector.extract_strided_slice %698 {offsets = [37, 0], sizes = [1, 128], strides = [1, 1]} : vector<55x128xf32> to vector<1x128xf32>
    %751 = vector.extract_strided_slice %698 {offsets = [38, 0], sizes = [1, 128], strides = [1, 1]} : vector<55x128xf32> to vector<1x128xf32>
    %752 = vector.extract_strided_slice %698 {offsets = [39, 0], sizes = [1, 128], strides = [1, 1]} : vector<55x128xf32> to vector<1x128xf32>
    %753 = vector.extract_strided_slice %698 {offsets = [40, 0], sizes = [1, 128], strides = [1, 1]} : vector<55x128xf32> to vector<1x128xf32>
    %754 = vector.extract_strided_slice %698 {offsets = [41, 0], sizes = [1, 128], strides = [1, 1]} : vector<55x128xf32> to vector<1x128xf32>
    %755 = vector.extract_strided_slice %698 {offsets = [42, 0], sizes = [1, 128], strides = [1, 1]} : vector<55x128xf32> to vector<1x128xf32>
    %756 = vector.extract_strided_slice %698 {offsets = [43, 0], sizes = [1, 128], strides = [1, 1]} : vector<55x128xf32> to vector<1x128xf32>
    %757 = vector.extract_strided_slice %698 {offsets = [44, 0], sizes = [1, 128], strides = [1, 1]} : vector<55x128xf32> to vector<1x128xf32>
    %758 = vector.extract_strided_slice %698 {offsets = [45, 0], sizes = [1, 128], strides = [1, 1]} : vector<55x128xf32> to vector<1x128xf32>
    %759 = vector.extract_strided_slice %698 {offsets = [46, 0], sizes = [1, 128], strides = [1, 1]} : vector<55x128xf32> to vector<1x128xf32>
    %760 = vector.extract_strided_slice %698 {offsets = [47, 0], sizes = [1, 128], strides = [1, 1]} : vector<55x128xf32> to vector<1x128xf32>
    %761 = vector.extract_strided_slice %698 {offsets = [48, 0], sizes = [1, 128], strides = [1, 1]} : vector<55x128xf32> to vector<1x128xf32>
    %762 = vector.extract_strided_slice %698 {offsets = [49, 0], sizes = [1, 128], strides = [1, 1]} : vector<55x128xf32> to vector<1x128xf32>
    %763 = vector.extract_strided_slice %698 {offsets = [50, 0], sizes = [1, 128], strides = [1, 1]} : vector<55x128xf32> to vector<1x128xf32>
    %764 = vector.extract_strided_slice %698 {offsets = [51, 0], sizes = [1, 128], strides = [1, 1]} : vector<55x128xf32> to vector<1x128xf32>
    %765 = vector.extract_strided_slice %698 {offsets = [52, 0], sizes = [1, 128], strides = [1, 1]} : vector<55x128xf32> to vector<1x128xf32>
    %766 = vector.extract_strided_slice %698 {offsets = [53, 0], sizes = [1, 128], strides = [1, 1]} : vector<55x128xf32> to vector<1x128xf32>
    %767 = vector.extract_strided_slice %698 {offsets = [54, 0], sizes = [1, 128], strides = [1, 1]} : vector<55x128xf32> to vector<1x128xf32>
    %768 = vector.broadcast %699 : vector<1x128xf32> to vector<8x128xf32>
    %769 = arith.cmpf oge, %696, %768 : vector<8x128xf32>
    %770 = arith.extui %769 : vector<8x128xi1> to vector<8x128xi32>
    %771 = arith.sitofp %770 : vector<8x128xi32> to vector<8x128xf32>
    %772 = vector.broadcast %700 : vector<1x128xf32> to vector<8x128xf32>
    %773 = arith.cmpf oge, %696, %772 : vector<8x128xf32>
    %774 = arith.extui %773 : vector<8x128xi1> to vector<8x128xi32>
    %775 = arith.sitofp %774 : vector<8x128xi32> to vector<8x128xf32>
    %776 = vector.broadcast %701 : vector<1x128xf32> to vector<8x128xf32>
    %777 = arith.cmpf oge, %696, %776 : vector<8x128xf32>
    %778 = arith.extui %777 : vector<8x128xi1> to vector<8x128xi32>
    %779 = arith.sitofp %778 : vector<8x128xi32> to vector<8x128xf32>
    %780 = vector.broadcast %702 : vector<1x128xf32> to vector<8x128xf32>
    %781 = arith.cmpf oge, %696, %780 : vector<8x128xf32>
    %782 = arith.extui %781 : vector<8x128xi1> to vector<8x128xi32>
    %783 = arith.sitofp %782 : vector<8x128xi32> to vector<8x128xf32>
    %784 = vector.broadcast %703 : vector<1x128xf32> to vector<8x128xf32>
    %785 = arith.cmpf oge, %696, %784 : vector<8x128xf32>
    %786 = arith.extui %785 : vector<8x128xi1> to vector<8x128xi32>
    %787 = arith.sitofp %786 : vector<8x128xi32> to vector<8x128xf32>
    %788 = vector.broadcast %704 : vector<1x128xf32> to vector<8x128xf32>
    %789 = arith.cmpf oge, %696, %788 : vector<8x128xf32>
    %790 = arith.extui %789 : vector<8x128xi1> to vector<8x128xi32>
    %791 = arith.sitofp %790 : vector<8x128xi32> to vector<8x128xf32>
    %792 = vector.broadcast %705 : vector<1x128xf32> to vector<8x128xf32>
    %793 = arith.cmpf oge, %696, %792 : vector<8x128xf32>
    %794 = arith.extui %793 : vector<8x128xi1> to vector<8x128xi32>
    %795 = arith.sitofp %794 : vector<8x128xi32> to vector<8x128xf32>
    %796 = vector.broadcast %706 : vector<1x128xf32> to vector<8x128xf32>
    %797 = arith.cmpf oge, %696, %796 : vector<8x128xf32>
    %798 = arith.extui %797 : vector<8x128xi1> to vector<8x128xi32>
    %799 = arith.sitofp %798 : vector<8x128xi32> to vector<8x128xf32>
    %800 = vector.broadcast %707 : vector<1x128xf32> to vector<8x128xf32>
    %801 = arith.cmpf oge, %696, %800 : vector<8x128xf32>
    %802 = arith.extui %801 : vector<8x128xi1> to vector<8x128xi32>
    %803 = arith.sitofp %802 : vector<8x128xi32> to vector<8x128xf32>
    %804 = vector.broadcast %708 : vector<1x128xf32> to vector<8x128xf32>
    %805 = arith.cmpf oge, %696, %804 : vector<8x128xf32>
    %806 = arith.extui %805 : vector<8x128xi1> to vector<8x128xi32>
    %807 = arith.sitofp %806 : vector<8x128xi32> to vector<8x128xf32>
    %808 = vector.broadcast %709 : vector<1x128xf32> to vector<8x128xf32>
    %809 = arith.cmpf oge, %696, %808 : vector<8x128xf32>
    %810 = arith.extui %809 : vector<8x128xi1> to vector<8x128xi32>
    %811 = arith.sitofp %810 : vector<8x128xi32> to vector<8x128xf32>
    %812 = vector.broadcast %710 : vector<1x128xf32> to vector<8x128xf32>
    %813 = arith.cmpf oge, %696, %812 : vector<8x128xf32>
    %814 = arith.extui %813 : vector<8x128xi1> to vector<8x128xi32>
    %815 = arith.sitofp %814 : vector<8x128xi32> to vector<8x128xf32>
    %816 = vector.broadcast %711 : vector<1x128xf32> to vector<8x128xf32>
    %817 = arith.cmpf oge, %696, %816 : vector<8x128xf32>
    %818 = arith.extui %817 : vector<8x128xi1> to vector<8x128xi32>
    %819 = arith.sitofp %818 : vector<8x128xi32> to vector<8x128xf32>
    %820 = vector.broadcast %712 : vector<1x128xf32> to vector<8x128xf32>
    %821 = arith.cmpf oge, %696, %820 : vector<8x128xf32>
    %822 = arith.extui %821 : vector<8x128xi1> to vector<8x128xi32>
    %823 = arith.sitofp %822 : vector<8x128xi32> to vector<8x128xf32>
    %824 = arith.subf %771, %775 : vector<8x128xf32>
    %825 = arith.subf %775, %779 : vector<8x128xf32>
    %826 = arith.subf %779, %783 : vector<8x128xf32>
    %827 = arith.subf %783, %787 : vector<8x128xf32>
    %828 = arith.subf %787, %791 : vector<8x128xf32>
    %829 = arith.subf %791, %795 : vector<8x128xf32>
    %830 = arith.subf %795, %799 : vector<8x128xf32>
    %831 = arith.subf %799, %803 : vector<8x128xf32>
    %832 = arith.subf %803, %807 : vector<8x128xf32>
    %833 = arith.subf %807, %811 : vector<8x128xf32>
    %834 = arith.subf %811, %815 : vector<8x128xf32>
    %835 = arith.subf %815, %819 : vector<8x128xf32>
    %836 = arith.subf %819, %823 : vector<8x128xf32>
    %837 = vector.broadcast %699 : vector<1x128xf32> to vector<8x128xf32>
    %838 = arith.subf %696, %837 : vector<8x128xf32>
    %839 = vector.broadcast %713 : vector<1x128xf32> to vector<8x128xf32>
    %840 = arith.mulf %838, %839 : vector<8x128xf32>
    %841 = arith.mulf %840, %824 : vector<8x128xf32>
    %842 = vector.broadcast %701 : vector<1x128xf32> to vector<8x128xf32>
    %843 = arith.subf %842, %696 : vector<8x128xf32>
    %844 = vector.broadcast %714 : vector<1x128xf32> to vector<8x128xf32>
    %845 = arith.mulf %843, %844 : vector<8x128xf32>
    %846 = arith.mulf %845, %825 : vector<8x128xf32>
    %847 = arith.addf %841, %846 : vector<8x128xf32>
    %848 = vector.broadcast %700 : vector<1x128xf32> to vector<8x128xf32>
    %849 = arith.subf %696, %848 : vector<8x128xf32>
    %850 = vector.broadcast %714 : vector<1x128xf32> to vector<8x128xf32>
    %851 = arith.mulf %849, %850 : vector<8x128xf32>
    %852 = arith.mulf %851, %825 : vector<8x128xf32>
    %853 = vector.broadcast %702 : vector<1x128xf32> to vector<8x128xf32>
    %854 = arith.subf %853, %696 : vector<8x128xf32>
    %855 = vector.broadcast %715 : vector<1x128xf32> to vector<8x128xf32>
    %856 = arith.mulf %854, %855 : vector<8x128xf32>
    %857 = arith.mulf %856, %826 : vector<8x128xf32>
    %858 = arith.addf %852, %857 : vector<8x128xf32>
    %859 = vector.broadcast %701 : vector<1x128xf32> to vector<8x128xf32>
    %860 = arith.subf %696, %859 : vector<8x128xf32>
    %861 = vector.broadcast %715 : vector<1x128xf32> to vector<8x128xf32>
    %862 = arith.mulf %860, %861 : vector<8x128xf32>
    %863 = arith.mulf %862, %826 : vector<8x128xf32>
    %864 = vector.broadcast %703 : vector<1x128xf32> to vector<8x128xf32>
    %865 = arith.subf %864, %696 : vector<8x128xf32>
    %866 = vector.broadcast %716 : vector<1x128xf32> to vector<8x128xf32>
    %867 = arith.mulf %865, %866 : vector<8x128xf32>
    %868 = arith.mulf %867, %827 : vector<8x128xf32>
    %869 = arith.addf %863, %868 : vector<8x128xf32>
    %870 = vector.broadcast %702 : vector<1x128xf32> to vector<8x128xf32>
    %871 = arith.subf %696, %870 : vector<8x128xf32>
    %872 = vector.broadcast %716 : vector<1x128xf32> to vector<8x128xf32>
    %873 = arith.mulf %871, %872 : vector<8x128xf32>
    %874 = arith.mulf %873, %827 : vector<8x128xf32>
    %875 = vector.broadcast %704 : vector<1x128xf32> to vector<8x128xf32>
    %876 = arith.subf %875, %696 : vector<8x128xf32>
    %877 = vector.broadcast %717 : vector<1x128xf32> to vector<8x128xf32>
    %878 = arith.mulf %876, %877 : vector<8x128xf32>
    %879 = arith.mulf %878, %828 : vector<8x128xf32>
    %880 = arith.addf %874, %879 : vector<8x128xf32>
    %881 = vector.broadcast %703 : vector<1x128xf32> to vector<8x128xf32>
    %882 = arith.subf %696, %881 : vector<8x128xf32>
    %883 = vector.broadcast %717 : vector<1x128xf32> to vector<8x128xf32>
    %884 = arith.mulf %882, %883 : vector<8x128xf32>
    %885 = arith.mulf %884, %828 : vector<8x128xf32>
    %886 = vector.broadcast %705 : vector<1x128xf32> to vector<8x128xf32>
    %887 = arith.subf %886, %696 : vector<8x128xf32>
    %888 = vector.broadcast %718 : vector<1x128xf32> to vector<8x128xf32>
    %889 = arith.mulf %887, %888 : vector<8x128xf32>
    %890 = arith.mulf %889, %829 : vector<8x128xf32>
    %891 = arith.addf %885, %890 : vector<8x128xf32>
    %892 = vector.broadcast %704 : vector<1x128xf32> to vector<8x128xf32>
    %893 = arith.subf %696, %892 : vector<8x128xf32>
    %894 = vector.broadcast %718 : vector<1x128xf32> to vector<8x128xf32>
    %895 = arith.mulf %893, %894 : vector<8x128xf32>
    %896 = arith.mulf %895, %829 : vector<8x128xf32>
    %897 = vector.broadcast %706 : vector<1x128xf32> to vector<8x128xf32>
    %898 = arith.subf %897, %696 : vector<8x128xf32>
    %899 = vector.broadcast %719 : vector<1x128xf32> to vector<8x128xf32>
    %900 = arith.mulf %898, %899 : vector<8x128xf32>
    %901 = arith.mulf %900, %830 : vector<8x128xf32>
    %902 = arith.addf %896, %901 : vector<8x128xf32>
    %903 = vector.broadcast %705 : vector<1x128xf32> to vector<8x128xf32>
    %904 = arith.subf %696, %903 : vector<8x128xf32>
    %905 = vector.broadcast %719 : vector<1x128xf32> to vector<8x128xf32>
    %906 = arith.mulf %904, %905 : vector<8x128xf32>
    %907 = arith.mulf %906, %830 : vector<8x128xf32>
    %908 = vector.broadcast %707 : vector<1x128xf32> to vector<8x128xf32>
    %909 = arith.subf %908, %696 : vector<8x128xf32>
    %910 = vector.broadcast %720 : vector<1x128xf32> to vector<8x128xf32>
    %911 = arith.mulf %909, %910 : vector<8x128xf32>
    %912 = arith.mulf %911, %831 : vector<8x128xf32>
    %913 = arith.addf %907, %912 : vector<8x128xf32>
    %914 = vector.broadcast %706 : vector<1x128xf32> to vector<8x128xf32>
    %915 = arith.subf %696, %914 : vector<8x128xf32>
    %916 = vector.broadcast %720 : vector<1x128xf32> to vector<8x128xf32>
    %917 = arith.mulf %915, %916 : vector<8x128xf32>
    %918 = arith.mulf %917, %831 : vector<8x128xf32>
    %919 = vector.broadcast %708 : vector<1x128xf32> to vector<8x128xf32>
    %920 = arith.subf %919, %696 : vector<8x128xf32>
    %921 = vector.broadcast %721 : vector<1x128xf32> to vector<8x128xf32>
    %922 = arith.mulf %920, %921 : vector<8x128xf32>
    %923 = arith.mulf %922, %832 : vector<8x128xf32>
    %924 = arith.addf %918, %923 : vector<8x128xf32>
    %925 = vector.broadcast %707 : vector<1x128xf32> to vector<8x128xf32>
    %926 = arith.subf %696, %925 : vector<8x128xf32>
    %927 = vector.broadcast %721 : vector<1x128xf32> to vector<8x128xf32>
    %928 = arith.mulf %926, %927 : vector<8x128xf32>
    %929 = arith.mulf %928, %832 : vector<8x128xf32>
    %930 = vector.broadcast %709 : vector<1x128xf32> to vector<8x128xf32>
    %931 = arith.subf %930, %696 : vector<8x128xf32>
    %932 = vector.broadcast %722 : vector<1x128xf32> to vector<8x128xf32>
    %933 = arith.mulf %931, %932 : vector<8x128xf32>
    %934 = arith.mulf %933, %833 : vector<8x128xf32>
    %935 = arith.addf %929, %934 : vector<8x128xf32>
    %936 = vector.broadcast %708 : vector<1x128xf32> to vector<8x128xf32>
    %937 = arith.subf %696, %936 : vector<8x128xf32>
    %938 = vector.broadcast %722 : vector<1x128xf32> to vector<8x128xf32>
    %939 = arith.mulf %937, %938 : vector<8x128xf32>
    %940 = arith.mulf %939, %833 : vector<8x128xf32>
    %941 = vector.broadcast %710 : vector<1x128xf32> to vector<8x128xf32>
    %942 = arith.subf %941, %696 : vector<8x128xf32>
    %943 = vector.broadcast %723 : vector<1x128xf32> to vector<8x128xf32>
    %944 = arith.mulf %942, %943 : vector<8x128xf32>
    %945 = arith.mulf %944, %834 : vector<8x128xf32>
    %946 = arith.addf %940, %945 : vector<8x128xf32>
    %947 = vector.broadcast %709 : vector<1x128xf32> to vector<8x128xf32>
    %948 = arith.subf %696, %947 : vector<8x128xf32>
    %949 = vector.broadcast %723 : vector<1x128xf32> to vector<8x128xf32>
    %950 = arith.mulf %948, %949 : vector<8x128xf32>
    %951 = arith.mulf %950, %834 : vector<8x128xf32>
    %952 = vector.broadcast %711 : vector<1x128xf32> to vector<8x128xf32>
    %953 = arith.subf %952, %696 : vector<8x128xf32>
    %954 = vector.broadcast %724 : vector<1x128xf32> to vector<8x128xf32>
    %955 = arith.mulf %953, %954 : vector<8x128xf32>
    %956 = arith.mulf %955, %835 : vector<8x128xf32>
    %957 = arith.addf %951, %956 : vector<8x128xf32>
    %958 = vector.broadcast %710 : vector<1x128xf32> to vector<8x128xf32>
    %959 = arith.subf %696, %958 : vector<8x128xf32>
    %960 = vector.broadcast %724 : vector<1x128xf32> to vector<8x128xf32>
    %961 = arith.mulf %959, %960 : vector<8x128xf32>
    %962 = arith.mulf %961, %835 : vector<8x128xf32>
    %963 = vector.broadcast %712 : vector<1x128xf32> to vector<8x128xf32>
    %964 = arith.subf %963, %696 : vector<8x128xf32>
    %965 = vector.broadcast %725 : vector<1x128xf32> to vector<8x128xf32>
    %966 = arith.mulf %964, %965 : vector<8x128xf32>
    %967 = arith.mulf %966, %836 : vector<8x128xf32>
    %968 = arith.addf %962, %967 : vector<8x128xf32>
    %969 = vector.broadcast %699 : vector<1x128xf32> to vector<8x128xf32>
    %970 = arith.subf %696, %969 : vector<8x128xf32>
    %971 = vector.broadcast %726 : vector<1x128xf32> to vector<8x128xf32>
    %972 = arith.mulf %970, %971 : vector<8x128xf32>
    %973 = arith.mulf %972, %847 : vector<8x128xf32>
    %974 = vector.broadcast %702 : vector<1x128xf32> to vector<8x128xf32>
    %975 = arith.subf %974, %696 : vector<8x128xf32>
    %976 = vector.broadcast %727 : vector<1x128xf32> to vector<8x128xf32>
    %977 = arith.mulf %975, %976 : vector<8x128xf32>
    %978 = arith.mulf %977, %858 : vector<8x128xf32>
    %979 = arith.addf %973, %978 : vector<8x128xf32>
    %980 = vector.broadcast %700 : vector<1x128xf32> to vector<8x128xf32>
    %981 = arith.subf %696, %980 : vector<8x128xf32>
    %982 = vector.broadcast %727 : vector<1x128xf32> to vector<8x128xf32>
    %983 = arith.mulf %981, %982 : vector<8x128xf32>
    %984 = arith.mulf %983, %858 : vector<8x128xf32>
    %985 = vector.broadcast %703 : vector<1x128xf32> to vector<8x128xf32>
    %986 = arith.subf %985, %696 : vector<8x128xf32>
    %987 = vector.broadcast %728 : vector<1x128xf32> to vector<8x128xf32>
    %988 = arith.mulf %986, %987 : vector<8x128xf32>
    %989 = arith.mulf %988, %869 : vector<8x128xf32>
    %990 = arith.addf %984, %989 : vector<8x128xf32>
    %991 = vector.broadcast %701 : vector<1x128xf32> to vector<8x128xf32>
    %992 = arith.subf %696, %991 : vector<8x128xf32>
    %993 = vector.broadcast %728 : vector<1x128xf32> to vector<8x128xf32>
    %994 = arith.mulf %992, %993 : vector<8x128xf32>
    %995 = arith.mulf %994, %869 : vector<8x128xf32>
    %996 = vector.broadcast %704 : vector<1x128xf32> to vector<8x128xf32>
    %997 = arith.subf %996, %696 : vector<8x128xf32>
    %998 = vector.broadcast %729 : vector<1x128xf32> to vector<8x128xf32>
    %999 = arith.mulf %997, %998 : vector<8x128xf32>
    %1000 = arith.mulf %999, %880 : vector<8x128xf32>
    %1001 = arith.addf %995, %1000 : vector<8x128xf32>
    %1002 = vector.broadcast %702 : vector<1x128xf32> to vector<8x128xf32>
    %1003 = arith.subf %696, %1002 : vector<8x128xf32>
    %1004 = vector.broadcast %729 : vector<1x128xf32> to vector<8x128xf32>
    %1005 = arith.mulf %1003, %1004 : vector<8x128xf32>
    %1006 = arith.mulf %1005, %880 : vector<8x128xf32>
    %1007 = vector.broadcast %705 : vector<1x128xf32> to vector<8x128xf32>
    %1008 = arith.subf %1007, %696 : vector<8x128xf32>
    %1009 = vector.broadcast %730 : vector<1x128xf32> to vector<8x128xf32>
    %1010 = arith.mulf %1008, %1009 : vector<8x128xf32>
    %1011 = arith.mulf %1010, %891 : vector<8x128xf32>
    %1012 = arith.addf %1006, %1011 : vector<8x128xf32>
    %1013 = vector.broadcast %703 : vector<1x128xf32> to vector<8x128xf32>
    %1014 = arith.subf %696, %1013 : vector<8x128xf32>
    %1015 = vector.broadcast %730 : vector<1x128xf32> to vector<8x128xf32>
    %1016 = arith.mulf %1014, %1015 : vector<8x128xf32>
    %1017 = arith.mulf %1016, %891 : vector<8x128xf32>
    %1018 = vector.broadcast %706 : vector<1x128xf32> to vector<8x128xf32>
    %1019 = arith.subf %1018, %696 : vector<8x128xf32>
    %1020 = vector.broadcast %731 : vector<1x128xf32> to vector<8x128xf32>
    %1021 = arith.mulf %1019, %1020 : vector<8x128xf32>
    %1022 = arith.mulf %1021, %902 : vector<8x128xf32>
    %1023 = arith.addf %1017, %1022 : vector<8x128xf32>
    %1024 = vector.broadcast %704 : vector<1x128xf32> to vector<8x128xf32>
    %1025 = arith.subf %696, %1024 : vector<8x128xf32>
    %1026 = vector.broadcast %731 : vector<1x128xf32> to vector<8x128xf32>
    %1027 = arith.mulf %1025, %1026 : vector<8x128xf32>
    %1028 = arith.mulf %1027, %902 : vector<8x128xf32>
    %1029 = vector.broadcast %707 : vector<1x128xf32> to vector<8x128xf32>
    %1030 = arith.subf %1029, %696 : vector<8x128xf32>
    %1031 = vector.broadcast %732 : vector<1x128xf32> to vector<8x128xf32>
    %1032 = arith.mulf %1030, %1031 : vector<8x128xf32>
    %1033 = arith.mulf %1032, %913 : vector<8x128xf32>
    %1034 = arith.addf %1028, %1033 : vector<8x128xf32>
    %1035 = vector.broadcast %705 : vector<1x128xf32> to vector<8x128xf32>
    %1036 = arith.subf %696, %1035 : vector<8x128xf32>
    %1037 = vector.broadcast %732 : vector<1x128xf32> to vector<8x128xf32>
    %1038 = arith.mulf %1036, %1037 : vector<8x128xf32>
    %1039 = arith.mulf %1038, %913 : vector<8x128xf32>
    %1040 = vector.broadcast %708 : vector<1x128xf32> to vector<8x128xf32>
    %1041 = arith.subf %1040, %696 : vector<8x128xf32>
    %1042 = vector.broadcast %733 : vector<1x128xf32> to vector<8x128xf32>
    %1043 = arith.mulf %1041, %1042 : vector<8x128xf32>
    %1044 = arith.mulf %1043, %924 : vector<8x128xf32>
    %1045 = arith.addf %1039, %1044 : vector<8x128xf32>
    %1046 = vector.broadcast %706 : vector<1x128xf32> to vector<8x128xf32>
    %1047 = arith.subf %696, %1046 : vector<8x128xf32>
    %1048 = vector.broadcast %733 : vector<1x128xf32> to vector<8x128xf32>
    %1049 = arith.mulf %1047, %1048 : vector<8x128xf32>
    %1050 = arith.mulf %1049, %924 : vector<8x128xf32>
    %1051 = vector.broadcast %709 : vector<1x128xf32> to vector<8x128xf32>
    %1052 = arith.subf %1051, %696 : vector<8x128xf32>
    %1053 = vector.broadcast %734 : vector<1x128xf32> to vector<8x128xf32>
    %1054 = arith.mulf %1052, %1053 : vector<8x128xf32>
    %1055 = arith.mulf %1054, %935 : vector<8x128xf32>
    %1056 = arith.addf %1050, %1055 : vector<8x128xf32>
    %1057 = vector.broadcast %707 : vector<1x128xf32> to vector<8x128xf32>
    %1058 = arith.subf %696, %1057 : vector<8x128xf32>
    %1059 = vector.broadcast %734 : vector<1x128xf32> to vector<8x128xf32>
    %1060 = arith.mulf %1058, %1059 : vector<8x128xf32>
    %1061 = arith.mulf %1060, %935 : vector<8x128xf32>
    %1062 = vector.broadcast %710 : vector<1x128xf32> to vector<8x128xf32>
    %1063 = arith.subf %1062, %696 : vector<8x128xf32>
    %1064 = vector.broadcast %735 : vector<1x128xf32> to vector<8x128xf32>
    %1065 = arith.mulf %1063, %1064 : vector<8x128xf32>
    %1066 = arith.mulf %1065, %946 : vector<8x128xf32>
    %1067 = arith.addf %1061, %1066 : vector<8x128xf32>
    %1068 = vector.broadcast %708 : vector<1x128xf32> to vector<8x128xf32>
    %1069 = arith.subf %696, %1068 : vector<8x128xf32>
    %1070 = vector.broadcast %735 : vector<1x128xf32> to vector<8x128xf32>
    %1071 = arith.mulf %1069, %1070 : vector<8x128xf32>
    %1072 = arith.mulf %1071, %946 : vector<8x128xf32>
    %1073 = vector.broadcast %711 : vector<1x128xf32> to vector<8x128xf32>
    %1074 = arith.subf %1073, %696 : vector<8x128xf32>
    %1075 = vector.broadcast %736 : vector<1x128xf32> to vector<8x128xf32>
    %1076 = arith.mulf %1074, %1075 : vector<8x128xf32>
    %1077 = arith.mulf %1076, %957 : vector<8x128xf32>
    %1078 = arith.addf %1072, %1077 : vector<8x128xf32>
    %1079 = vector.broadcast %709 : vector<1x128xf32> to vector<8x128xf32>
    %1080 = arith.subf %696, %1079 : vector<8x128xf32>
    %1081 = vector.broadcast %736 : vector<1x128xf32> to vector<8x128xf32>
    %1082 = arith.mulf %1080, %1081 : vector<8x128xf32>
    %1083 = arith.mulf %1082, %957 : vector<8x128xf32>
    %1084 = vector.broadcast %712 : vector<1x128xf32> to vector<8x128xf32>
    %1085 = arith.subf %1084, %696 : vector<8x128xf32>
    %1086 = vector.broadcast %737 : vector<1x128xf32> to vector<8x128xf32>
    %1087 = arith.mulf %1085, %1086 : vector<8x128xf32>
    %1088 = arith.mulf %1087, %968 : vector<8x128xf32>
    %1089 = arith.addf %1083, %1088 : vector<8x128xf32>
    %1090 = vector.broadcast %699 : vector<1x128xf32> to vector<8x128xf32>
    %1091 = arith.subf %696, %1090 : vector<8x128xf32>
    %1092 = vector.broadcast %738 : vector<1x128xf32> to vector<8x128xf32>
    %1093 = arith.mulf %1091, %1092 : vector<8x128xf32>
    %1094 = arith.mulf %1093, %979 : vector<8x128xf32>
    %1095 = vector.broadcast %703 : vector<1x128xf32> to vector<8x128xf32>
    %1096 = arith.subf %1095, %696 : vector<8x128xf32>
    %1097 = vector.broadcast %739 : vector<1x128xf32> to vector<8x128xf32>
    %1098 = arith.mulf %1096, %1097 : vector<8x128xf32>
    %1099 = arith.mulf %1098, %990 : vector<8x128xf32>
    %1100 = arith.addf %1094, %1099 : vector<8x128xf32>
    %1101 = vector.broadcast %700 : vector<1x128xf32> to vector<8x128xf32>
    %1102 = arith.subf %696, %1101 : vector<8x128xf32>
    %1103 = vector.broadcast %739 : vector<1x128xf32> to vector<8x128xf32>
    %1104 = arith.mulf %1102, %1103 : vector<8x128xf32>
    %1105 = arith.mulf %1104, %990 : vector<8x128xf32>
    %1106 = vector.broadcast %704 : vector<1x128xf32> to vector<8x128xf32>
    %1107 = arith.subf %1106, %696 : vector<8x128xf32>
    %1108 = vector.broadcast %740 : vector<1x128xf32> to vector<8x128xf32>
    %1109 = arith.mulf %1107, %1108 : vector<8x128xf32>
    %1110 = arith.mulf %1109, %1001 : vector<8x128xf32>
    %1111 = arith.addf %1105, %1110 : vector<8x128xf32>
    %1112 = vector.broadcast %701 : vector<1x128xf32> to vector<8x128xf32>
    %1113 = arith.subf %696, %1112 : vector<8x128xf32>
    %1114 = vector.broadcast %740 : vector<1x128xf32> to vector<8x128xf32>
    %1115 = arith.mulf %1113, %1114 : vector<8x128xf32>
    %1116 = arith.mulf %1115, %1001 : vector<8x128xf32>
    %1117 = vector.broadcast %705 : vector<1x128xf32> to vector<8x128xf32>
    %1118 = arith.subf %1117, %696 : vector<8x128xf32>
    %1119 = vector.broadcast %741 : vector<1x128xf32> to vector<8x128xf32>
    %1120 = arith.mulf %1118, %1119 : vector<8x128xf32>
    %1121 = arith.mulf %1120, %1012 : vector<8x128xf32>
    %1122 = arith.addf %1116, %1121 : vector<8x128xf32>
    %1123 = vector.broadcast %702 : vector<1x128xf32> to vector<8x128xf32>
    %1124 = arith.subf %696, %1123 : vector<8x128xf32>
    %1125 = vector.broadcast %741 : vector<1x128xf32> to vector<8x128xf32>
    %1126 = arith.mulf %1124, %1125 : vector<8x128xf32>
    %1127 = arith.mulf %1126, %1012 : vector<8x128xf32>
    %1128 = vector.broadcast %706 : vector<1x128xf32> to vector<8x128xf32>
    %1129 = arith.subf %1128, %696 : vector<8x128xf32>
    %1130 = vector.broadcast %742 : vector<1x128xf32> to vector<8x128xf32>
    %1131 = arith.mulf %1129, %1130 : vector<8x128xf32>
    %1132 = arith.mulf %1131, %1023 : vector<8x128xf32>
    %1133 = arith.addf %1127, %1132 : vector<8x128xf32>
    %1134 = vector.broadcast %703 : vector<1x128xf32> to vector<8x128xf32>
    %1135 = arith.subf %696, %1134 : vector<8x128xf32>
    %1136 = vector.broadcast %742 : vector<1x128xf32> to vector<8x128xf32>
    %1137 = arith.mulf %1135, %1136 : vector<8x128xf32>
    %1138 = arith.mulf %1137, %1023 : vector<8x128xf32>
    %1139 = vector.broadcast %707 : vector<1x128xf32> to vector<8x128xf32>
    %1140 = arith.subf %1139, %696 : vector<8x128xf32>
    %1141 = vector.broadcast %743 : vector<1x128xf32> to vector<8x128xf32>
    %1142 = arith.mulf %1140, %1141 : vector<8x128xf32>
    %1143 = arith.mulf %1142, %1034 : vector<8x128xf32>
    %1144 = arith.addf %1138, %1143 : vector<8x128xf32>
    %1145 = vector.broadcast %704 : vector<1x128xf32> to vector<8x128xf32>
    %1146 = arith.subf %696, %1145 : vector<8x128xf32>
    %1147 = vector.broadcast %743 : vector<1x128xf32> to vector<8x128xf32>
    %1148 = arith.mulf %1146, %1147 : vector<8x128xf32>
    %1149 = arith.mulf %1148, %1034 : vector<8x128xf32>
    %1150 = vector.broadcast %708 : vector<1x128xf32> to vector<8x128xf32>
    %1151 = arith.subf %1150, %696 : vector<8x128xf32>
    %1152 = vector.broadcast %744 : vector<1x128xf32> to vector<8x128xf32>
    %1153 = arith.mulf %1151, %1152 : vector<8x128xf32>
    %1154 = arith.mulf %1153, %1045 : vector<8x128xf32>
    %1155 = arith.addf %1149, %1154 : vector<8x128xf32>
    %1156 = vector.broadcast %705 : vector<1x128xf32> to vector<8x128xf32>
    %1157 = arith.subf %696, %1156 : vector<8x128xf32>
    %1158 = vector.broadcast %744 : vector<1x128xf32> to vector<8x128xf32>
    %1159 = arith.mulf %1157, %1158 : vector<8x128xf32>
    %1160 = arith.mulf %1159, %1045 : vector<8x128xf32>
    %1161 = vector.broadcast %709 : vector<1x128xf32> to vector<8x128xf32>
    %1162 = arith.subf %1161, %696 : vector<8x128xf32>
    %1163 = vector.broadcast %745 : vector<1x128xf32> to vector<8x128xf32>
    %1164 = arith.mulf %1162, %1163 : vector<8x128xf32>
    %1165 = arith.mulf %1164, %1056 : vector<8x128xf32>
    %1166 = arith.addf %1160, %1165 : vector<8x128xf32>
    %1167 = vector.broadcast %706 : vector<1x128xf32> to vector<8x128xf32>
    %1168 = arith.subf %696, %1167 : vector<8x128xf32>
    %1169 = vector.broadcast %745 : vector<1x128xf32> to vector<8x128xf32>
    %1170 = arith.mulf %1168, %1169 : vector<8x128xf32>
    %1171 = arith.mulf %1170, %1056 : vector<8x128xf32>
    %1172 = vector.broadcast %710 : vector<1x128xf32> to vector<8x128xf32>
    %1173 = arith.subf %1172, %696 : vector<8x128xf32>
    %1174 = vector.broadcast %746 : vector<1x128xf32> to vector<8x128xf32>
    %1175 = arith.mulf %1173, %1174 : vector<8x128xf32>
    %1176 = arith.mulf %1175, %1067 : vector<8x128xf32>
    %1177 = arith.addf %1171, %1176 : vector<8x128xf32>
    %1178 = vector.broadcast %707 : vector<1x128xf32> to vector<8x128xf32>
    %1179 = arith.subf %696, %1178 : vector<8x128xf32>
    %1180 = vector.broadcast %746 : vector<1x128xf32> to vector<8x128xf32>
    %1181 = arith.mulf %1179, %1180 : vector<8x128xf32>
    %1182 = arith.mulf %1181, %1067 : vector<8x128xf32>
    %1183 = vector.broadcast %711 : vector<1x128xf32> to vector<8x128xf32>
    %1184 = arith.subf %1183, %696 : vector<8x128xf32>
    %1185 = vector.broadcast %747 : vector<1x128xf32> to vector<8x128xf32>
    %1186 = arith.mulf %1184, %1185 : vector<8x128xf32>
    %1187 = arith.mulf %1186, %1078 : vector<8x128xf32>
    %1188 = arith.addf %1182, %1187 : vector<8x128xf32>
    %1189 = vector.broadcast %708 : vector<1x128xf32> to vector<8x128xf32>
    %1190 = arith.subf %696, %1189 : vector<8x128xf32>
    %1191 = vector.broadcast %747 : vector<1x128xf32> to vector<8x128xf32>
    %1192 = arith.mulf %1190, %1191 : vector<8x128xf32>
    %1193 = arith.mulf %1192, %1078 : vector<8x128xf32>
    %1194 = vector.broadcast %712 : vector<1x128xf32> to vector<8x128xf32>
    %1195 = arith.subf %1194, %696 : vector<8x128xf32>
    %1196 = vector.broadcast %748 : vector<1x128xf32> to vector<8x128xf32>
    %1197 = arith.mulf %1195, %1196 : vector<8x128xf32>
    %1198 = arith.mulf %1197, %1089 : vector<8x128xf32>
    %1199 = arith.addf %1193, %1198 : vector<8x128xf32>
    %1200 = vector.broadcast %699 : vector<1x128xf32> to vector<8x128xf32>
    %1201 = arith.subf %696, %1200 : vector<8x128xf32>
    %1202 = vector.broadcast %749 : vector<1x128xf32> to vector<8x128xf32>
    %1203 = arith.mulf %1201, %1202 : vector<8x128xf32>
    %1204 = arith.mulf %1203, %1100 : vector<8x128xf32>
    %1205 = vector.broadcast %704 : vector<1x128xf32> to vector<8x128xf32>
    %1206 = arith.subf %1205, %696 : vector<8x128xf32>
    %1207 = vector.broadcast %750 : vector<1x128xf32> to vector<8x128xf32>
    %1208 = arith.mulf %1206, %1207 : vector<8x128xf32>
    %1209 = arith.mulf %1208, %1111 : vector<8x128xf32>
    %1210 = arith.addf %1204, %1209 : vector<8x128xf32>
    %1211 = vector.broadcast %700 : vector<1x128xf32> to vector<8x128xf32>
    %1212 = arith.subf %696, %1211 : vector<8x128xf32>
    %1213 = vector.broadcast %750 : vector<1x128xf32> to vector<8x128xf32>
    %1214 = arith.mulf %1212, %1213 : vector<8x128xf32>
    %1215 = arith.mulf %1214, %1111 : vector<8x128xf32>
    %1216 = vector.broadcast %705 : vector<1x128xf32> to vector<8x128xf32>
    %1217 = arith.subf %1216, %696 : vector<8x128xf32>
    %1218 = vector.broadcast %751 : vector<1x128xf32> to vector<8x128xf32>
    %1219 = arith.mulf %1217, %1218 : vector<8x128xf32>
    %1220 = arith.mulf %1219, %1122 : vector<8x128xf32>
    %1221 = arith.addf %1215, %1220 : vector<8x128xf32>
    %1222 = vector.broadcast %701 : vector<1x128xf32> to vector<8x128xf32>
    %1223 = arith.subf %696, %1222 : vector<8x128xf32>
    %1224 = vector.broadcast %751 : vector<1x128xf32> to vector<8x128xf32>
    %1225 = arith.mulf %1223, %1224 : vector<8x128xf32>
    %1226 = arith.mulf %1225, %1122 : vector<8x128xf32>
    %1227 = vector.broadcast %706 : vector<1x128xf32> to vector<8x128xf32>
    %1228 = arith.subf %1227, %696 : vector<8x128xf32>
    %1229 = vector.broadcast %752 : vector<1x128xf32> to vector<8x128xf32>
    %1230 = arith.mulf %1228, %1229 : vector<8x128xf32>
    %1231 = arith.mulf %1230, %1133 : vector<8x128xf32>
    %1232 = arith.addf %1226, %1231 : vector<8x128xf32>
    %1233 = vector.broadcast %702 : vector<1x128xf32> to vector<8x128xf32>
    %1234 = arith.subf %696, %1233 : vector<8x128xf32>
    %1235 = vector.broadcast %752 : vector<1x128xf32> to vector<8x128xf32>
    %1236 = arith.mulf %1234, %1235 : vector<8x128xf32>
    %1237 = arith.mulf %1236, %1133 : vector<8x128xf32>
    %1238 = vector.broadcast %707 : vector<1x128xf32> to vector<8x128xf32>
    %1239 = arith.subf %1238, %696 : vector<8x128xf32>
    %1240 = vector.broadcast %753 : vector<1x128xf32> to vector<8x128xf32>
    %1241 = arith.mulf %1239, %1240 : vector<8x128xf32>
    %1242 = arith.mulf %1241, %1144 : vector<8x128xf32>
    %1243 = arith.addf %1237, %1242 : vector<8x128xf32>
    %1244 = vector.broadcast %703 : vector<1x128xf32> to vector<8x128xf32>
    %1245 = arith.subf %696, %1244 : vector<8x128xf32>
    %1246 = vector.broadcast %753 : vector<1x128xf32> to vector<8x128xf32>
    %1247 = arith.mulf %1245, %1246 : vector<8x128xf32>
    %1248 = arith.mulf %1247, %1144 : vector<8x128xf32>
    %1249 = vector.broadcast %708 : vector<1x128xf32> to vector<8x128xf32>
    %1250 = arith.subf %1249, %696 : vector<8x128xf32>
    %1251 = vector.broadcast %754 : vector<1x128xf32> to vector<8x128xf32>
    %1252 = arith.mulf %1250, %1251 : vector<8x128xf32>
    %1253 = arith.mulf %1252, %1155 : vector<8x128xf32>
    %1254 = arith.addf %1248, %1253 : vector<8x128xf32>
    %1255 = vector.broadcast %704 : vector<1x128xf32> to vector<8x128xf32>
    %1256 = arith.subf %696, %1255 : vector<8x128xf32>
    %1257 = vector.broadcast %754 : vector<1x128xf32> to vector<8x128xf32>
    %1258 = arith.mulf %1256, %1257 : vector<8x128xf32>
    %1259 = arith.mulf %1258, %1155 : vector<8x128xf32>
    %1260 = vector.broadcast %709 : vector<1x128xf32> to vector<8x128xf32>
    %1261 = arith.subf %1260, %696 : vector<8x128xf32>
    %1262 = vector.broadcast %755 : vector<1x128xf32> to vector<8x128xf32>
    %1263 = arith.mulf %1261, %1262 : vector<8x128xf32>
    %1264 = arith.mulf %1263, %1166 : vector<8x128xf32>
    %1265 = arith.addf %1259, %1264 : vector<8x128xf32>
    %1266 = vector.broadcast %705 : vector<1x128xf32> to vector<8x128xf32>
    %1267 = arith.subf %696, %1266 : vector<8x128xf32>
    %1268 = vector.broadcast %755 : vector<1x128xf32> to vector<8x128xf32>
    %1269 = arith.mulf %1267, %1268 : vector<8x128xf32>
    %1270 = arith.mulf %1269, %1166 : vector<8x128xf32>
    %1271 = vector.broadcast %710 : vector<1x128xf32> to vector<8x128xf32>
    %1272 = arith.subf %1271, %696 : vector<8x128xf32>
    %1273 = vector.broadcast %756 : vector<1x128xf32> to vector<8x128xf32>
    %1274 = arith.mulf %1272, %1273 : vector<8x128xf32>
    %1275 = arith.mulf %1274, %1177 : vector<8x128xf32>
    %1276 = arith.addf %1270, %1275 : vector<8x128xf32>
    %1277 = vector.broadcast %706 : vector<1x128xf32> to vector<8x128xf32>
    %1278 = arith.subf %696, %1277 : vector<8x128xf32>
    %1279 = vector.broadcast %756 : vector<1x128xf32> to vector<8x128xf32>
    %1280 = arith.mulf %1278, %1279 : vector<8x128xf32>
    %1281 = arith.mulf %1280, %1177 : vector<8x128xf32>
    %1282 = vector.broadcast %711 : vector<1x128xf32> to vector<8x128xf32>
    %1283 = arith.subf %1282, %696 : vector<8x128xf32>
    %1284 = vector.broadcast %757 : vector<1x128xf32> to vector<8x128xf32>
    %1285 = arith.mulf %1283, %1284 : vector<8x128xf32>
    %1286 = arith.mulf %1285, %1188 : vector<8x128xf32>
    %1287 = arith.addf %1281, %1286 : vector<8x128xf32>
    %1288 = vector.broadcast %707 : vector<1x128xf32> to vector<8x128xf32>
    %1289 = arith.subf %696, %1288 : vector<8x128xf32>
    %1290 = vector.broadcast %757 : vector<1x128xf32> to vector<8x128xf32>
    %1291 = arith.mulf %1289, %1290 : vector<8x128xf32>
    %1292 = arith.mulf %1291, %1188 : vector<8x128xf32>
    %1293 = vector.broadcast %712 : vector<1x128xf32> to vector<8x128xf32>
    %1294 = arith.subf %1293, %696 : vector<8x128xf32>
    %1295 = vector.broadcast %758 : vector<1x128xf32> to vector<8x128xf32>
    %1296 = arith.mulf %1294, %1295 : vector<8x128xf32>
    %1297 = arith.mulf %1296, %1199 : vector<8x128xf32>
    %1298 = arith.addf %1292, %1297 : vector<8x128xf32>
    %1299 = vector.broadcast %699 : vector<1x128xf32> to vector<8x128xf32>
    %1300 = arith.subf %696, %1299 : vector<8x128xf32>
    %1301 = vector.broadcast %759 : vector<1x128xf32> to vector<8x128xf32>
    %1302 = arith.mulf %1300, %1301 : vector<8x128xf32>
    %1303 = arith.mulf %1302, %1210 : vector<8x128xf32>
    %1304 = vector.broadcast %705 : vector<1x128xf32> to vector<8x128xf32>
    %1305 = arith.subf %1304, %696 : vector<8x128xf32>
    %1306 = vector.broadcast %760 : vector<1x128xf32> to vector<8x128xf32>
    %1307 = arith.mulf %1305, %1306 : vector<8x128xf32>
    %1308 = arith.mulf %1307, %1221 : vector<8x128xf32>
    %1309 = arith.addf %1303, %1308 : vector<8x128xf32>
    %1310 = vector.broadcast %700 : vector<1x128xf32> to vector<8x128xf32>
    %1311 = arith.subf %696, %1310 : vector<8x128xf32>
    %1312 = vector.broadcast %760 : vector<1x128xf32> to vector<8x128xf32>
    %1313 = arith.mulf %1311, %1312 : vector<8x128xf32>
    %1314 = arith.mulf %1313, %1221 : vector<8x128xf32>
    %1315 = vector.broadcast %706 : vector<1x128xf32> to vector<8x128xf32>
    %1316 = arith.subf %1315, %696 : vector<8x128xf32>
    %1317 = vector.broadcast %761 : vector<1x128xf32> to vector<8x128xf32>
    %1318 = arith.mulf %1316, %1317 : vector<8x128xf32>
    %1319 = arith.mulf %1318, %1232 : vector<8x128xf32>
    %1320 = arith.addf %1314, %1319 : vector<8x128xf32>
    %1321 = vector.broadcast %701 : vector<1x128xf32> to vector<8x128xf32>
    %1322 = arith.subf %696, %1321 : vector<8x128xf32>
    %1323 = vector.broadcast %761 : vector<1x128xf32> to vector<8x128xf32>
    %1324 = arith.mulf %1322, %1323 : vector<8x128xf32>
    %1325 = arith.mulf %1324, %1232 : vector<8x128xf32>
    %1326 = vector.broadcast %707 : vector<1x128xf32> to vector<8x128xf32>
    %1327 = arith.subf %1326, %696 : vector<8x128xf32>
    %1328 = vector.broadcast %762 : vector<1x128xf32> to vector<8x128xf32>
    %1329 = arith.mulf %1327, %1328 : vector<8x128xf32>
    %1330 = arith.mulf %1329, %1243 : vector<8x128xf32>
    %1331 = arith.addf %1325, %1330 : vector<8x128xf32>
    %1332 = vector.broadcast %702 : vector<1x128xf32> to vector<8x128xf32>
    %1333 = arith.subf %696, %1332 : vector<8x128xf32>
    %1334 = vector.broadcast %762 : vector<1x128xf32> to vector<8x128xf32>
    %1335 = arith.mulf %1333, %1334 : vector<8x128xf32>
    %1336 = arith.mulf %1335, %1243 : vector<8x128xf32>
    %1337 = vector.broadcast %708 : vector<1x128xf32> to vector<8x128xf32>
    %1338 = arith.subf %1337, %696 : vector<8x128xf32>
    %1339 = vector.broadcast %763 : vector<1x128xf32> to vector<8x128xf32>
    %1340 = arith.mulf %1338, %1339 : vector<8x128xf32>
    %1341 = arith.mulf %1340, %1254 : vector<8x128xf32>
    %1342 = arith.addf %1336, %1341 : vector<8x128xf32>
    %1343 = vector.broadcast %703 : vector<1x128xf32> to vector<8x128xf32>
    %1344 = arith.subf %696, %1343 : vector<8x128xf32>
    %1345 = vector.broadcast %763 : vector<1x128xf32> to vector<8x128xf32>
    %1346 = arith.mulf %1344, %1345 : vector<8x128xf32>
    %1347 = arith.mulf %1346, %1254 : vector<8x128xf32>
    %1348 = vector.broadcast %709 : vector<1x128xf32> to vector<8x128xf32>
    %1349 = arith.subf %1348, %696 : vector<8x128xf32>
    %1350 = vector.broadcast %764 : vector<1x128xf32> to vector<8x128xf32>
    %1351 = arith.mulf %1349, %1350 : vector<8x128xf32>
    %1352 = arith.mulf %1351, %1265 : vector<8x128xf32>
    %1353 = arith.addf %1347, %1352 : vector<8x128xf32>
    %1354 = vector.broadcast %704 : vector<1x128xf32> to vector<8x128xf32>
    %1355 = arith.subf %696, %1354 : vector<8x128xf32>
    %1356 = vector.broadcast %764 : vector<1x128xf32> to vector<8x128xf32>
    %1357 = arith.mulf %1355, %1356 : vector<8x128xf32>
    %1358 = arith.mulf %1357, %1265 : vector<8x128xf32>
    %1359 = vector.broadcast %710 : vector<1x128xf32> to vector<8x128xf32>
    %1360 = arith.subf %1359, %696 : vector<8x128xf32>
    %1361 = vector.broadcast %765 : vector<1x128xf32> to vector<8x128xf32>
    %1362 = arith.mulf %1360, %1361 : vector<8x128xf32>
    %1363 = arith.mulf %1362, %1276 : vector<8x128xf32>
    %1364 = arith.addf %1358, %1363 : vector<8x128xf32>
    %1365 = vector.broadcast %705 : vector<1x128xf32> to vector<8x128xf32>
    %1366 = arith.subf %696, %1365 : vector<8x128xf32>
    %1367 = vector.broadcast %765 : vector<1x128xf32> to vector<8x128xf32>
    %1368 = arith.mulf %1366, %1367 : vector<8x128xf32>
    %1369 = arith.mulf %1368, %1276 : vector<8x128xf32>
    %1370 = vector.broadcast %711 : vector<1x128xf32> to vector<8x128xf32>
    %1371 = arith.subf %1370, %696 : vector<8x128xf32>
    %1372 = vector.broadcast %766 : vector<1x128xf32> to vector<8x128xf32>
    %1373 = arith.mulf %1371, %1372 : vector<8x128xf32>
    %1374 = arith.mulf %1373, %1287 : vector<8x128xf32>
    %1375 = arith.addf %1369, %1374 : vector<8x128xf32>
    %1376 = vector.broadcast %706 : vector<1x128xf32> to vector<8x128xf32>
    %1377 = arith.subf %696, %1376 : vector<8x128xf32>
    %1378 = vector.broadcast %766 : vector<1x128xf32> to vector<8x128xf32>
    %1379 = arith.mulf %1377, %1378 : vector<8x128xf32>
    %1380 = arith.mulf %1379, %1287 : vector<8x128xf32>
    %1381 = vector.broadcast %712 : vector<1x128xf32> to vector<8x128xf32>
    %1382 = arith.subf %1381, %696 : vector<8x128xf32>
    %1383 = vector.broadcast %767 : vector<1x128xf32> to vector<8x128xf32>
    %1384 = arith.mulf %1382, %1383 : vector<8x128xf32>
    %1385 = arith.mulf %1384, %1298 : vector<8x128xf32>
    %1386 = arith.addf %1380, %1385 : vector<8x128xf32>
    %1387 = tpu.concatenate %696, %1309, %1320, %1331, %1342, %1353, %1364, %1375, %1386 in 1 : vector<8x128xf32>, vector<8x128xf32>, vector<8x128xf32>, vector<8x128xf32>, vector<8x128xf32>, vector<8x128xf32>, vector<8x128xf32>, vector<8x128xf32>, vector<8x128xf32> -> vector<8x1152xf32>
    %1388 = arith.truncf %1387 : vector<8x1152xf32> to vector<8x1152xbf16>
    %c0_12 = arith.constant 0 : index
    %c0_13 = arith.constant 0 : index
    %1389 = vector.load %arg7[%c0_12, %c0_13] : memref<1152x128xbf16, #tpu.memory_space<vmem>>, vector<1152x128xbf16>
    %cst_14 = arith.constant dense<0.000000e+00> : vector<8x128xf32>
    %1390 = tpu.matmul %1388, %1389, %cst_14 {dimension_numbers = #tpu.dot_dimension_numbers<[1], [0], [0], [1], [0, 0, 1, 1], [], []>} : vector<8x1152xbf16>, vector<1152x128xbf16>, vector<8x128xf32> -> vector<8x128xf32>
    %1391 = tpu.iota {dimensions = array<i32: 1>} : vector<8x128xi32>
    %c16_i32 = arith.constant 16 : i32
    %1392 = vector.broadcast %c16_i32 : i32 to vector<8x128xi32>
    %1393 = arith.cmpi slt, %1391, %1392 : vector<8x128xi32>
    %cst_15 = arith.constant 0xFF800000 : f32
    %1394 = vector.broadcast %cst_15 : f32 to vector<8x128xf32>
    %1395 = arith.select %1393, %1390, %1394 : vector<8x128xi1>, vector<8x128xf32>
    %cst_16 = arith.constant dense<0xFF800000> : vector<8xf32>
    %1396 = vector.multi_reduction <maximumf>, %1395, %cst_16 [1] : vector<8x128xf32> to vector<8xf32>
    %1397 = vector.shape_cast %1396 : vector<8xf32> to vector<8x1xf32>
    %1398 = vector.broadcast %1397 : vector<8x1xf32> to vector<8x128xf32>
    %1399 = arith.subf %1395, %1398 : vector<8x128xf32>
    %1400 = math.exp %1399 : vector<8x128xf32>
    %cst_17 = arith.constant dense<0.000000e+00> : vector<8xf32>
    %1401 = vector.multi_reduction <add>, %1400, %cst_17 [1] : vector<8x128xf32> to vector<8xf32>
    %1402 = vector.shape_cast %1401 : vector<8xf32> to vector<8x1xf32>
    %1403 = math.log %1402 : vector<8x1xf32>
    %1404 = vector.broadcast %1403 : vector<8x1xf32> to vector<8x128xf32>
    %1405 = arith.subf %1399, %1404 : vector<8x128xf32>
    %c0_18 = arith.constant 0 : index
    %c0_19 = arith.constant 0 : index
    %1406 = vector.load %arg8[%c0_18, %c0_19] : memref<8x128xf32, #tpu.memory_space<vmem>>, vector<8x128xf32>
    tpu.vector_store %arg8[%c0_18, %c0_19], %1405 {strides = array<i32>} : memref<8x128xf32, #tpu.memory_space<vmem>>, vector<8x128xf32>,
    return
  }
  func.func @transform_0(%arg0: i32) -> (i32, i32) {
    %c0_i32 = arith.constant 0 : i32
    %c0_i32_0 = arith.constant 0 : i32
    return %arg0, %c0_i32 : i32, i32
  }
  func.func @transform_1(%arg0: i32) -> (i32, i32) {
    %c0_i32 = arith.constant 0 : i32
    %c0_i32_0 = arith.constant 0 : i32
    %c0_i32_1 = arith.constant 0 : i32
    return %c0_i32, %c0_i32_0 : i32, i32
  }
  func.func @transform_2(%arg0: i32) -> (i32, i32) {
    %c0_i32 = arith.constant 0 : i32
    %c0_i32_0 = arith.constant 0 : i32
    %c0_i32_1 = arith.constant 0 : i32
    return %c0_i32, %c0_i32_0 : i32, i32
  }
  func.func @transform_3(%arg0: i32) -> (i32, i32) {
    %c0_i32 = arith.constant 0 : i32
    %c0_i32_0 = arith.constant 0 : i32
    %c0_i32_1 = arith.constant 0 : i32
    return %c0_i32, %c0_i32_0 : i32, i32
  }
  func.func @transform_4(%arg0: i32) -> (i32, i32) {
    %c0_i32 = arith.constant 0 : i32
    %c0_i32_0 = arith.constant 0 : i32
    %c0_i32_1 = arith.constant 0 : i32
    return %c0_i32, %c0_i32_0 : i32, i32
  }
  func.func @transform_5(%arg0: i32) -> (i32, i32) {
    %c0_i32 = arith.constant 0 : i32
    %c0_i32_0 = arith.constant 0 : i32
    %c0_i32_1 = arith.constant 0 : i32
    return %c0_i32, %c0_i32_0 : i32, i32
  }
  func.func @transform_6(%arg0: i32) -> (i32, i32) {
    %c0_i32 = arith.constant 0 : i32
    %c0_i32_0 = arith.constant 0 : i32
    %c0_i32_1 = arith.constant 0 : i32
    return %c0_i32, %c0_i32_0 : i32, i32
  }
  func.func @transform_7(%arg0: i32) -> (i32, i32) {
    %c0_i32 = arith.constant 0 : i32
    %c0_i32_0 = arith.constant 0 : i32
    return %arg0, %c0_i32 : i32, i32
  }
}

</mosaic_0001>

<bundles_post_ra>
// kernel: kan_fully_connected_forward.1
= control target key start
LH: loop header
LB: loop body
LE: loop exit
PB: predicated region body
PF: predicated region fallthrough
CT: control target
= control target key end

     0   :  { %12 = vsyncpa [#allocation3], 0  ;;  %s5036_s0 = inlined_call_operand.vmem [shape: f32[8,128], index: 0, kind: input, shape index: {}]   ;;  %s5037_s1 = inlined_call_operand.hbm [shape: f32[14,128], index: 1, kind: input, shape index: {}]   ;;  %s5038_s2 = inlined_call_operand.hbm [shape: f32[55,128], index: 2, kind: input, shape index: {}]   ;;  %s5039_s3 = inlined_call_operand.hbm [shape: bf16[1152,128], index: 3, kind: input, shape index: {}]   ;;  %s5040_s4 = inlined_call_operand.hbm [shape: f32[14,128], index: 4, kind: input, shape index: {}]   ;;  %s5041_s5 = inlined_call_operand.vmem [shape: f32[55,128], index: 5, kind: input, shape index: {}]   ;;  %s5042_s6 = inlined_call_operand.hbm [shape: bf16[1152,128], index: 6, kind: input, shape index: {}]   ;;  %s5043_s7 = inlined_call_operand.hbm [shape: f32[8,128], index: 7, kind: output, shape index: {}]  }
   0x1   :  { %13 = vsyncpa [#allocation6], 0 }
   0x2   :  { %14 = vsyncpa [#allocation9], 0 }
   0x3   :  { %15 = vsyncpa [#allocation4], 0  ;;  %s3639_s24 = smov [#allocation5]   ;;  %s3640_s26 = smov [#allocation8]  }
   0x4   :  { %s35_s25 = sshll.u32 %s3639_s24, 4  ;;  %s59_s27 = sshll.u32 %s3640_s26, 4  ;;  %s36_s25 = int_to_ptr.vmem [resolvable:$true] %s35_s25  ;;  %s3691_s27 = int_to_ptr.vmem [resolvable:$true] %s59_s27 }
   0x5   :  { %s3499_s30 = scalar_lea.hbm %s5038_s2, 896 }
   0x6   :  { %p3500_p0 = scmp.ne.s32.totalorder %s5038_s2, %s3499_s30  ;;  %p3503_p1 = scmp.lt.u32.totalorder %s3499_s30, %s5038_s2 }
   0x8   :  { %p3505_p2 = pnand %p3503_p1, %p3500_p0 }
   0xa   :  { %3508 = shalt.err (!%p3505_p2)
}
   0xb   :  { %s3509_s12 = scalar_lea.vmem %s36_s25, 896  ;;  %p3514_p4 = scmp.lt.s32.totalorder %s36_s25, %s36_s25 }
   0xc   :  { %p3510_p3 = scmp.ne.s32.totalorder %s36_s25, %s3509_s12  ;;  %p3515_p5 = scmp.lt.s32.totalorder %s3509_s12, %s3509_s12 }
   0xe   :  { %p3516_p6 = por %p3515_p5, %p3514_p4 }
  0x10   :  { %p3517_p7 = pnand %p3516_p6, %p3510_p3 }
  0x12   :  { %3520 = shalt.err (!%p3517_p7)
}
  0x13   :  { %s3641_s13 = smov 128   ;;  %s3642_s14 = smov 8  }
  0x14   :  { %41 = dma.hbm_to_vmem [thread:$0]  %s5038_s2, 896, %s36_s25, [#allocation6], %s3641_s13, %s3641_s13, %s3642_s14  }
  0x15   :  { %s3521_s19 = scalar_lea.hbm %s5040_s4, 256 }
  0x16   :  { %p3522_p8 = scmp.ne.s32.totalorder %s5040_s4, %s3521_s19  ;;  %p3525_p9 = scmp.lt.u32.totalorder %s3521_s19, %s5040_s4 }
  0x18   :  { %p3527_p10 = pnand %p3525_p9, %p3522_p8 }
  0x1a   :  { %3530 = shalt.err (!%p3527_p10)
}
  0x1b   :  { %s3531_s24 = scalar_lea.vmem %s3691_s27, 256  ;;  %p3536_p12 = scmp.lt.s32.totalorder %s3691_s27, %s3691_s27 }
  0x1c   :  { %p3532_p11 = scmp.ne.s32.totalorder %s3691_s27, %s3531_s24  ;;  %p3537_p13 = scmp.lt.s32.totalorder %s3531_s24, %s3531_s24 }
  0x1e   :  { %p3538_p0 = por %p3537_p13, %p3536_p12 }
  0x20   :  { %p3539_p1 = pnand %p3538_p0, %p3532_p11 }
  0x22   :  { %3542 = shalt.err (!%p3539_p1)
}
  0x23   :  { %65 = dma.hbm_to_vmem [thread:$0]  %s5040_s4, 256, %s3691_s27, [#allocation9], %s3641_s13, %s3641_s13, %s3642_s14  }
  0x24   :  { %s3643_s26 = smov [#allocation2]   ;;  %s3644_s29 = smov [#allocation7]  }
  0x25   :  { %s23_s28 = sshll.u32 %s3643_s26, 4  ;;  %s47_s30 = sshll.u32 %s3644_s29, 4  ;;  %s24_s28 = int_to_ptr.vmem [resolvable:$true] %s23_s28  ;;  %s3728_s30 = int_to_ptr.vmem [resolvable:$true] %s47_s30 }
  0x26   :  { %s3543_s10 = scalar_lea.hbm %s5037_s1, 256 }
  0x27   :  { %p3544_p2 = scmp.ne.s32.totalorder %s5037_s1, %s3543_s10  ;;  %p3547_p3 = scmp.lt.u32.totalorder %s3543_s10, %s5037_s1 }
  0x29   :  { %p3549_p4 = pnand %p3547_p3, %p3544_p2 }
  0x2b   :  { %3552 = shalt.err (!%p3549_p4)
}
  0x2c   :  { %s3553_s4 = scalar_lea.vmem %s24_s28, 256  ;;  %p3558_p6 = scmp.lt.s32.totalorder %s24_s28, %s24_s28 }
  0x2d   :  { %p3554_p5 = scmp.ne.s32.totalorder %s24_s28, %s3553_s4  ;;  %p3559_p7 = scmp.lt.s32.totalorder %s3553_s4, %s3553_s4 }
  0x2f   :  { %p3560_p8 = por %p3559_p7, %p3558_p6 }
  0x31   :  { %p3561_p9 = pnand %p3560_p8, %p3554_p5 }
  0x33   :  { %3564 = shalt.err (!%p3561_p9)
}
  0x34   :  { %29 = dma.hbm_to_vmem [thread:$0]  %s5037_s1, 256, %s24_s28, [#allocation3], %s3641_s13, %s3641_s13, %s3642_s14  }
  0x35   :  { %s3565_s20 = scalar_lea.hbm %s5039_s3, 9216 }
  0x36   :  { %p3566_p10 = scmp.ne.s32.totalorder %s5039_s3, %s3565_s20  ;;  %p3569_p11 = scmp.lt.u32.totalorder %s3565_s20, %s5039_s3 }
  0x38   :  { %p3571_p12 = pnand %p3569_p11, %p3566_p10 }
  0x3a   :  { %3574 = shalt.err (!%p3571_p12)
}
  0x3b   :  { %s3575_s2 = scalar_lea.vmem %s3728_s30, 9216  ;;  %p3580_p0 = scmp.lt.s32.totalorder %s3728_s30, %s3728_s30 }
  0x3c   :  { %p3576_p13 = scmp.ne.s32.totalorder %s3728_s30, %s3575_s2  ;;  %p3581_p1 = scmp.lt.s32.totalorder %s3575_s2, %s3575_s2 }
  0x3e   :  { %p3582_p2 = por %p3581_p1, %p3580_p0 }
  0x40   :  { %p3583_p3 = pnand %p3582_p2, %p3576_p13 }
  0x42   :  { %3586 = shalt.err (!%p3583_p3)
}
  0x43   :  { %s3645_s1 = smov 64   ;;  %s3646_s13 = smov 4  }
  0x44   :  { %53 = dma.hbm_to_vmem [thread:$0]  %s5039_s3, 9216, %s3728_s30, [#allocation6], %s3645_s1, %s3645_s1, %s3646_s13  }
  0x45   :  { %s3647_s26 = smov [#allocation10]   ;;  %s3587_s9 = scalar_lea.hbm %s5042_s6, 9216 }
  0x46   :  { %s73_s28 = sshll.u32 %s3647_s26, 4  ;;  %p3588_p4 = scmp.ne.s32.totalorder %s5042_s6, %s3587_s9  ;;  %s74_s28 = int_to_ptr.vmem [resolvable:$true] %s73_s28 }
  0x47   :  { %p3591_p5 = scmp.lt.u32.totalorder %s3587_s9, %s5042_s6 }
  0x49   :  { %p3593_p6 = pnand %p3591_p5, %p3588_p4 }
  0x4b   :  { %3596 = shalt.err (!%p3593_p6)
}
  0x4c   :  { %s3597_s16 = scalar_lea.vmem %s74_s28, 9216  ;;  %p3602_p8 = scmp.lt.s32.totalorder %s74_s28, %s74_s28 }
  0x4d   :  { %p3598_p7 = scmp.ne.s32.totalorder %s74_s28, %s3597_s16  ;;  %p3603_p9 = scmp.lt.s32.totalorder %s3597_s16, %s3597_s16 }
  0x4f   :  { %p3604_p10 = por %p3603_p9, %p3602_p8 }
  0x51   :  { %p3605_p11 = pnand %p3604_p10, %p3598_p7 }
  0x53   :  { %3608 = shalt.err (!%p3605_p11)
}
  0x54   :  { %79 = dma.hbm_to_vmem [thread:$0]  %s5042_s6, 9216, %s74_s28, [#allocation9], %s3645_s1, %s3645_s1, %s3646_s13  }
  0x55   :  { %3631 = dma.done.wait [#allocation3], 256  }
  0x56   :  { %3632 = vsyncadd [#allocation3], 4294967040 }
  0x57   :  { %3633 = dma.done.wait [#allocation6], 10112  }
  0x58   :  { %3634 = vsyncadd [#allocation6], 4294957184 }
  0x59   :  { %3635 = dma.done.wait [#allocation9], 9472  }
  0x5a   :  { %3636 = vsyncadd [#allocation9], 4294957824  ;;  %v3346_v0 = vld [vmem:[#allocation7 + $0x40] sm:$0xff]   ;;  %v3350_v4 = vld [vmem:[#allocation7 + $0x48] sm:$0xff]   ;;  %v5044_v17 = vlaneseq  ;;  %v5045_v53 = vmov 0.0   ;;  %vm3649_vm14 = vmmov 0  }
  0x5b   :  { %v3347_v1 = vld [vmem:[#allocation7 + $0xc0] sm:$0xff]   ;;  %3100 = vmatprep.subr.bf16.mxu0 %v3346_v0  ;;  %v3351_v5 = vld [vmem:[#allocation7 + $0xc8] sm:$0xff]   ;;  %v3354_v8 = vld [vmem:[#allocation7 + $0x50] sm:$0xff]  }
  0x5c   :  { %v3348_v2 = vld [vmem:[#allocation7] sm:$0xff]   ;;  %3122 = vmatprep.subr.bf16.mxu1 %v3347_v1  ;;  %v3352_v6 = vld [vmem:[#allocation7 + $0x8] sm:$0xff]   ;;  %v3355_v9 = vld [vmem:[#allocation7 + $0xd0] sm:$0xff]   ;;  %v107_v22 = vshrl.u32 %v5044_v17, 7 }
  0x5d   :  { %v3349_v3 = vld [vmem:[#allocation7 + $0x80] sm:$0xff]   ;;  %3101 = vmatpush3.bf16.msra.mxu0 %v3348_v2  ;;  %v3353_v7 = vld [vmem:[#allocation7 + $0x88] sm:$0xff]   ;;  %v3356_v10 = vld [vmem:[#allocation7 + $0x10] sm:$0xff]  }
  0x5e   :  { %3123 = vmatpush3.bf16.msra.mxu1 %v3349_v3  ;;  %3102 = vmatprep.subr.bf16.mxu0 %v3350_v4  ;;  %v3357_v11 = vld [vmem:[#allocation7 + $0x90] sm:$0xff]   ;;  %v3358_v12 = vld [vmem:[#allocation7 + $0x58] sm:$0xff]   ;;  %v3362_v16 = vld [vmem:[#allocation7 + $0x60] sm:$0xff]   ;;  %v3775_v27 = vsub.s32 0, %v107_v22  ;;  %v3777_v29 = vsub.s32 1, %v107_v22  ;;  %v3779_v31 = vsub.s32 2, %v107_v22 }
  0x5f   :  { %3124 = vmatprep.subr.bf16.mxu1 %v3351_v5  ;;  %v3359_v13 = vld [vmem:[#allocation7 + $0xd8] sm:$0xff]   ;;  %v3363_v18 = vld [vmem:[#allocation7 + $0xe0] sm:$0xff]   ;;  %v3366_v21 = vld [vmem:[#allocation7 + $0x68] sm:$0xff]   ;;  %v3781_v33 = vsub.s32 3, %v107_v22  ;;  %v3783_v35 = vsub.s32 4, %v107_v22  ;;  %v3785_v37 = vsub.s32 5, %v107_v22 }
  0x60   :  { %v3360_v14 = vld [vmem:[#allocation7 + $0x18] sm:$0xff]   ;;  %v3364_v19 = vld [vmem:[#allocation7 + $0x20] sm:$0xff]   ;;  %v3367_v23 = vld [vmem:[#allocation7 + $0xe8] sm:$0xff]   ;;  %5084 = vst [vmem:[#allocation16_spill] sm:$0xff] %v3775_v27  ;;  %v3787_v39 = vsub.s32 6, %v107_v22  ;;  %v3798_v44 = vsub.s32 7, %v107_v22 }
  0x61   :  { %3103 = vmatpush3.bf16.msra.mxu0 %v3352_v6  ;;  %v3361_v15 = vld [vmem:[#allocation7 + $0x98] sm:$0xff]   ;;  %v3365_v20 = vld [vmem:[#allocation7 + $0xa0] sm:$0xff]   ;;  %v3368_v24 = vld [vmem:[#allocation7 + $0x28] sm:$0xff]  }
  0x62   :  { %3125 = vmatpush3.bf16.msra.mxu1 %v3353_v7  ;;  %3104 = vmatprep.subr.bf16.mxu0 %v3354_v8  ;;  %v3369_v25 = vld [vmem:[#allocation7 + $0xa8] sm:$0xff]   ;;  %v3370_v26 = vld [vmem:[#allocation7 + $0x70] sm:$0xff]   ;;  %v3374_v34 = vld [vmem:[#allocation7 + $0x78] sm:$0xff]   ;;  %5085 = vst [vmem:[#allocation17_spill] sm:$0xff] %v3787_v39 }
  0x63   :  { %3126 = vmatprep.subr.bf16.mxu1 %v3355_v9  ;;  %v3371_v28 = vld [vmem:[#allocation7 + $0xf0] sm:$0xff]   ;;  %v3375_v36 = vld [vmem:[#allocation7 + $0xf8] sm:$0xff]   ;;  %v3796_v43 = vld [vmem:[#allocation5] sm:$0xff] }
  0x64   :  { %v3372_v30 = vld [vmem:[#allocation7 + $0x30] sm:$0xff]   ;;  %v3376_v38 = vld [vmem:[#allocation7 + $0x38] sm:$0xff]   ;;  %v221_v52 = vrot.slane %v3796_v43, %v3775_v27  ;;  %v3378_v58 = vld [vmem:[#allocation7 + $0x140] sm:$0xff]   ;;  %v228_v7 = vrot.slane %v3796_v43, %v3777_v29 }
  0x65   :  { %3105 = vmatpush3.bf16.msra.mxu0 %v3356_v10  ;;  %v3373_v32 = vld [vmem:[#allocation7 + $0xb0] sm:$0xff]   ;;  %v3377_v40 = vld [vmem:[#allocation7 + $0xb8] sm:$0xff]   ;;  %v3380_v0 = vld [vmem:[#allocation7 + $0x1c0] sm:$0xff]   ;;  %v239_v10 = vrot.slane %v3796_v43, %v3779_v31 }
  0x66   :  { %3127 = vmatpush3.bf16.msra.mxu1 %v3357_v11  ;;  %3106 = vmatprep.subr.bf16.mxu0 %v3358_v12  ;;  %v3792_v41 = vld [vmem:[%s5036_s0] sm:$0xff]  ;;  %v3383_v17 = vld [vmem:[#allocation7 + $0x108] sm:$0xff]  }
  0x67   :  { %3128 = vmatprep.subr.bf16.mxu1 %v3359_v13  ;;  %v3794_v42 = vld [vmem:[#allocation2] sm:$0xff] }
  0x68   :  { %v109_v45 = vrot.slane %v3794_v42, %v3775_v27  ;;  %v116_v46 = vrot.slane %v3794_v42, %v3777_v29  ;;  %v123_v47 = vrot.slane %v3794_v42, %v3779_v31  ;;  %v130_v48 = vrot.slane %v3794_v42, %v3781_v33 }
  0x69   :  { %3107 = vmatpush3.bf16.msra.mxu0 %v3360_v14  ;;  %v137_v49 = vrot.slane %v3794_v42, %v3783_v35  ;;  %v3812_v50 = vrot.slane %v3794_v42, %v3785_v37  ;;  %v3816_v51 = vrot.slane %v3794_v42, %v3787_v39 }
  0x6a   :  { %3129 = vmatpush3.bf16.msra.mxu1 %v3361_v15  ;;  %3108 = vmatprep.subr.bf16.mxu0 %v3362_v16  ;;  %vm110_vm0 = vcmp.ge.f32.partialorder %v3792_v41, %v109_v45  ;;  %vm117_vm1 = vcmp.ge.f32.partialorder %v3792_v41, %v116_v46  ;;  %vm124_vm2 = vcmp.ge.f32.partialorder %v3792_v41, %v123_v47 }
  0x6b   :  { %3130 = vmatprep.subr.bf16.mxu1 %v3363_v18  ;;  %vm131_vm3 = vcmp.ge.f32.partialorder %v3792_v41, %v130_v48  ;;  %v2928_v54 = vsel %vm110_vm0, 1.0, %v5045_v53  ;;  %v2929_v55 = vsel %vm117_vm1, 1.0, %v5045_v53  ;;  %v2930_v56 = vsel %vm124_vm2, 1.0, %v5045_v53 }
  0x6c   :  { %v2931_v57 = vsel %vm131_vm3, 1.0, %v5045_v53  ;;  %vm138_vm4 = vcmp.ge.f32.partialorder %v3792_v41, %v137_v49  ;;  %vm145_vm5 = vcmp.ge.f32.partialorder %v3792_v41, %v3812_v50  ;;  %vm152_vm6 = vcmp.ge.f32.partialorder %v3792_v41, %v3816_v51 }
  0x6d   :  { %3109 = vmatpush3.bf16.msra.mxu0 %v3364_v19  ;;  %v204_v59 = vsub.f32 %v2928_v54, %v2929_v55  ;;  %v2932_v60 = vsel %vm138_vm4, 1.0, %v5045_v53  ;;  %v2933_v61 = vsel %vm145_vm5, 1.0, %v5045_v53  ;;  %v3836_v62 = vsel %vm152_vm6, 1.0, %v5045_v53 }
  0x6e   :  { %3131 = vmatpush3.bf16.msra.mxu1 %v3365_v20  ;;  %3110 = vmatprep.subr.bf16.mxu0 %v3366_v21  ;;  %v205_v63 = vsub.f32 %v2929_v55, %v2930_v56  ;;  %v206_v1 = vsub.f32 %v2930_v56, %v2931_v57  ;;  %v207_v2 = vsub.f32 %v2931_v57, %v2932_v60 }
  0x6f   :  { %3132 = vmatprep.subr.bf16.mxu1 %v3367_v23  ;;  %v208_v3 = vsub.f32 %v2932_v60, %v2933_v61  ;;  %v3839_v4 = vsub.f32 %v2933_v61, %v3836_v62  ;;  %v3842_v5 = vsub.f32 %v3792_v41, %v109_v45  ;;  %v224_v6 = vsub.f32 %v123_v47, %v3792_v41 }
  0x70   :  { %v3848_v8 = vsub.f32 %v3792_v41, %v116_v46  ;;  %v235_v9 = vsub.f32 %v130_v48, %v3792_v41  ;;  %v3854_v11 = vsub.f32 %v3792_v41, %v123_v47  ;;  %v3857_v12 = vsub.f32 %v137_v49, %v3792_v41  ;;  %v3884_v46 = vld [vmem:[#allocation5 + $0x10] sm:$0xff] }
  0x71   :  { %3111 = vmatpush3.bf16.msra.mxu0 %v3368_v24  ;;  %v222_v13 = vmul.f32 %v221_v52, %v3842_v5  ;;  %v229_v14 = vmul.f32 %v228_v7, %v224_v6  ;;  %v250_v16 = vrot.slane %v3796_v43, %v3781_v33  ;;  %v3865_v20 = vsub.f32 %v3792_v41, %v130_v48 }
  0x72   :  { %3133 = vmatpush3.bf16.msra.mxu1 %v3369_v25  ;;  %3112 = vmatprep.subr.bf16.mxu0 %v3370_v26  ;;  %v233_v15 = vmul.f32 %v3848_v8, %v228_v7  ;;  %v240_v18 = vmul.f32 %v239_v10, %v235_v9  ;;  %v244_v19 = vmul.f32 %v3854_v11, %v239_v10  ;;  %v3916_v10 = vld [vmem:[#allocation5 + $0x18] sm:$0xff] }
  0x73   :  { %3134 = vmatprep.subr.bf16.mxu1 %v3371_v28  ;;  %v3869_v21 = vsub.f32 %v3812_v50, %v3792_v41  ;;  %v223_v22 = vmul.f32 %v222_v13, %v204_v59  ;;  %v230_v23 = vmul.f32 %v229_v14, %v205_v63  ;;  %v251_v25 = vmul.f32 %v250_v16, %v3857_v12 }
  0x74   :  { %v234_v24 = vmul.f32 %v233_v15, %v205_v63  ;;  %v241_v26 = vmul.f32 %v240_v18, %v206_v1  ;;  %v245_v28 = vmul.f32 %v244_v19, %v206_v1  ;;  %v3882_v45 = vsub.f32 %v3816_v51, %v3792_v41 }
  0x75   :  { %3113 = vmatpush3.bf16.msra.mxu0 %v3372_v30  ;;  %v255_v30 = vmul.f32 %v3865_v20, %v250_v16  ;;  %v3889_v54 = vrot.slane %v3796_v43, %v3785_v37  ;;  %v3898_v57 = vsub.f32 %v3792_v41, %v3816_v51  ;;  %v3912_v51 = vrot.slane %v3884_v46, %v3777_v29 }
  0x76   :  { %3135 = vmatpush3.bf16.msra.mxu1 %v3373_v32  ;;  %3114 = vmatprep.subr.bf16.mxu0 %v3374_v34  ;;  %v261_v32 = vrot.slane %v3796_v43, %v3783_v35  ;;  %v3875_v34 = vld [vmem:[#allocation5 + $0x8] sm:$0xff]  ;;  %v242_v47 = vadd.f32 %v241_v26, %v234_v24 }
  0x77   :  { %3136 = vmatprep.subr.bf16.mxu1 %v3375_v36  ;;  %v231_v36 = vadd.f32 %v230_v23, %v223_v22  ;;  %v256_v48 = vmul.f32 %v255_v30, %v207_v2  ;;  %v273_v59 = vmul.f32 %v3889_v54, %v3882_v45  ;;  %v356_v60 = vrot.slane %v3875_v34, %v3785_v37  ;;  %v3925_v23 = vld [vmem:[#allocation5 + $0x20] sm:$0xff] }
  0x78   :  { %v262_v52 = vmul.f32 %v261_v32, %v3869_v21  ;;  %v362_v61 = vrot.slane %v3875_v34, %v3787_v39 }
  0x79   :  { %3115 = vmatpush3.bf16.msra.mxu0 %v3376_v38  ;;  %v252_v38 = vmul.f32 %v251_v25, %v207_v2  ;;  %v274_v2 = vmul.f32 %v273_v59, %v3839_v4  ;;  %v357_v6 = vmul.f32 %v356_v60, %v3842_v5  ;;  %v553_v59 = vrot.slane %v3925_v23, %v3783_v35 }
  0x7a   :  { %3137 = vmatpush3.bf16.msra.mxu1 %v3377_v40  ;;  %3144 = vmatprep.subr.bf16.mxu0 %v3378_v58  ;;  %v3878_v40 = vsub.f32 %v3792_v41, %v137_v49  ;;  %v3894_v49 = vsub.f32 %v3792_v41, %v3812_v50  ;;  %v263_v58 = vmul.f32 %v262_v52, %v208_v3 }
  0x7b   :  { %3166 = vmatprep.subr.bf16.mxu1 %v3380_v0  ;;  %v253_v55 = vadd.f32 %v252_v38, %v245_v28  ;;  %v371_v0 = vrot.slane %v3875_v34, %v3798_v44  ;;  %v380_v50 = vrot.slane %v3884_v46, %v3775_v27  ;;  %v363_v7 = vmul.f32 %v362_v61, %v235_v9 }
  0x7c   :  { %v266_v56 = vmul.f32 %v3878_v40, %v261_v32  ;;  %v264_v1 = vadd.f32 %v263_v58, %v256_v48  ;;  %v358_v18 = vmul.f32 %v357_v6, %v231_v36  ;;  %v390_v32 = vmul.f32 %v3912_v51, %v3882_v45 }
  0x7d   :  { %v372_v13 = vmul.f32 %v371_v0, %v3857_v12  ;;  %v375_v14 = vmul.f32 %v371_v0, %v3854_v11  ;;  %v381_v15 = vmul.f32 %v380_v50, %v3869_v21  ;;  %v364_v19 = vmul.f32 %v363_v7, %v242_v47  ;;  %v3952_v7 = vld [vmem:[#allocation5 + $0x28] sm:$0xff] }
  0x7e   :  { %v267_v63 = vmul.f32 %v266_v56, %v208_v3  ;;  %v366_v3 = vmul.f32 %v362_v61, %v3848_v8  ;;  %v384_v22 = vmul.f32 %v380_v50, %v3865_v20  ;;  %v459_v38 = vrot.slane %v3916_v10, %v3777_v29 }
  0x7f   :  { %v373_v9 = vmul.f32 %v372_v13, %v253_v55  ;;  %v376_v25 = vmul.f32 %v375_v14, %v253_v55  ;;  %v382_v26 = vmul.f32 %v381_v15, %v264_v1  ;;  %v365_v28 = vadd.f32 %v364_v19, %v358_v18 }
  0x80   :  { %v3922_v16 = vadd.f32 %v274_v2, %v267_v63  ;;  %v367_v24 = vmul.f32 %v366_v3, %v242_v47  ;;  %v385_v30 = vmul.f32 %v384_v22, %v264_v1  ;;  %v465_v36 = vrot.slane %v3916_v10, %v3779_v31 }
  0x81   :  { %v383_v52 = vadd.f32 %v382_v26, %v376_v25  ;;  %v474_v56 = vrot.slane %v3916_v10, %v3781_v33  ;;  %v460_v55 = vmul.f32 %v459_v38, %v3842_v5  ;;  %v3939_v58 = vrot.slane %v3916_v10, %v3783_v35 }
  0x82   :  { %v374_v48 = vadd.f32 %v373_v9, %v367_v24  ;;  %v391_v47 = vmul.f32 %v390_v32, %v3922_v16  ;;  %v466_v60 = vmul.f32 %v465_v36, %v3857_v12  ;;  %v469_v61 = vmul.f32 %v465_v36, %v3848_v8 }
  0x83   :  { %v475_v63 = vmul.f32 %v474_v56, %v3869_v21  ;;  %v478_v0 = vmul.f32 %v474_v56, %v3854_v11  ;;  %v461_v1 = vmul.f32 %v460_v55, %v365_v28  ;;  %v484_v2 = vmul.f32 %v3939_v58, %v3882_v45 }
  0x84   :  { %v3947_v50 = vadd.f32 %v391_v47, %v385_v30  ;;  %v554_v6 = vmul.f32 %v553_v59, %v3842_v5  ;;  %v467_v3 = vmul.f32 %v466_v60, %v374_v48  ;;  %v470_v13 = vmul.f32 %v469_v61, %v374_v48  ;;  %v3975_v48 = vld [vmem:[#allocation2 + $0x8] sm:$0x3f] }
  0x85   :  { %v476_v14 = vmul.f32 %v475_v63, %v383_v52  ;;  %v479_v12 = vmul.f32 %v478_v0, %v383_v52  ;;  %v559_v18 = vrot.slane %v3925_v23, %v3785_v37  ;;  %v3959_v19 = vrot.slane %v3925_v23, %v3787_v39 }
  0x86   :  { %v485_v15 = vmul.f32 %v484_v2, %v3947_v50  ;;  %v638_v22 = vrot.slane %v3952_v7, %v3787_v39  ;;  %v468_v24 = vadd.f32 %v467_v3, %v461_v1  ;;  %v3965_v25 = vrot.slane %v3952_v7, %v3798_v44 }
  0x87   :  { %v477_v9 = vadd.f32 %v476_v14, %v470_v13  ;;  %v158_v26 = vrot.slane %v3794_v42, %v3798_v44  ;;  %v560_v30 = vmul.f32 %v559_v18, %v3869_v21  ;;  %v563_v32 = vmul.f32 %v559_v18, %v3848_v8 }
  0x88   :  { %v3969_v28 = vadd.f32 %v485_v15, %v479_v12  ;;  %v569_v38 = vmul.f32 %v3959_v19, %v3882_v45  ;;  %v555_v52 = vmul.f32 %v554_v6, %v468_v24  ;;  %v639_v36 = vmul.f32 %v638_v22, %v3842_v5 }
  0x89   :  { %v645_v56 = vmul.f32 %v3965_v25, %v3882_v45  ;;  %vm159_vm7 = vcmp.ge.f32.partialorder %v3792_v41, %v158_v26  ;;  %v561_v42 = vmul.f32 %v560_v30, %v477_v9  ;;  %v564_v47 = vmul.f32 %v563_v32, %v477_v9 }
  0x8a   :  { %v570_v55 = vmul.f32 %v569_v38, %v3969_v28  ;;  %v2935_v21 = vsel %vm159_vm7, 1.0, %v5045_v53  ;;  %v165_v59 = vrot.slane %v3975_v48, %v3775_v27  ;;  %v3987_v60 = vrot.slane %v3975_v48, %v3777_v29 }
  0x8b   :  { %v210_v5 = vsub.f32 %v3836_v62, %v2935_v21  ;;  %v277_v45 = vmul.f32 %v3894_v49, %v3889_v54  ;;  %v562_v61 = vadd.f32 %v561_v42, %v555_v52  ;;  %v3995_v0 = vsub.f32 %v158_v26, %v3792_v41 }
  0x8c   :  { %v3992_v63 = vadd.f32 %v570_v55, %v564_v47  ;;  %v283_v1 = vrot.slane %v3796_v43, %v3787_v39  ;;  %vm166_vm8 = vcmp.ge.f32.partialorder %v3792_v41, %v165_v59  ;;  %vm173_vm9 = vcmp.ge.f32.partialorder %v3792_v41, %v3987_v60 }
  0x8d   :  { %v278_v2 = vmul.f32 %v277_v45, %v3839_v4  ;;  %v290_v62 = vsub.f32 %v165_v59, %v3792_v41  ;;  %v640_v6 = vmul.f32 %v639_v36, %v562_v61  ;;  %v2936_v3 = vsel %vm166_vm8, 1.0, %v5045_v53  ;;  %v4042_v61 = vld [vmem:[#allocation5 + $0x30] sm:$0x7f] }
  0x8e   :  { %v646_v54 = vmul.f32 %v645_v56, %v3992_v63  ;;  %v4007_v13 = vsel %vm173_vm9, 1.0, %v5045_v53  ;;  %v4009_v14 = vsub.f32 %v2935_v21, %v2936_v3  ;;  %v284_v15 = vmul.f32 %v283_v1, %v3995_v0 }
  0x8f   :  { %v4012_v12 = vsub.f32 %v2936_v3, %v4007_v13  ;;  %v288_v18 = vmul.f32 %v3898_v57, %v283_v1  ;;  %v294_v22 = vrot.slane %v3796_v43, %v3798_v44  ;;  %v4019_v24 = vsub.f32 %v3792_v41, %v158_v26 }
  0x90   :  { %v647_v4 = vadd.f32 %v646_v54, %v640_v6  ;;  %v4022_v9 = vsub.f32 %v3792_v41, %v165_v59  ;;  %v285_v30 = vmul.f32 %v284_v15, %v210_v5  ;;  %v393_v38 = vmul.f32 %v3912_v51, %v3878_v40 }
  0x91   :  { %v289_v32 = vmul.f32 %v288_v18, %v210_v5  ;;  %v398_v52 = vrot.slane %v3884_v46, %v3779_v31  ;;  %v295_v56 = vmul.f32 %v294_v22, %v290_v62  ;;  %v4030_v42 = vrot.slane %v3884_v46, %v3781_v33 }
  0x92   :  { %v713_v36 = vpack.c.bf16 %v647_v4, %v647_v4  ;;  %v487_v43 = vmul.f32 %v3939_v58, %v3865_v20  ;;  %v286_v26 = vadd.f32 %v285_v30, %v278_v2  ;;  %v394_v47 = vmul.f32 %v393_v38, %v3922_v16 }
  0x93   :  { %v399_v55 = vmul.f32 %v398_v52, %v3995_v0  ;;  %v402_v21 = vmul.f32 %v398_v52, %v3894_v49  ;;  %v296_v51 = vmul.f32 %v295_v56, %v4009_v14  ;;  %v408_v59 = vmul.f32 %v4030_v42, %v290_v62 }
  0x94   :  { %1329 = vmatprep.mubr.bf16.mxu0 %v713_v36  ;;  %v488_v5 = vmul.f32 %v487_v43, %v3947_v50  ;;  %v492_v45 = vrot.slane %v3916_v10, %v3785_v37  ;;  %v4046_v16 = vrot.slane %v3916_v10, %v3787_v39  ;;  %v572_v2 = vmul.f32 %v3959_v19, %v3854_v11 }
  0x95   :  { %v400_v58 = vmul.f32 %v399_v55, %v286_v26  ;;  %v403_v1 = vmul.f32 %v402_v21, %v286_v26  ;;  %v4050_v6 = vadd.f32 %v296_v51, %v289_v32  ;;  %v577_v3 = vrot.slane %v3925_v23, %v3798_v44  ;;  %v3379_v26 = vld [vmem:[#allocation7 + $0x100] sm:$0xff]  }
  0x96   :  { %v493_v54 = vmul.f32 %v492_v45, %v3995_v0  ;;  %v496_v50 = vmul.f32 %v492_v45, %v3878_v40  ;;  %v502_v18 = vmul.f32 %v4046_v16, %v290_v62  ;;  %v573_v4 = vmul.f32 %v572_v2, %v3969_v28 }
  0x97   :  { %v401_v15 = vadd.f32 %v400_v58, %v394_v47  ;;  %v4060_v30 = vrot.slane %v3952_v7, %v3775_v27  ;;  %v409_v19 = vmul.f32 %v408_v59, %v4050_v6  ;;  %v578_v32 = vmul.f32 %v577_v3, %v3995_v0  ;;  %v3382_v59 = vld [vmem:[#allocation7 + $0x148] sm:$0xff]  }
  0x98   :  { %v581_v38 = vmul.f32 %v577_v3, %v3865_v20  ;;  %v653_v52 = vrot.slane %v4042_v61, %v3775_v27  ;;  %v662_v28 = vrot.slane %v4042_v61, %v3777_v29  ;;  %v711_v21 = vmax.f32 %v3792_v41, 0.0 }
  0x99   :  { %v494_v36 = vmul.f32 %v493_v54, %v401_v15  ;;  %v497_v56 = vmul.f32 %v496_v50, %v401_v15  ;;  %v587_v43 = vmul.f32 %v4060_v30, %v290_v62  ;;  %v4070_v47 = vadd.f32 %v409_v19, %v403_v1 }
  0x9a   :  { %v657_v55 = vmul.f32 %v653_v52, %v3854_v11  ;;  %v648_v51 = vmul.f32 %v3965_v25, %v3848_v8  ;;  %v663_v58 = vmul.f32 %v662_v28, %v290_v62  ;;  %v666_v2 = vmul.f32 %v662_v28, %v3865_v20 }
  0x9b   :  { %v495_v45 = vadd.f32 %v494_v36, %v488_v5  ;;  %v654_v54 = vmul.f32 %v653_v52, %v3995_v0  ;;  %v503_v50 = vmul.f32 %v502_v18, %v4070_v47  ;;  %v712_v3 = vpack.c.bf16 %v711_v21, %v711_v21  ;;  %v3386_v5 = vld [vmem:[#allocation7 + $0x150] sm:$0xff]  }
  0x9c   :  { %v649_v1 = vmul.f32 %v648_v51, %v3992_v63  ;;  %v4082_v11 = vrot.slane %v3975_v48, %v3779_v31  ;;  %v299_v8 = vmul.f32 %v4019_v24, %v294_v22  ;;  %v4087_v25 = vsub.f32 %v3987_v60, %v3792_v41 }
  0x9d   :  { %v579_v15 = vmul.f32 %v578_v32, %v495_v45  ;;  %v582_v19 = vmul.f32 %v581_v38, %v495_v45  ;;  %v504_v20 = vadd.f32 %v503_v50, %v497_v56  ;;  %1330 = vmatmul.mubr.bf16.vlgmr.msra.gmra.mrb[0].mxu0 %v712_v3  ;;  %v305_v63 = vrot.slane %v3875_v34, %v3775_v27 }
  0x9e   :  { %vm180_vm10 = vcmp.ge.f32.partialorder %v3792_v41, %v4082_v11  ;;  %v4095_v0 = vsub.f32 %v4082_v11, %v3792_v41  ;;  %3145 = vmatpush3.bf16.msra.mxu0 %v3379_v26  ;;  %v300_v18 = vmul.f32 %v299_v8, %v4009_v14  ;;  %v4103_v32 = vrot.slane %v3875_v34, %v3777_v29  ;;  %v3387_v26 = vld [vmem:[#allocation7 + $0x110] sm:$0xff]  }
  0x9f   :  { %v580_v62 = vadd.f32 %v579_v15, %v573_v4  ;;  %v4098_v22 = vsel %vm180_vm10, 1.0, %v5045_v53  ;;  %v588_v38 = vmul.f32 %v587_v43, %v504_v20  ;;  %3146 = vmatprep.subr.bf16.mxu0 %v3382_v59  ;;  %v306_v36 = vmul.f32 %v305_v63, %v4087_v25  ;;  %v3390_v43 = vld [vmem:[#allocation7 + $0x158] sm:$0xff]  }
  0xa0   :  { %v4107_v52 = vsub.f32 %v4007_v13, %v4098_v22  ;;  %v310_v4 = vmul.f32 %v4022_v9, %v305_v63  ;;  %v317_v14 = vmul.f32 %v4103_v32, %v4095_v0  ;;  %v411_v21 = vmul.f32 %v4030_v42, %v3898_v57  ;;  %v3391_v63 = vld [vmem:[#allocation7 + $0x118] sm:$0xff]  }
  0xa1   :  { %v658_v56 = vmul.f32 %v657_v55, %v580_v62  ;;  %v655_v28 = vmul.f32 %v654_v54, %v580_v62  ;;  %v589_v51 = vadd.f32 %v588_v38, %v582_v19  ;;  %v307_v59 = vmul.f32 %v306_v36, %v4012_v12  ;;  %v3381_v38 = vld [vmem:[#allocation7 + $0x180] sm:$0xff]  }
  0xa2   :  { %v311_v13 = vmul.f32 %v310_v4, %v4012_v12  ;;  %v416_v45 = vrot.slane %v3884_v46, %v3783_v35  ;;  %3147 = vmatpush3.bf16.msra.mxu0 %v3383_v17  ;;  %v318_v55 = vmul.f32 %v317_v14, %v4107_v52  ;;  %v412_v54 = vmul.f32 %v411_v21, %v4050_v6  ;;  %v3394_v36 = vld [vmem:[#allocation7 + $0x160] sm:$0xff]  }
  0xa3   :  { %v656_v50 = vadd.f32 %v655_v28, %v649_v1  ;;  %v4123_v3 = vrot.slane %v3884_v46, %v3785_v37  ;;  %v664_v42 = vmul.f32 %v663_v58, %v589_v51  ;;  %v4125_v15 = vmul.f32 %v666_v2, %v589_v51  ;;  %3148 = vmatprep.subr.bf16.mxu0 %v3386_v5  ;;  %v3384_v5 = vld [vmem:[#allocation7 + $0x1c8] sm:$0xff]  }
  0xa4   :  { %v308_v19 = vadd.f32 %v307_v59, %v300_v18  ;;  %v417_v12 = vmul.f32 %v416_v45, %v4087_v25  ;;  %v4128_v62 = vadd.f32 %v318_v55, %v311_v13  ;;  %v420_v17 = vmul.f32 %v416_v45, %v4019_v24  ;;  %v3385_v55 = vld [vmem:[#allocation7 + $0x188] sm:$0xff]  }
  0xa5   :  { %v714_v8 = vpack.c.bf16 %v656_v50, %v656_v50  ;;  %v426_v6 = vmul.f32 %v4123_v3, %v4095_v0  ;;  %v665_v1 = vadd.f32 %v664_v42, %v658_v56  ;;  %v505_v58 = vmul.f32 %v4046_v16, %v3894_v49  ;;  %v3398_v42 = vld [vmem:[#allocation7 + $0x168] sm:$0xff]  }
  0xa6   :  { %v418_v4 = vmul.f32 %v417_v12, %v308_v19  ;;  %v510_v2 = vrot.slane %v3916_v10, %v3798_v44  ;;  %3149 = vmatpush3.bf16.msra.mxu0 %v3387_v26  ;;  %v421_v18 = vmul.f32 %v420_v17, %v308_v19  ;;  %v4140_v14 = vrot.slane %v3925_v23, %v3775_v27  ;;  %v3395_v10 = vld [vmem:[#allocation7 + $0x120] sm:$0xff]   ;;  %v3388_v19 = vld [vmem:[#allocation7 + $0x1d0] sm:$0xff]  }
  0xa7   :  { %v427_v28 = vmul.f32 %v426_v6, %v4128_v62  ;;  %v590_v56 = vmul.f32 %v4060_v30, %v3878_v40  ;;  %v715_v21 = vpack.c.bf16 %v665_v1, %v665_v1  ;;  %3150 = vmatprep.subr.bf16.mxu0 %v3390_v43  ;;  %v506_v16 = vmul.f32 %v505_v58, %v4070_v47  ;;  %v3399_v58 = vld [vmem:[#allocation7 + $0x128] sm:$0xff]  }
  0xa8   :  { %v419_v51 = vadd.f32 %v418_v4, %v412_v54  ;;  %v511_v59 = vmul.f32 %v510_v2, %v4087_v25  ;;  %v514_v26 = vmul.f32 %v510_v2, %v3898_v57  ;;  %v520_v45 = vmul.f32 %v4140_v14, %v4095_v0 }
  0xa9   :  { %v4146_v13 = vadd.f32 %v427_v28, %v421_v18  ;;  %v591_v50 = vmul.f32 %v590_v56, %v504_v20  ;;  %1369 = vmatprep.mubr.bf16.mxu1 %v715_v21  ;;  %v595_v43 = vrot.slane %v3952_v7, %v3777_v29  ;;  %v4155_v47 = vrot.slane %v3952_v7, %v3779_v31  ;;  %v3389_v28 = vld [vmem:[#allocation7 + $0x190] sm:$0xff]  }
  0xaa   :  { %v512_v30 = vmul.f32 %v511_v59, %v419_v51  ;;  %v671_v54 = vrot.slane %v4042_v61, %v3779_v31  ;;  %1370 = vmatmul.mubr.bf16.vlgmr.msra.gmra.mrb[0].mxu1 %v714_v8  ;;  %3151 = vmatpush3.bf16.msra.mxu0 %v3391_v63  ;;  %v515_v12 = vmul.f32 %v514_v26, %v419_v51  ;;  %v3392_v51 = vld [vmem:[#allocation7 + $0x1d8] sm:$0xff]   ;;  %v3403_v26 = vld [vmem:[#allocation7 + $0x130] sm:$0xff]  }
  0xab   :  { %v521_v20 = vmul.f32 %v520_v45, %v4146_v13  ;;  %v4162_v17 = vrot.slane %v4042_v61, %v3781_v33  ;;  %3167 = vmatpush3.bf16.msra.mxu1 %v3381_v38  ;;  %3152 = vmatprep.subr.bf16.mxu0 %v3394_v36  ;;  %v596_v1 = vmul.f32 %v595_v43, %v4087_v25  ;;  %v3402_v38 = vld [vmem:[#allocation7 + $0x170] sm:$0xff]  }
  0xac   :  { %v513_v6 = vadd.f32 %v512_v30, %v506_v16  ;;  %v599_v4 = vmul.f32 %v595_v43, %v3894_v49  ;;  %3168 = vmatprep.subr.bf16.mxu1 %v3384_v5  ;;  %v605_v8 = vmul.f32 %v4155_v47, %v4095_v0  ;;  %v675_v63 = vmul.f32 %v671_v54, %v3878_v40 }
  0xad   :  { %v4166_v2 = vadd.f32 %v521_v20, %v515_v12  ;;  %v681_v18 = vmul.f32 %v4162_v17, %v4095_v0  ;;  %v672_v21 = vmul.f32 %v671_v54, %v4087_v25  ;;  %v4176_v5 = vrot.slane %v3975_v48, %v3781_v33  ;;  %v3396_v54 = vld [vmem:[#allocation7 + $0x1e0] sm:$0xff]  }
  0xae   :  { %v597_v36 = vmul.f32 %v596_v1, %v513_v6  ;;  %v600_v56 = vmul.f32 %v599_v4, %v513_v6  ;;  %3153 = vmatpush3.bf16.msra.mxu0 %v3395_v10  ;;  %v193_v40 = vrot.slane %v3975_v48, %v3783_v35  ;;  %v4183_v0 = vrot.slane %v3975_v48, %v3785_v37  ;;  %v3407_v4 = vld [vmem:[#allocation7 + $0x138] sm:$0xff]  }
  0xaf   :  { %v606_v16 = vmul.f32 %v605_v8, %v4166_v2  ;;  %v4187_v59 = vsub.f32 %v3792_v41, %v3987_v60  ;;  %3169 = vmatpush3.bf16.msra.mxu1 %v3385_v55  ;;  %3154 = vmatprep.subr.bf16.mxu0 %v3398_v42  ;;  %vm187_vm11 = vcmp.ge.f32.partialorder %v3792_v41, %v4176_v5  ;;  %v3393_v60 = vld [vmem:[#allocation7 + $0x198] sm:$0xff]  }
  0xb0   :  { %v598_v25 = vadd.f32 %v597_v36, %v591_v50  ;;  %v4193_v10 = vsub.f32 %v4176_v5, %v3792_v41  ;;  %3170 = vmatprep.subr.bf16.mxu1 %v3388_v19  ;;  %v2939_v48 = vsel %vm187_vm11, 1.0, %v5045_v53  ;;  %vm194_vm12 = vcmp.ge.f32.partialorder %v3792_v41, %v193_v40  ;;  %v3406_v50 = vld [vmem:[#allocation7 + $0x178] sm:$0xff]  }
  0xb1   :  { %v4195_v45 = vadd.f32 %v606_v16, %v600_v56  ;;  %vm201_vm13 = vcmp.ge.f32.partialorder %v3792_v41, %v4183_v0  ;;  %v4202_v30 = vsel %vm194_vm12, 1.0, %v5045_v53  ;;  %v214_v12 = vsub.f32 %v4098_v22, %v2939_v48  ;;  %v4220_v22 = vld [vmem:[%s5036_s0] sm:$0xff]  ;;  %v3400_v56 = vld [vmem:[#allocation7 + $0x1e8] sm:$0xff]  }
  0xb2   :  { %v676_v55 = vmul.f32 %v675_v63, %v598_v25  ;;  %v673_v42 = vmul.f32 %v672_v21, %v598_v25  ;;  %v4205_v43 = vsel %vm201_vm13, 1.0, %v5045_v53  ;;  %3155 = vmatpush3.bf16.msra.mxu0 %v3399_v58  ;;  %v4210_v20 = vsub.f32 %v2939_v48, %v4202_v30  ;;  %v3397_v63 = vld [vmem:[#allocation7 + $0x1a0] sm:$0xff]  }
  0xb3   :  { %v682_v19 = vmul.f32 %v681_v18, %v4195_v45  ;;  %3171 = vmatpush3.bf16.msra.mxu1 %v3389_v28  ;;  %3156 = vmatprep.subr.bf16.mxu0 %v3402_v38  ;;  %v321_v6 = vmul.f32 %v4187_v59, %v4103_v32  ;;  %v327_v1 = vrot.slane %v3875_v34, %v3779_v31  ;;  %v3410_v48 = vld [vmem:[#allocation7 + $0x200] sm:$0xff]  }
  0xb4   :  { %v674_v41 = vadd.f32 %v673_v42, %v4125_v15  ;;  %3172 = vmatprep.subr.bf16.mxu1 %v3392_v51  ;;  %v4224_v8 = vsub.f32 %v4220_v22, %v4082_v11  ;;  %v4227_v15 = vsub.f32 %v193_v40, %v4220_v22  ;;  %v4231_v32 = vrot.slane %v3875_v34, %v3781_v33 }
  0xb5   :  { %v683_v58 = vadd.f32 %v682_v19, %v676_v55  ;;  %v322_v28 = vmul.f32 %v321_v6, %v4107_v52  ;;  %v328_v38 = vmul.f32 %v327_v1, %v4193_v10  ;;  %v429_v36 = vmul.f32 %v4123_v3, %v4022_v9  ;;  %v3401_v55 = vld [vmem:[#allocation7 + $0x1a8] sm:$0xff]  }
  0xb6   :  { %v716_v18 = vpack.c.bf16 %v674_v41, %v674_v41  ;;  %3157 = vmatpush3.bf16.msra.mxu0 %v3403_v26  ;;  %v332_v21 = vmul.f32 %v4224_v8, %v327_v1  ;;  %v339_v51 = vmul.f32 %v4231_v32, %v4227_v15  ;;  %v434_v34 = vrot.slane %v3884_v46, %v3787_v39 }
  0xb7   :  { %v717_v11 = vpack.c.bf16 %v683_v58, %v683_v58  ;;  %3173 = vmatpush3.bf16.msra.mxu1 %v3393_v60  ;;  %3158 = vmatprep.subr.bf16.mxu0 %v3406_v50  ;;  %v329_v16 = vmul.f32 %v328_v38, %v214_v12  ;;  %v430_v52 = vmul.f32 %v429_v36, %v4128_v62  ;;  %v3411_v38 = vld [vmem:[#allocation7 + $0x208] sm:$0xff]  }
  0xb8   :  { %v4245_v40 = vrot.slane %v3884_v46, %v3798_v44  ;;  %3174 = vmatprep.subr.bf16.mxu1 %v3396_v54  ;;  %v333_v3 = vmul.f32 %v332_v21, %v214_v12  ;;  %v340_v25 = vmul.f32 %v339_v51, %v4210_v20  ;;  %v435_v26 = vmul.f32 %v434_v34, %v4193_v10  ;;  %v3404_v46 = vld [vmem:[#allocation7 + $0x1f0] sm:$0xff]   ;;  %v3408_v21 = vld [vmem:[#allocation7 + $0x1f8] sm:$0xff]  }
  0xb9   :  { %1409 = vmatprep.mubr.bf16.mxu0 %v717_v11  ;;  %v330_v42 = vadd.f32 %v329_v16, %v322_v28  ;;  %v438_v60 = vmul.f32 %v434_v34, %v4187_v59  ;;  %v523_v62 = vmul.f32 %v4140_v14, %v4019_v24  ;;  %v528_v19 = vrot.slane %v3925_v23, %v3777_v29 }
  0xba   :  { %v444_v50 = vmul.f32 %v4245_v40, %v4227_v15  ;;  %3159 = vmatpush3.bf16.msra.mxu0 %v3407_v4  ;;  %v4254_v54 = vadd.f32 %v340_v25, %v333_v3  ;;  %v4260_v12 = vrot.slane %v3925_v23, %v3779_v31  ;;  %v608_v41 = vmul.f32 %v4155_v47, %v3898_v57  ;;  %v3405_v47 = vld [vmem:[#allocation7 + $0x1b0] sm:$0xff]  }
  0xbb   :  { %3175 = vmatpush3.bf16.msra.mxu1 %v3397_v63  ;;  %3294 = vmatprep.subr.bf16.mxu0 %v5045_v53  ;;  %v216_v14 = vsub.f32 %v4202_v30, %v4205_v43  ;;  %v436_v6 = vmul.f32 %v435_v26, %v330_v42  ;;  %v439_v1 = vmul.f32 %v438_v60, %v330_v42  ;;  %v3412_v60 = vld [vmem:[#allocation7 + $0x210] sm:$0xff]  }
  0xbc   :  { %3176 = vmatprep.subr.bf16.mxu1 %v3400_v56  ;;  %v445_v4 = vmul.f32 %v444_v50, %v4254_v54  ;;  %v529_v58 = vmul.f32 %v528_v19, %v4193_v10  ;;  %v532_v28 = vmul.f32 %v528_v19, %v4022_v9  ;;  %v538_v23 = vmul.f32 %v4260_v12, %v4227_v15  ;;  %v3498_v43 = vld [vmem:[#allocation5 + $0x28] sm:$0xff] }
  0xbd   :  { %1410 = vmatmul.mubr.bf16.vlgmr.msra.gmra.mrb[4].mxu0 %v716_v18  ;;  %v437_v63 = vadd.f32 %v436_v6, %v430_v52  ;;  %v524_v36 = vmul.f32 %v523_v62, %v4146_v13  ;;  %v613_v11 = vrot.slane %v3952_v7, %v3781_v33  ;;  %v4277_v56 = vrot.slane %v3952_v7, %v3783_v35 }
  0xbe   :  { %v4279_v51 = vadd.f32 %v445_v4, %v439_v1  ;;  %v609_v34 = vmul.f32 %v608_v41, %v4166_v2  ;;  %v689_v16 = vrot.slane %v4042_v61, %v3783_v35  ;;  %v4286_v18 = vrot.slane %v4042_v61, %v3785_v37  ;;  %3295 = vmatpush3.bf16.msra.mxu0 %v3410_v48  ;;  %v3409_v48 = vld [vmem:[#allocation7 + $0x1b8] sm:$0xff]  }
  0xbf   :  { %3177 = vmatpush3.bf16.msra.mxu1 %v3401_v55  ;;  %v530_v13 = vmul.f32 %v529_v58, %v437_v63  ;;  %v533_v52 = vmul.f32 %v532_v28, %v437_v63  ;;  %v614_v3 = vmul.f32 %v613_v11, %v4193_v10  ;;  %v617_v7 = vmul.f32 %v613_v11, %v4019_v24  ;;  %v3497_v28 = vld [vmem:[#allocation5 + $0x20] sm:$0xff] }
  0xc0   :  { %3178 = vmatprep.subr.bf16.mxu1 %v3404_v46  ;;  %v539_v25 = vmul.f32 %v538_v23, %v4279_v51  ;;  %v623_v2 = vmul.f32 %v4277_v56, %v4227_v15  ;;  %v693_v26 = vmul.f32 %v689_v16, %v3898_v57  ;;  %v684_v42 = vmul.f32 %v4162_v17, %v3894_v49  ;;  %v3495_v17 = vld [vmem:[#allocation5 + $0x8] sm:$0xff] }
  0xc1   :  { %v531_v55 = vadd.f32 %v530_v13, %v524_v36  ;;  %v699_v50 = vmul.f32 %v4286_v18, %v4227_v15  ;;  %v690_v62 = vmul.f32 %v689_v16, %v4193_v10  ;;  %3296 = vmatprep.subr.bf16.mxu0 %v5045_v53  ;;  %3310 = vmatprep.mubr.msk.bf16.mxu0 %vm3649_vm14, %v5045_v53 }
  0xc2   :  { %v540_v46 = vadd.f32 %v539_v25, %v533_v52  ;;  %3297 = vmatpush3.bf16.msra.mxu0 %v3411_v38  ;;  %v342_v57 = vsub.f32 %v4220_v22, %v4176_v5  ;;  %v345_v49 = vsub.f32 %v4183_v0, %v4220_v22  ;;  %v349_v19 = vrot.slane %v3495_v17, %v3783_v35  ;;  %v3496_v5 = vld [vmem:[#allocation5 + $0x18] sm:$0xff] }
  0xc3   :  { %3179 = vmatpush3.bf16.msra.mxu1 %v3405_v47  ;;  %v615_v15 = vmul.f32 %v614_v3, %v531_v55  ;;  %v618_v10 = vmul.f32 %v617_v7, %v531_v55  ;;  %3298 = vmatprep.subr.bf16.mxu0 %v5045_v53  ;;  %v447_v41 = vmul.f32 %v4245_v40, %v4224_v8  ;;  %v3413_v47 = vld [vmem:[#allocation7 + $0x218] sm:$0xff]  }
  0xc4   :  { %3180 = vmatprep.subr.bf16.mxu1 %v3408_v21  ;;  %v624_v6 = vmul.f32 %v623_v2, %v540_v46  ;;  %v343_v1 = vmul.f32 %v342_v57, %v4231_v32  ;;  %v350_v4 = vmul.f32 %v349_v19, %v345_v49  ;;  %v452_v58 = vrot.slane %v3496_v5, %v3775_v27  ;;  %v3417_v57 = vld [vmem:[#allocation7 + $0x238] sm:$0xff]   ;;  %v3428_v5 = vld [vmem:[#allocation10 + $0x10] sm:$0xff]  }
  0xc5   :  { %v616_v0 = vadd.f32 %v615_v15, %v609_v34  ;;  %v685_v22 = vmul.f32 %v684_v42, %v4195_v45  ;;  %v546_v23 = vrot.slane %v3497_v28, %v3781_v33  ;;  %v448_v21 = vmul.f32 %v447_v41, %v4254_v54  ;;  %v3419_v15 = vld [vmem:[#allocation10 + $0xc0] sm:$0xff]   ;;  %v3424_v41 = vld [vmem:[#allocation10 + $0x8] sm:$0xff]   ;;  %v3432_v28 = vld [vmem:[#allocation10 + $0x18] sm:$0xff]  }
  0xc6   :  { %v625_v38 = vadd.f32 %v624_v6, %v618_v10  ;;  %3299 = vmatpush3.bf16.msra.mxu0 %v3412_v60  ;;  %v344_v63 = vmul.f32 %v343_v1, %v4210_v20  ;;  %v351_v8 = vmul.f32 %v350_v4, %v216_v14  ;;  %v453_v32 = vmul.f32 %v452_v58, %v345_v49  ;;  %v3414_v20 = vld [vmem:[#allocation7 + $0x220] sm:$0xff]   ;;  %v3423_v10 = vld [vmem:[#allocation10 + $0xc8] sm:$0xff]  }
  0xc7   :  { %3181 = vmatpush3.bf16.msra.mxu1 %v3409_v48  ;;  %v694_v40 = vmul.f32 %v693_v26, %v616_v0  ;;  %v691_v36 = vmul.f32 %v690_v62, %v616_v0  ;;  %3300 = vmatprep.subr.bf16.mxu0 %v5045_v53  ;;  %v541_v34 = vmul.f32 %v4260_v12, %v4187_v59  ;;  %v3415_v59 = vld [vmem:[#allocation7 + $0x228] sm:$0xff]   ;;  %v3425_v6 = vld [vmem:[#allocation10 + $0x88] sm:$0xff]   ;;  %v3426_v1 = vld [vmem:[#allocation10 + $0x50] sm:$0xff]  }
  0xc8   :  { %v700_v11 = vmul.f32 %v699_v50, %v625_v38  ;;  %v352_v45 = vadd.f32 %v351_v8, %v344_v63  ;;  %v547_v30 = vmul.f32 %v546_v23, %v345_v49  ;;  %v631_v14 = vrot.slane %v3498_v43, %v3785_v37  ;;  %v3427_v4 = vld [vmem:[#allocation10 + $0xd0] sm:$0xff]   ;;  %v3430_v0 = vld [vmem:[#allocation10 + $0x58] sm:$0xff]   ;;  %v3436_v63 = vld [vmem:[#allocation10 + $0x20] sm:$0xff]  }
  0xc9   :  { %v692_v16 = vadd.f32 %v691_v36, %v685_v22  ;;  %v542_v2 = vmul.f32 %v541_v34, %v4279_v51  ;;  %v626_v54 = vmul.f32 %v4277_v56, %v4022_v9  ;;  %v707_v42 = vrot.slane %v4042_v61, %v3787_v39  ;;  %v3416_v51 = vld [vmem:[#allocation7 + $0x230] sm:$0xff]   ;;  %v3429_v58 = vld [vmem:[#allocation10 + $0x90] sm:$0xff]   ;;  %v3431_v22 = vld [vmem:[#allocation10 + $0xd8] sm:$0xff]  }
  0xca   :  { %v701_v13 = vadd.f32 %v700_v11, %v694_v40  ;;  %3301 = vmatpush3.bf16.msra.mxu0 %v3413_v47  ;;  %v454_v52 = vmul.f32 %v453_v32, %v352_v45  ;;  %v632_v26 = vmul.f32 %v631_v14, %v345_v49  ;;  %v702_v55 = vmul.f32 %v4286_v18, %v4019_v24  ;;  %v3420_v24 = vld [vmem:[#allocation10] sm:$0xff]   ;;  %v3433_v23 = vld [vmem:[#allocation10 + $0x98] sm:$0xff]   ;;  %v3438_v32 = vld [vmem:[#allocation10 + $0x68] sm:$0xff]  }
  0xcb   :  { %v718_v3 = vpack.c.bf16 %v692_v16, %v692_v16  ;;  %3302 = vmatprep.subr.bf16.mxu0 %v5045_v53  ;;  %v627_v48 = vmul.f32 %v626_v54, %v540_v46  ;;  %v708_v9 = vmul.f32 %v707_v42, %v345_v49  ;;  %v3418_v46 = vld [vmem:[#allocation10 + $0x40] sm:$0xff]   ;;  %v3422_v49 = vld [vmem:[#allocation10 + $0x48] sm:$0xff]   ;;  %v3442_v45 = vld [vmem:[#allocation10 + $0x70] sm:$0xff]  }
  0xcc   :  { %v719_v7 = vpack.c.bf16 %v701_v13, %v701_v13  ;;  %v455_v25 = vadd.f32 %v454_v52, %v448_v21  ;;  %v703_v62 = vmul.f32 %v702_v55, %v625_v38  ;;  %v3421_v18 = vld [vmem:[#allocation10 + $0x80] sm:$0xff]   ;;  %3197 = vmatprep.subr.bf16.mxu1 %v3418_v46  ;;  %v3439_v40 = vld [vmem:[#allocation10 + $0xe8] sm:$0xff]   ;;  %v3443_v21 = vld [vmem:[#allocation10 + $0xf0] sm:$0xff]  }
  0xcd   :  { %v3434_v38 = vld [vmem:[#allocation10 + $0x60] sm:$0xff]   ;;  %v3440_v36 = vld [vmem:[#allocation10 + $0x28] sm:$0xff]   ;;  %v3444_v34 = vld [vmem:[#allocation10 + $0x30] sm:$0xff]  }
  0xce   :  { %1449 = vmatprep.mubr.bf16.mxu1 %v719_v7  ;;  %3303 = vmatpush3.bf16.msra.mxu0 %v3414_v20  ;;  %v548_v12 = vmul.f32 %v547_v30, %v455_v25  ;;  %v3435_v47 = vld [vmem:[#allocation10 + $0xe0] sm:$0xff]   ;;  %v3441_v11 = vld [vmem:[#allocation10 + $0xa8] sm:$0xff]   ;;  %v3445_v16 = vld [vmem:[#allocation10 + $0xb0] sm:$0xff]  }
  0xcf   :  { %1450 = vmatmul.mubr.bf16.vlgmr.msra.gmra.mrb[4].mxu1 %v718_v3  ;;  %3304 = vmatprep.subr.bf16.mxu0 %v5045_v53  ;;  %v3437_v8 = vld [vmem:[#allocation10 + $0xa0] sm:$0xff]   ;;  %v3446_v13 = vld [vmem:[#allocation10 + $0x78] sm:$0xff]  }
  0xd0   :  { %v549_v60 = vadd.f32 %v548_v12, %v542_v2  ;;  %3198 = vmatpush3.bf16.msra.mxu1 %v3420_v24  ;;  %v3447_v20 = vld [vmem:[#allocation10 + $0xf8] sm:$0xff]   ;;  %v3450_v43 = vld [vmem:[#allocation10 + $0x140] sm:$0xff]  }
  0xd1   :  { %3199 = vmatprep.subr.bf16.mxu1 %v3422_v49  ;;  %v3448_v52 = vld [vmem:[#allocation10 + $0x38] sm:$0xff]   ;;  %v3451_v14 = vld [vmem:[#allocation10 + $0x1c0] sm:$0xff]  }
  0xd2   :  { %3305 = vmatpush3.bf16.msra.mxu0 %v3415_v59  ;;  %v633_v50 = vmul.f32 %v632_v26, %v549_v60  ;;  %v3449_v30 = vld [vmem:[#allocation10 + $0xb8] sm:$0xff]  }
  0xd3   :  { %3306 = vmatprep.subr.bf16.mxu0 %v5045_v53 }
  0xd4   :  { %v634_v56 = vadd.f32 %v633_v50, %v627_v48  ;;  %3200 = vmatpush3.bf16.msra.mxu1 %v3424_v41  ;;  %v4356_v41 = vld [vmem:[%s5041_s5 + $0x10] sm:$0xff] }
  0xd5   :  { %3201 = vmatprep.subr.bf16.mxu1 %v3426_v1 }
  0xd6   :  { %3307 = vmatpush3.bf16.msra.mxu0 %v3416_v51  ;;  %v709_v17 = vmul.f32 %v708_v9, %v634_v56 }
  0xd7   :  { %3308 = vmatprep.subr.bf16.mxu0 %v5045_v53 }
  0xd8   :  { %v710_v61 = vadd.f32 %v709_v17, %v703_v62  ;;  %3202 = vmatpush3.bf16.msra.mxu1 %v3428_v5 }
  0xd9   :  { %3203 = vmatprep.subr.bf16.mxu1 %v3430_v0 }
  0xda   :  { %3309 = vmatpush3.bf16.msra.mxu0 %v3417_v57  ;;  %v720_v19 = vpack.c.bf16 %v710_v61, %v710_v61  ;;  %v1497_v57 = vld [vmem:[#allocation8] sm:$0xff]  ;;  %v4337_v61 = vld [vmem:[%s5041_s5] sm:$0xff] }
  0xdb   :  { %3219 = vmatprep.subr.bf16.mxu0 %v3419_v15  ;;  %v4340_v46 = vrot.slane %v1497_v57, %v3775_v27  ;;  %v4343_v15 = vrot.slane %v1497_v57, %v3777_v29  ;;  %v4346_v24 = vrot.slane %v1497_v57, %v3779_v31  ;;  %v4362_v1 = vrot.slane %v1497_v57, %v3783_v35 }
  0xdc   :  { %3204 = vmatpush3.bf16.msra.mxu1 %v3432_v28  ;;  %v4373_v0 = vrot.slane %v1497_v57, %v3787_v39  ;;  %v4379_v28 = vrot.slane %v4337_v61, %v3777_v29 }
  0xdd   :  { %3311 = vmatmul.mubr.bf16.vlgmr.msra.gmra.mrb[8].mxu0 %v720_v19  ;;  %3205 = vmatprep.subr.bf16.mxu1 %v3434_v38 }
  0xde   :  { %3220 = vmatpush3.bf16.msra.mxu0 %v3421_v18 }
  0xdf   :  { %3221 = vmatprep.subr.bf16.mxu0 %v3423_v10  ;;  %v4351_v10 = vld [vmem:[%s5041_s5 + $0x8] sm:$0xff] }
  0xe0   :  { %3206 = vmatpush3.bf16.msra.mxu1 %v3436_v63  ;;  %v4392_v63 = vrot.slane %v4337_v61, %v3781_v33 }
  0xe1   :  { %3207 = vmatprep.subr.bf16.mxu1 %v3438_v32  ;;  %v4400_v32 = vrot.slane %v4337_v61, %v3785_v37 }
  0xe2   :  { %3222 = vmatpush3.bf16.msra.mxu0 %v3425_v6  ;;  %v4359_v6 = vrot.slane %v1497_v57, %v3781_v33 }
  0xe3   :  { %3223 = vmatprep.subr.bf16.mxu0 %v3427_v4  ;;  %v4365_v4 = vrot.slane %v1497_v57, %v3785_v37 }
  0xe4   :  { %3208 = vmatpush3.bf16.msra.mxu1 %v3440_v36 }
  0xe5   :  { %3209 = vmatprep.subr.bf16.mxu1 %v3442_v45  ;;  %v4415_v45 = vrot.slane %v4351_v10, %v3798_v44 }
  0xe6   :  { %3224 = vmatpush3.bf16.msra.mxu0 %v3429_v58  ;;  %v4370_v58 = vld [vmem:[%s5041_s5 + $0x18] sm:$0xff] }
  0xe7   :  { %3225 = vmatprep.subr.bf16.mxu0 %v3431_v22 }
  0xe8   :  { %3210 = vmatpush3.bf16.msra.mxu1 %v3444_v34  ;;  %v1498_v34 = vld [vmem:[#allocation8 + $0x8] sm:$0x3f] }
  0xe9   :  { %3211 = vmatprep.subr.bf16.mxu1 %v3446_v13 }
  0xea   :  { %3226 = vmatpush3.bf16.msra.mxu0 %v3433_v23  ;;  %v4383_v23 = vrot.slane %v4337_v61, %v3779_v31 }
  0xeb   :  { %3227 = vmatprep.subr.bf16.mxu0 %v3435_v47  ;;  %v4388_v47 = vld [vmem:[%s5041_s5 + $0x20] sm:$0xff] }
  0xec   :  { %3212 = vmatpush3.bf16.msra.mxu1 %v3448_v52  ;;  %v4433_v52 = vrot.slane %v4370_v58, %v3781_v33 }
  0xed   :  { %3241 = vmatprep.subr.bf16.mxu1 %v3450_v43 }
  0xee   :  { %3228 = vmatpush3.bf16.msra.mxu0 %v3437_v8  ;;  %v4396_v8 = vrot.slane %v4337_v61, %v3783_v35 }
  0xef   :  { %3229 = vmatprep.subr.bf16.mxu0 %v3439_v40  ;;  %v4405_v40 = vld [vmem:[%s5041_s5 + $0x28] sm:$0xff] }
  0xf0   :  { %v4538_v43 = vrot.slane %v4405_v40, %v3777_v29  ;;  %v4542_v13 = vrot.slane %v4405_v40, %v3779_v31 }
  0xf2   :  { %3230 = vmatpush3.bf16.msra.mxu0 %v3441_v11  ;;  %v4411_v11 = vrot.slane %v4351_v10, %v3787_v39  ;;  %5105 = vst [vmem:[#allocation37_spill] sm:$0xff] %v4538_v43  ;;  %5106 = vst [vmem:[#allocation38_spill] sm:$0xff] %v4542_v13  ;;  %v4561_v13 = vrot.slane %v1498_v34, %v3785_v37 }
  0xf3   :  { %3231 = vmatprep.subr.bf16.mxu0 %v3443_v21  ;;  %v4419_v21 = vrot.slane %v4356_v41, %v3775_v27 }
  0xf4   :  { %5111 = vst [vmem:[#allocation43_spill] sm:$0xff] %v4561_v13 }
  0xf6   :  { %3232 = vmatpush3.bf16.msra.mxu0 %v3445_v16  ;;  %v4423_v16 = vrot.slane %v4356_v41, %v3777_v29 }
  0xf7   :  { %3233 = vmatprep.subr.bf16.mxu0 %v3447_v20  ;;  %v4429_v20 = vrot.slane %v4370_v58, %v3779_v31 }
  0xfa   :  { %3234 = vmatpush3.bf16.msra.mxu0 %v3449_v30  ;;  %v4437_v30 = vrot.slane %v4370_v58, %v3783_v35 }
  0xfb   :  { %3263 = vmatprep.subr.bf16.mxu0 %v3451_v14  ;;  %v4443_v14 = vrot.slane %v4388_v47, %v3785_v37 }
 0x170   :  { %v3116_v3 = vpop.f32.mrb[0].mxu0 }
 0x171   :  { %v3117_v7 = vpop.f32.mrb[1].mxu0 }
 0x172   :  { %v3118_v25 = vadd.f32 %v3117_v7, %v3116_v3  ;;  %v3119_v2 = vpop.f32.mrb[2].mxu0  ;;  %v4447_v3 = vrot.slane %v4388_v47, %v3787_v39  ;;  %v4534_v7 = vrot.slane %v4388_v47, %v3775_v27 }
 0x173   :  { %v3120_v54 = vpop.f32.mrb[3].mxu0  ;;  %v4458_v2 = vld [vmem:[%s5041_s5 + $0x30] sm:$0x7f]  ;;  %s3650_s5 = smov [#allocation11]  }
 0x174   :  { %5086 = vst [vmem:[#allocation18_spill] sm:$0xff] %v4458_v2  ;;  %v4461_v54 = vrot.slane %v1497_v57, %v3798_v44  ;;  %v4510_v57 = vrot.slane %v1498_v34, %v3779_v31  ;;  %5104 = vst [vmem:[#allocation36_spill] sm:$0xff] %v4534_v7  ;;  %v4546_v22 = vrot.slane %v4458_v2, %v3779_v31  ;;  %s2917_s28 = sshll.u32 %s3650_s5, 4  ;;  %s2918_s28 = int_to_ptr.vmem [resolvable:$true] %s2917_s28 }
 0x175   :  { %v4550_v53 = vrot.slane %v4458_v2, %v3781_v33  ;;  %v4556_v7 = vrot.slane %v1498_v34, %v3783_v35  ;;  %s3609_s29 = scalar_lea.vmem %s2918_s28, 128  ;;  %p3614_p13 = scmp.lt.s32.totalorder %s2918_s28, %s2918_s28 }
 0x176   :  { %5098 = vst [vmem:[#allocation30_spill] sm:$0xff] %v4510_v57  ;;  %5107 = vst [vmem:[#allocation39_spill] sm:$0xff] %v4546_v22  ;;  %v4569_v22 = vrot.slane %v4351_v10, %v3781_v33  ;;  %p3610_p12 = scmp.ne.s32.totalorder %s2918_s28, %s3609_s29  ;;  %p3615_p0 = scmp.lt.s32.totalorder %s3609_s29, %s3609_s29 }
 0x177   :  { %5108 = vst [vmem:[#allocation40_spill] sm:$0xff] %v4550_v53  ;;  %5110 = vst [vmem:[#allocation42_spill] sm:$0xff] %v4556_v7 }
 0x178   :  { %5113 = vst [vmem:[#allocation45_spill] sm:$0xff] %v4569_v22  ;;  %p3616_p1 = por %p3615_p0, %p3614_p13 }
 0x17a   :  { %p3617_p2 = pnand %p3616_p1, %p3610_p12 }
 0x17d   :  { %v3138_v59 = vpop.f32.mrb[0].mxu1 }
 0x17e   :  { %v3139_v12 = vpop.f32.mrb[1].mxu1 }
 0x17f   :  { %v3140_v26 = vadd.f32 %v3139_v12, %v3138_v59  ;;  %v3141_v42 = vpop.f32.mrb[2].mxu1  ;;  %v4464_v59 = vrot.slane %v1498_v34, %v3775_v27  ;;  %v4468_v12 = vrot.slane %v4337_v61, %v3787_v39 }
 0x180   :  { %v3142_v60 = vpop.f32.mrb[3].mxu1  ;;  %v4476_v42 = vrot.slane %v4356_v41, %v3779_v31 }
 0x181   :  { %v1372_v48 = vadd.f32 %v3140_v26, %v3118_v25  ;;  %v4453_v25 = vrot.slane %v4405_v40, %v3798_v44  ;;  %5087 = vst [vmem:[#allocation19_spill] sm:$0xff] %v4468_v12  ;;  %v4472_v26 = vrot.slane %v4337_v61, %v3798_v44  ;;  %v4480_v60 = vrot.slane %v4356_v41, %v3781_v33 }
 0x182   :  { %5089 = vst [vmem:[#allocation21_spill] sm:$0xff] %v4476_v42 }
 0x183   :  { %5088 = vst [vmem:[#allocation20_spill] sm:$0xff] %v4472_v26  ;;  %5090 = vst [vmem:[#allocation22_spill] sm:$0xff] %v4480_v60 }
 0x190   :  { %v3160_v55 = vpop.f32.mrb[4].mxu0 }
 0x191   :  { %v3161_v51 = vpop.f32.mrb[5].mxu0 }
 0x192   :  { %v3162_v50 = vadd.f32 %v3161_v51, %v3160_v55  ;;  %v3163_v9 = vpop.f32.mrb[6].mxu0  ;;  %v4488_v55 = vrot.slane %v4370_v58, %v3787_v39  ;;  %v4492_v51 = vrot.slane %v4388_v47, %v3798_v44 }
 0x193   :  { %v3164_v56 = vpop.f32.mrb[7].mxu0  ;;  %v4500_v9 = vrot.slane %v4458_v2, %v3775_v27 }
 0x194   :  { %v1412_v62 = vadd.f32 %v3162_v50, %v1372_v48  ;;  %v4484_v48 = vrot.slane %v4370_v58, %v3785_v37  ;;  %5092 = vst [vmem:[#allocation24_spill] sm:$0xff] %v4488_v55  ;;  %5093 = vst [vmem:[#allocation25_spill] sm:$0xff] %v4492_v51  ;;  %v4496_v50 = vrot.slane %v4405_v40, %v3775_v27 }
 0x195   :  { %5095 = vst [vmem:[#allocation27_spill] sm:$0xff] %v4500_v9  ;;  %v4504_v56 = vrot.slane %v4458_v2, %v3777_v29 }
 0x196   :  { %5091 = vst [vmem:[#allocation23_spill] sm:$0xff] %v4484_v48  ;;  %5094 = vst [vmem:[#allocation26_spill] sm:$0xff] %v4496_v50 }
 0x197   :  { %5096 = vst [vmem:[#allocation28_spill] sm:$0xff] %v4504_v56 }
 0x1a2   :  { %v3182_v17 = vpop.f32.mrb[4].mxu1 }
 0x1a3   :  { %v3183_v19 = vpop.f32.mrb[5].mxu1 }
 0x1a4   :  { %v3184_v18 = vadd.f32 %v3183_v19, %v3182_v17  ;;  %v3185_v49 = vpop.f32.mrb[6].mxu1  ;;  %v4514_v17 = vrot.slane %v4351_v10, %v3775_v27  ;;  %v4518_v19 = vrot.slane %v4351_v10, %v3777_v29 }
 0x1a5   :  { %v3186_v5 = vpop.f32.mrb[7].mxu1  ;;  %v4526_v49 = vrot.slane %v4356_v41, %v3785_v37 }
 0x1a6   :  { %v1452_v38 = vadd.f32 %v3184_v18, %v1412_v62  ;;  %v4507_v62 = vrot.slane %v1498_v34, %v3777_v29  ;;  %5099 = vst [vmem:[#allocation31_spill] sm:$0xff] %v4514_v17  ;;  %5100 = vst [vmem:[#allocation32_spill] sm:$0xff] %v4518_v19  ;;  %v4522_v18 = vrot.slane %v4356_v41, %v3783_v35 }
 0x1a7   :  { %5102 = vst [vmem:[#allocation34_spill] sm:$0xff] %v4526_v49  ;;  %v4530_v5 = vrot.slane %v4370_v58, %v3798_v44 }
 0x1a8   :  { %5097 = vst [vmem:[#allocation29_spill] sm:$0xff] %v4507_v62  ;;  %5101 = vst [vmem:[#allocation33_spill] sm:$0xff] %v4522_v18  ;;  %v4565_v18 = vrot.slane %v4351_v10, %v3779_v31 }
 0x1a9   :  { %5103 = vst [vmem:[#allocation35_spill] sm:$0xff] %v4530_v5  ;;  %v4553_v5 = vrot.slane %v1498_v34, %v3781_v33  ;;  %v4585_v34 = vrot.slane %v4388_v47, %v3779_v31 }
 0x1aa   :  { %5112 = vst [vmem:[#allocation44_spill] sm:$0xff] %v4565_v18 }
 0x1ab   :  { %5109 = vst [vmem:[#allocation41_spill] sm:$0xff] %v4553_v5  ;;  %v4573_v5 = vrot.slane %v4356_v41, %v3787_v39  ;;  %5117 = vst [vmem:[#allocation49_spill] sm:$0xff] %v4585_v34 }
 0x1ad   :  { %5114 = vst [vmem:[#allocation46_spill] sm:$0xff] %v4573_v5 }
 0x1b0   :  { %v1491_v36 = vpop.f32.mrb[8].mxu0 }
 0x1b1   :  { %v4558_v43 = vadd.f32 %v1491_v36, %v1452_v38  ;;  %v3312_v49 = vpop.f32.mrb[9].mxu0  ;;  %v4577_v38 = vrot.slane %v4356_v41, %v3798_v44  ;;  %v4581_v36 = vrot.slane %v4388_v47, %v3777_v29  ;;  %v5118_v44 = vmov 0.0  }
 0x1b2   :  { %v1494_v53 = vpop.f32.mrb[10].mxu0 }
 0x1b3   :  { %5115 = vst [vmem:[#allocation47_spill] sm:$0xff] %v4577_v38  ;;  %5116 = vst [vmem:[#allocation48_spill] sm:$0xff] %v4581_v36  ;;  %v3313_v49 = vpop.f32.mrb[11].mxu0  ;;  %vm1510_vm15 = vcmp.ge.f32.partialorder %v4558_v43, %v4340_v46  ;;  %vm1517_vm0 = vcmp.ge.f32.partialorder %v4558_v43, %v4343_v15  ;;  %vm1524_vm1 = vcmp.ge.f32.partialorder %v4558_v43, %v4346_v24 }
 0x1b4   :  { %vm1531_vm2 = vcmp.ge.f32.partialorder %v4558_v43, %v4359_v6  ;;  %v3014_v53 = vsel %vm1510_vm15, 1.0, %v5118_v44  ;;  %v3015_v41 = vsel %vm1517_vm0, 1.0, %v5118_v44  ;;  %v3016_v31 = vsel %vm1524_vm1, 1.0, %v5118_v44 }
 0x1b5   :  { %v3017_v49 = vsel %vm1531_vm2, 1.0, %v5118_v44  ;;  %vm1538_vm3 = vcmp.ge.f32.partialorder %v4558_v43, %v4362_v1  ;;  %vm1545_vm4 = vcmp.ge.f32.partialorder %v4558_v43, %v4365_v4  ;;  %vm1552_vm5 = vcmp.ge.f32.partialorder %v4558_v43, %v4373_v0 }
 0x1b6   :  { %v1604_v34 = vsub.f32 %v3014_v53, %v3015_v41  ;;  %v3018_v36 = vsel %vm1538_vm3, 1.0, %v5118_v44  ;;  %v3019_v38 = vsel %vm1545_vm4, 1.0, %v5118_v44  ;;  %v4608_v5 = vsel %vm1552_vm5, 1.0, %v5118_v44 }
 0x1b7   :  { %v1605_v22 = vsub.f32 %v3015_v41, %v3016_v31  ;;  %v1606_v18 = vsub.f32 %v3016_v31, %v3017_v49  ;;  %v1607_v13 = vsub.f32 %v3017_v49, %v3018_v36  ;;  %v1608_v7 = vsub.f32 %v3018_v36, %v3019_v38 }
 0x1b8   :  { %v4611_v2 = vsub.f32 %v3019_v38, %v4608_v5  ;;  %v4615_v19 = vsub.f32 %v4558_v43, %v4340_v46  ;;  %v1624_v53 = vsub.f32 %v4346_v24, %v4558_v43  ;;  %v4621_v17 = vsub.f32 %v4558_v43, %v4343_v15 }
 0x1b9   :  { %v1635_v41 = vsub.f32 %v4359_v6, %v4558_v43  ;;  %v4627_v36 = vsub.f32 %v4558_v43, %v4346_v24  ;;  %v1646_v38 = vsub.f32 %v4362_v1, %v4558_v43  ;;  %v4633_v46 = vsub.f32 %v4558_v43, %v4359_v6 }
 0x1ba   :  { %v4637_v31 = vsub.f32 %v4365_v4, %v4558_v43  ;;  %v5119_v15 = vrot.slane %v4337_v61, %v3775_v27  ;;  %v1629_v57 = vmul.f32 %v4379_v28, %v1624_v53  ;;  %v1633_v24 = vmul.f32 %v4621_v17, %v4379_v28 }
 0x1bb   :  { %v1640_v62 = vmul.f32 %v4383_v23, %v1635_v41  ;;  %v1644_v6 = vmul.f32 %v4627_v36, %v4383_v23  ;;  %v1651_v56 = vmul.f32 %v4392_v63, %v1646_v38  ;;  %v1655_v9 = vmul.f32 %v4633_v46, %v4392_v63 }
 0x1bc   :  { %v1622_v49 = vmul.f32 %v5119_v15, %v4615_v19  ;;  %v1662_v50 = vmul.f32 %v4396_v8, %v4637_v31  ;;  %v1630_v15 = vmul.f32 %v1629_v57, %v1605_v22  ;;  %v1634_v27 = vmul.f32 %v1633_v24, %v1605_v22 }
 0x1bd   :  { %v1641_v53 = vmul.f32 %v1640_v62, %v1606_v18  ;;  %v1645_v51 = vmul.f32 %v1644_v6, %v1606_v18  ;;  %v1652_v55 = vmul.f32 %v1651_v56, %v1607_v13  ;;  %v1656_v28 = vmul.f32 %v1655_v9, %v1607_v13 }
 0x1be   :  { %v1623_v61 = vmul.f32 %v1622_v49, %v1604_v34  ;;  %v1663_v48 = vmul.f32 %v1662_v50, %v1608_v7  ;;  %v4656_v23 = vsub.f32 %v4558_v43, %v4362_v1  ;;  %v4660_v63 = vsub.f32 %v4373_v0, %v4558_v43 }
 0x1bf   :  { %v1642_v42 = vadd.f32 %v1641_v53, %v1634_v27  ;;  %v1653_v26 = vadd.f32 %v1652_v55, %v1645_v51  ;;  %v4664_v22 = vsub.f32 %v4558_v43, %v4365_v4  ;;  %v4668_v13 = vrot.slane %v4405_v40, %v3781_v33 }
 0x1c0   :  { %v1631_v60 = vadd.f32 %v1630_v15, %v1623_v61  ;;  %v1664_v12 = vadd.f32 %v1663_v48, %v1656_v28  ;;  %v1666_v27 = vmul.f32 %v4656_v23, %v4396_v8  ;;  %v1673_v1 = vmul.f32 %v4400_v32, %v4660_v63 }
 0x1c1   :  { %v5120_v50 = vrot.slane %v4351_v10, %v3785_v37  ;;  %v1763_v48 = vmul.f32 %v4411_v11, %v1635_v41  ;;  %v1766_v4 = vmul.f32 %v4411_v11, %v4621_v17  ;;  %v1772_v51 = vmul.f32 %v4415_v45, %v1646_v38 }
 0x1c2   :  { %v1775_v9 = vmul.f32 %v4415_v45, %v4627_v36  ;;  %v1781_v8 = vmul.f32 %v4419_v21, %v4637_v31  ;;  %v1667_v56 = vmul.f32 %v1666_v27, %v1608_v7  ;;  %v1674_v62 = vmul.f32 %v1673_v1, %v4611_v2 }
 0x1c3   :  { %v1757_v55 = vmul.f32 %v5120_v50, %v4615_v19  ;;  %v1764_v18 = vmul.f32 %v1763_v48, %v1642_v42  ;;  %v1767_v34 = vmul.f32 %v1766_v4, %v1642_v42  ;;  %v1773_v49 = vmul.f32 %v1772_v51, %v1653_v26 }
 0x1c4   :  { %v1776_v24 = vmul.f32 %v1775_v9, %v1653_v26  ;;  %v1782_v41 = vmul.f32 %v1781_v8, %v1664_v12  ;;  %v1675_v6 = vadd.f32 %v1674_v62, %v1667_v56  ;;  %v1784_v11 = vmul.f32 %v4419_v21, %v4633_v46 }
 0x1c5   :  { %v1758_v57 = vmul.f32 %v1757_v55, %v1631_v60  ;;  %v1790_v45 = vmul.f32 %v4423_v16, %v4660_v63  ;;  %v1774_v15 = vadd.f32 %v1773_v49, %v1767_v34  ;;  %v5121_v7 = vrot.slane %v4370_v58, %v3777_v29 }
 0x1c6   :  { %v1783_v53 = vadd.f32 %v1782_v41, %v1776_v24  ;;  %v1866_v42 = vmul.f32 %v4429_v20, %v1646_v38  ;;  %v1785_v28 = vmul.f32 %v1784_v11, %v1664_v12  ;;  %v1869_v27 = vmul.f32 %v4429_v20, %v4621_v17 }
 0x1c7   :  { %v1765_v61 = vadd.f32 %v1764_v18, %v1758_v57  ;;  %v1860_v60 = vmul.f32 %v5121_v7, %v4615_v19  ;;  %v1791_v26 = vmul.f32 %v1790_v45, %v1675_v6  ;;  %v1875_v21 = vmul.f32 %v4433_v52, %v4637_v31 }
 0x1c8   :  { %v4702_v1 = vsub.f32 %v4558_v43, %v4373_v0  ;;  %v1867_v55 = vmul.f32 %v1866_v42, %v1774_v15  ;;  %v1878_v29 = vmul.f32 %v4433_v52, %v4627_v36  ;;  %v1870_v4 = vmul.f32 %v1869_v27, %v1774_v15 }
 0x1c9   :  { %v1861_v50 = vmul.f32 %v1860_v60, %v1765_v61  ;;  %v1792_v48 = vadd.f32 %v1791_v26, %v1785_v28  ;;  %v1876_v38 = vmul.f32 %v1875_v21, %v1783_v53  ;;  %v1884_v12 = vmul.f32 %v4437_v30, %v4660_v63  ;;  %v5124_v60 = vld [vmem:[#allocation19_spill] sm:$0xff] }
 0x1ca   :  { %v1879_v20 = vmul.f32 %v1878_v29, %v1783_v53  ;;  %v5122_v9 = vrot.slane %v4388_v47, %v3783_v35  ;;  %v1960_v0 = vmul.f32 %v4443_v14, %v4637_v31  ;;  %v1963_v52 = vmul.f32 %v4443_v14, %v4621_v17 }
 0x1cb   :  { %v1868_v51 = vadd.f32 %v1867_v55, %v1861_v50  ;;  %v1877_v56 = vadd.f32 %v1876_v38, %v1870_v4  ;;  %v1885_v62 = vmul.f32 %v1884_v12, %v1792_v48  ;;  %v1969_v57 = vmul.f32 %v4447_v3, %v4660_v63  ;;  %v5125_v4 = vld [vmem:[#allocation20_spill] sm:$0xff] }
 0x1cc   :  { %v1954_v8 = vmul.f32 %v5122_v9, %v4615_v19  ;;  %v5123_v34 = vrot.slane %v4405_v40, %v3787_v39  ;;  %vm1559_vm6 = vcmp.ge.f32.partialorder %v4558_v43, %v4461_v54  ;;  %vm1566_vm7 = vcmp.ge.f32.partialorder %v4558_v43, %v4464_v59 }
 0x1cd   :  { %v1886_v31 = vadd.f32 %v1885_v62, %v1879_v20  ;;  %v1961_v24 = vmul.f32 %v1960_v0, %v1877_v56  ;;  %v1964_v41 = vmul.f32 %v1963_v52, %v1877_v56  ;;  %v3021_v14 = vsel %vm1559_vm6, 1.0, %v5118_v44  ;;  %v5127_v56 = vld [vmem:[#allocation22_spill] sm:$0xff]  ;;  %v5128_v62 = vld [vmem:[#allocation23_spill] sm:$0xff] }
 0x1ce   :  { %v1955_v18 = vmul.f32 %v1954_v8, %v1868_v51  ;;  %v2039_v49 = vmul.f32 %v5123_v34, %v4615_v19  ;;  %v3022_v61 = vsel %vm1566_vm7, 1.0, %v5118_v44  ;;  %v1610_v11 = vsub.f32 %v4608_v5, %v3021_v14 }
 0x1cf   :  { %v1677_v45 = vmul.f32 %v4664_v22, %v4400_v32  ;;  %v1679_v19 = vsub.f32 %v4461_v54, %v4558_v43  ;;  %v1970_v53 = vmul.f32 %v1969_v57, %v1886_v31  ;;  %v2045_v7 = vmul.f32 %v4453_v25, %v4660_v63 }
 0x1d0   :  { %v1962_v15 = vadd.f32 %v1961_v24, %v1955_v18  ;;  %v1688_v42 = vmul.f32 %v4702_v1, %v5124_v60  ;;  %v4737_v28 = vsub.f32 %v3021_v14, %v3022_v61  ;;  %v1690_v32 = vsub.f32 %v4464_v59, %v4558_v43  ;;  %v5129_v14 = vld [vmem:[#allocation24_spill] sm:$0xff] }
 0x1d1   :  { %v1678_v26 = vmul.f32 %v1677_v45, %v4611_v2  ;;  %v1684_v5 = vmul.f32 %v5124_v60, %v1679_v19  ;;  %v4743_v27 = vadd.f32 %v1970_v53, %v1964_v41  ;;  %v4747_v50 = vsub.f32 %v4558_v43, %v4464_v59  ;;  %v5126_v2 = vld [vmem:[#allocation21_spill] sm:$0xff] }
 0x1d2   :  { %v2040_v21 = vmul.f32 %v2039_v49, %v1962_v15  ;;  %v1793_v63 = vmul.f32 %v4423_v16, %v4656_v23  ;;  %v1689_v29 = vmul.f32 %v1688_v42, %v1610_v11  ;;  %v1695_v38 = vmul.f32 %v5125_v4, %v1690_v32  ;;  %v5130_v15 = vld [vmem:[#allocation25_spill] sm:$0xff]  ;;  %v5131_v42 = vld [vmem:[#allocation26_spill] sm:$0xff] }
 0x1d3   :  { %v1685_v55 = vmul.f32 %v1684_v5, %v1610_v11  ;;  %v1799_v12 = vmul.f32 %v5126_v2, %v1679_v19  ;;  %v2046_v51 = vmul.f32 %v2045_v7, %v4743_v27  ;;  %v1802_v9 = vmul.f32 %v5126_v2, %v4664_v22  ;;  %v5132_v5 = vld [vmem:[#allocation27_spill] sm:$0xff]  ;;  %v3454_v2 = vld [vmem:[#allocation10 + $0x148] sm:$0xff]  }
 0x1d4   :  { %v1794_v20 = vmul.f32 %v1793_v63, %v1675_v6  ;;  %v1887_v8 = vmul.f32 %v4437_v30, %v4633_v46  ;;  %v1696_v0 = vmul.f32 %v1695_v38, %v4737_v28  ;;  %v1808_v16 = vmul.f32 %v5127_v56, %v1690_v32  ;;  %v5133_v63 = vld [vmem:[#allocation28_spill] sm:$0xff]  ;;  %v5134_v38 = vld [vmem:[#allocation29_spill] sm:$0xff] }
 0x1d5   :  { %v1686_v59 = vadd.f32 %v1685_v55, %v1678_v26  ;;  %v1893_v52 = vmul.f32 %v5128_v62, %v1679_v19  ;;  %v2047_v57 = vadd.f32 %v2046_v51, %v2040_v21  ;;  %v1896_v34 = vmul.f32 %v5128_v62, %v4656_v23 }
 0x1d6   :  { %v1888_v18 = vmul.f32 %v1887_v8, %v1792_v48  ;;  %v1972_v6 = vmul.f32 %v4447_v3, %v4627_v36  ;;  %v1697_v49 = vadd.f32 %v1696_v0, %v1689_v29  ;;  %v1902_v30 = vmul.f32 %v5129_v14, %v1690_v32  ;;  %v3452_v3 = vld [vmem:[#allocation10 + $0x100] sm:$0xff]  }
 0x1d7   :  { %v1800_v24 = vmul.f32 %v1799_v12, %v1686_v59  ;;  %v1803_v41 = vmul.f32 %v1802_v9, %v1686_v59  ;;  %v2112_v11 = vpack.c.bf16 %v2047_v57, %v2047_v57  ;;  %v1978_v53 = vmul.f32 %v5130_v15, %v1679_v19 }
 0x1d8   :  { %v1973_v45 = vmul.f32 %v1972_v6, %v1886_v31  ;;  %v1981_v7 = vmul.f32 %v5130_v15, %v4633_v46  ;;  %v1809_v48 = vmul.f32 %v1808_v16, %v1697_v49  ;;  %v1987_v26 = vmul.f32 %v5131_v42, %v1690_v32 }
 0x1d9   :  { %v1801_v60 = vadd.f32 %v1800_v24, %v1794_v20  ;;  %v2057_v21 = vmul.f32 %v5132_v5, %v4627_v36  ;;  %2728 = vmatprep.mubr.bf16.mxu1 %v2112_v11  ;;  %v2063_v55 = vmul.f32 %v5133_v63, %v1690_v32  ;;  %v2111_v29 = vpack.c.bf16 %v4558_v43, %v4558_v43  ;;  %v5135_v32 = vld [vmem:[#allocation30_spill] sm:$0xff] }
 0x1da   :  { %v2048_v31 = vmul.f32 %v4453_v25, %v4621_v17  ;;  %vm1573_vm8 = vcmp.ge.f32.partialorder %v4558_v43, %v5134_v38  ;;  %v4779_v12 = vadd.f32 %v1809_v48, %v1803_v41  ;;  %v2054_v9 = vmul.f32 %v5132_v5, %v1679_v19  ;;  %v3456_v19 = vld [vmem:[#allocation10 + $0x108] sm:$0xff]  }
 0x1db   :  { %v1894_v51 = vmul.f32 %v1893_v52, %v1801_v60  ;;  %v1897_v20 = vmul.f32 %v1896_v34, %v1801_v60  ;;  %v3023_v36 = vsel %vm1573_vm8, 1.0, %v5118_v44  ;;  %2729 = vmatmul.mubr.bf16.vlgmr.msra.gmra.mrb[8].mxu1 %v2111_v29  ;;  %vm1580_vm9 = vcmp.ge.f32.partialorder %v4558_v43, %v5135_v32 }
 0x1dc   :  { %v1612_v8 = vsub.f32 %v3022_v61, %v3023_v36  ;;  %v4787_v25 = vsub.f32 %v4558_v43, %v4461_v54  ;;  %v1903_v59 = vmul.f32 %v1902_v30, %v4779_v12  ;;  %3242 = vmatpush3.bf16.msra.mxu1 %v3452_v3  ;;  %v4791_v0 = vsel %vm1580_vm9, 1.0, %v5118_v44  ;;  %v5136_v54 = vld [vmem:[#allocation31_spill] sm:$0xff] }
 0x1dd   :  { %v1895_v17 = vadd.f32 %v1894_v51, %v1888_v18  ;;  %v4795_v16 = vsub.f32 %v5134_v38, %v4558_v43  ;;  %v4798_v62 = vsub.f32 %v3023_v36, %v4791_v0  ;;  %v1710_v52 = vmul.f32 %v4747_v50, %v5136_v54  ;;  %3243 = vmatprep.subr.bf16.mxu1 %v3454_v2  ;;  %v3458_v18 = vld [vmem:[#allocation10 + $0x150] sm:$0xff]   ;;  %v3462_v36 = vld [vmem:[#allocation10 + $0x158] sm:$0xff]  }
 0x1de   :  { %v1699_v61 = vmul.f32 %v4787_v25, %v5125_v4  ;;  %v4806_v57 = vsub.f32 %v5135_v32, %v4558_v43  ;;  %v1904_v34 = vadd.f32 %v1903_v59, %v1897_v20  ;;  %v5137_v4 = vld [vmem:[#allocation32_spill] sm:$0xff]  ;;  %v1811_v60 = vmul.f32 %v5127_v56, %v4702_v1  ;;  %v5138_v51 = vld [vmem:[#allocation33_spill] sm:$0xff] }
 0x1df   :  { %v1979_v6 = vmul.f32 %v1978_v53, %v1895_v17  ;;  %v1982_v24 = vmul.f32 %v1981_v7, %v1895_v17  ;;  %v1706_v41 = vmul.f32 %v5136_v54, %v4795_v16  ;;  %v1711_v11 = vmul.f32 %v1710_v52, %v1612_v8  ;;  %v3460_v53 = vld [vmem:[#allocation10 + $0x110] sm:$0xff]  }
 0x1e0   :  { %v1700_v30 = vmul.f32 %v1699_v61, %v4737_v28  ;;  %v1717_v15 = vmul.f32 %v5137_v4, %v4806_v57  ;;  %v1988_v5 = vmul.f32 %v1987_v26, %v1904_v34  ;;  %v2049_v3 = vmul.f32 %v2048_v31, %v4743_v27  ;;  %3244 = vmatpush3.bf16.msra.mxu1 %v3456_v19  ;;  %v5139_v31 = vld [vmem:[#allocation34_spill] sm:$0xff] }
 0x1e1   :  { %v1980_v48 = vadd.f32 %v1979_v6, %v1973_v45  ;;  %v1707_v29 = vmul.f32 %v1706_v41, %v1612_v8  ;;  %v1812_v2 = vmul.f32 %v1811_v60, %v1697_v49  ;;  %v1817_v28 = vmul.f32 %v5138_v51, %v4795_v16  ;;  %3245 = vmatprep.subr.bf16.mxu1 %v3458_v18  ;;  %v5140_v18 = vld [vmem:[#allocation35_spill] sm:$0xff] }
 0x1e2   :  { %v1718_v7 = vmul.f32 %v1717_v15, %v4798_v62  ;;  %v1820_v20 = vmul.f32 %v5138_v51, %v4787_v25  ;;  %v4821_v17 = vadd.f32 %v1988_v5, %v1982_v24  ;;  %v1826_v8 = vmul.f32 %v5139_v31, %v4806_v57  ;;  %v5141_v24 = vld [vmem:[#allocation18_spill] sm:$0xff]  ;;  %v3453_v51 = vld [vmem:[#allocation10 + $0x180] sm:$0xff]  }
 0x1e3   :  { %v2058_v56 = vmul.f32 %v2057_v21, %v1980_v48  ;;  %v2055_v45 = vmul.f32 %v2054_v9, %v1980_v48  ;;  %v1708_v26 = vadd.f32 %v1707_v29, %v1700_v30  ;;  %v1905_v49 = vmul.f32 %v5129_v14, %v4664_v22  ;;  %v3464_v21 = vld [vmem:[#allocation10 + $0x118] sm:$0xff]  }
 0x1e4   :  { %v4823_v27 = vadd.f32 %v1718_v7, %v1711_v11  ;;  %v4831_v59 = vrot.slane %v4405_v40, %v3783_v35  ;;  %v2064_v19 = vmul.f32 %v2063_v55, %v4821_v17  ;;  %3246 = vmatpush3.bf16.msra.mxu1 %v3460_v53  ;;  %v1911_v6 = vmul.f32 %v5140_v18, %v4795_v16  ;;  %v3466_v55 = vld [vmem:[#allocation10 + $0x160] sm:$0xff]  }
 0x1e5   :  { %v2056_v61 = vadd.f32 %v2055_v45, %v2049_v3  ;;  %v1818_v54 = vmul.f32 %v1817_v28, %v1708_v26  ;;  %v1821_v52 = vmul.f32 %v1820_v20, %v1708_v26  ;;  %v4839_v41 = vrot.slane %v5141_v24, %v3783_v35  ;;  %3247 = vmatprep.subr.bf16.mxu1 %v3462_v36  ;;  %v5142_v3 = vld [vmem:[#allocation36_spill] sm:$0xff]  ;;  %v5144_v45 = vld [vmem:[#allocation41_spill] sm:$0xff]  ;;  %v5145_v26 = vld [vmem:[#allocation42_spill] sm:$0xff] }
 0x1e6   :  { %v1827_v9 = vmul.f32 %v1826_v8, %v4823_v27  ;;  %v4843_v14 = vrot.slane %v5141_v24, %v3785_v37  ;;  %v2065_v30 = vadd.f32 %v2064_v19, %v2058_v56  ;;  %v1906_v15 = vmul.f32 %v1905_v49, %v4779_v12  ;;  %v3455_v8 = vld [vmem:[#allocation10 + $0x1c8] sm:$0xff]   ;;  %v5152_v24 = vld [vmem:[#allocation46_spill] sm:$0xff] }
 0x1e7   :  { %v1819_v11 = vadd.f32 %v1818_v54, %v1812_v2  ;;  %v1914_v60 = vmul.f32 %v5140_v18, %v4702_v1  ;;  %v2113_v48 = vpack.c.bf16 %v2056_v61, %v2056_v61  ;;  %v1920_v29 = vmul.f32 %v5142_v3, %v4806_v57  ;;  %v5143_v2 = vld [vmem:[#allocation37_spill] sm:$0xff]  ;;  %v3468_v54 = vld [vmem:[#allocation10 + $0x120] sm:$0xff]  }
 0x1e8   :  { %v4848_v5 = vadd.f32 %v1827_v9, %v1821_v52  ;;  %v1990_v53 = vmul.f32 %v5131_v42, %v4656_v23  ;;  %v2114_v7 = vpack.c.bf16 %v2065_v30, %v2065_v30  ;;  %v1996_v36 = vmul.f32 %v5143_v2, %v4795_v16  ;;  %3248 = vmatpush3.bf16.msra.mxu1 %v3464_v21  ;;  %v5146_v52 = vld [vmem:[#allocation38_spill] sm:$0xff]  ;;  %v5147_v9 = vld [vmem:[#allocation43_spill] sm:$0xff] }
 0x1e9   :  { %v1912_v28 = vmul.f32 %v1911_v6, %v1819_v11  ;;  %v1915_v20 = vmul.f32 %v1914_v60, %v1819_v11  ;;  %vm1587_vm10 = vcmp.ge.f32.partialorder %v4558_v43, %v5144_v45  ;;  %vm1594_vm11 = vcmp.ge.f32.partialorder %v4558_v43, %v5145_v26  ;;  %3249 = vmatprep.subr.bf16.mxu1 %v3466_v55  ;;  %v3470_v6 = vld [vmem:[#allocation10 + $0x168] sm:$0xff]  }
 0x1ea   :  { %v1921_v12 = vmul.f32 %v1920_v29, %v4848_v5  ;;  %v1991_v56 = vmul.f32 %v1990_v53, %v1904_v34  ;;  %2768 = vmatprep.mubr.bf16.mxu0 %v2114_v7  ;;  %v1999_v49 = vmul.f32 %v5143_v2, %v4664_v22  ;;  %v3025_v19 = vsel %vm1587_vm10, 1.0, %v5118_v44  ;;  %v3457_v60 = vld [vmem:[#allocation10 + $0x188] sm:$0xff]   ;;  %v3459_v7 = vld [vmem:[#allocation10 + $0x1d0] sm:$0xff]  }
 0x1eb   :  { %v1913_v42 = vadd.f32 %v1912_v28, %v1906_v15  ;;  %v4865_v61 = vsel %vm1594_vm11, 1.0, %v5118_v44  ;;  %2769 = vmatmul.mubr.bf16.vlgmr.msra.gmra.mrb[12].mxu0 %v2113_v48  ;;  %v2005_v21 = vmul.f32 %v5146_v52, %v4806_v57  ;;  %vm1601_vm12 = vcmp.ge.f32.partialorder %v4558_v43, %v5147_v9 }
 0x1ec   :  { %v4867_v34 = vadd.f32 %v1921_v12, %v1915_v20  ;;  %v1614_v18 = vsub.f32 %v4791_v0, %v3025_v19  ;;  %3264 = vmatpush3.bf16.msra.mxu0 %v3453_v51  ;;  %v4875_v11 = vsub.f32 %v3025_v19, %v4865_v61  ;;  %v4879_v15 = vsub.f32 %v4558_v43, %v5134_v38  ;;  %v5148_v38 = vld [vmem:[#allocation39_spill] sm:$0xff]  ;;  %v5149_v20 = vld [vmem:[#allocation40_spill] sm:$0xff] }
 0x1ed   :  { %v1997_v55 = vmul.f32 %v1996_v36, %v1913_v42  ;;  %v2000_v30 = vmul.f32 %v1999_v49, %v1913_v42  ;;  %v4884_v29 = vsub.f32 %v5144_v45, %v4558_v43  ;;  %v4888_v0 = vsub.f32 %v4558_v43, %v5135_v32  ;;  %3265 = vmatprep.subr.bf16.mxu0 %v3455_v8  ;;  %v3472_v32 = vld [vmem:[#allocation10 + $0x128] sm:$0xff]   ;;  %v5151_v8 = vld [vmem:[#allocation45_spill] sm:$0xff] }
 0x1ee   :  { %v2006_v48 = vmul.f32 %v2005_v21, %v4867_v34  ;;  %v4892_v53 = vsub.f32 %v5145_v26, %v4558_v43  ;;  %v2075_v28 = vmul.f32 %v5148_v38, %v4656_v23  ;;  %v2081_v2 = vmul.f32 %v5149_v20, %v4806_v57  ;;  %3250 = vmatpush3.bf16.msra.mxu1 %v3468_v54  ;;  %v5150_v26 = vld [vmem:[#allocation44_spill] sm:$0xff]  ;;  %v3474_v23 = vld [vmem:[#allocation10 + $0x170] sm:$0xff]  }
 0x1ef   :  { %v4894_v51 = vadd.f32 %v1997_v55, %v1991_v56  ;;  %v1721_v36 = vmul.f32 %v4879_v15, %v5137_v4  ;;  %v1728_v42 = vmul.f32 %v5150_v26, %v4884_v29  ;;  %v1732_v56 = vmul.f32 %v4888_v0, %v5150_v26  ;;  %3251 = vmatprep.subr.bf16.mxu1 %v3470_v6  ;;  %v3461_v21 = vld [vmem:[#allocation10 + $0x190] sm:$0xff]  }
 0x1f0   :  { %v4902_v12 = vadd.f32 %v2006_v48, %v2000_v30  ;;  %v1739_v49 = vmul.f32 %v5151_v8, %v4892_v53  ;;  %v4915_v4 = vsel %vm1601_vm12, 1.0, %v5118_v44  ;;  %v1829_v54 = vmul.f32 %v5139_v31, %v4747_v50  ;;  %3266 = vmatpush3.bf16.msra.mxu0 %v3457_v60  ;;  %v3476_v31 = vld [vmem:[#allocation10 + $0x130] sm:$0xff]  }
 0x1f1   :  { %v2076_v57 = vmul.f32 %v2075_v28, %v4894_v51  ;;  %v1722_v19 = vmul.f32 %v1721_v36, %v4798_v62  ;;  %v1729_v30 = vmul.f32 %v1728_v42, %v1614_v18  ;;  %v1733_v6 = vmul.f32 %v1732_v56, %v1614_v18  ;;  %3267 = vmatprep.subr.bf16.mxu0 %v3459_v7  ;;  %v3463_v28 = vld [vmem:[#allocation10 + $0x1d8] sm:$0xff]   ;;  %v5153_v7 = vld [vmem:[#allocation47_spill] sm:$0xff] }
 0x1f2   :  { %v2082_v55 = vmul.f32 %v2081_v2, %v4902_v12  ;;  %v1740_v48 = vmul.f32 %v1739_v49, %v4875_v11  ;;  %v1830_v26 = vmul.f32 %v1829_v54, %v4823_v27  ;;  %v1835_v39 = vmul.f32 %v5152_v24, %v4884_v29  ;;  %3252 = vmatpush3.bf16.msra.mxu1 %v3472_v32  ;;  %v3478_v27 = vld [vmem:[#allocation10 + $0x178] sm:$0xff]   ;;  %v5154_v49 = vld [vmem:[#allocation16_spill] sm:$0xff] }
 0x1f3   :  { %v1838_v62 = vmul.f32 %v5152_v24, %v4879_v15  ;;  %v1749_v60 = vrot.slane %v4351_v10, %v3783_v35  ;;  %v1730_v36 = vadd.f32 %v1729_v30, %v1722_v19  ;;  %v1844_v42 = vmul.f32 %v5153_v7, %v4892_v53  ;;  %3253 = vmatprep.subr.bf16.mxu1 %v3474_v23  ;;  %v3465_v32 = vld [vmem:[#allocation10 + $0x198] sm:$0xff]   ;;  %v5156_v30 = vld [vmem:[#allocation49_spill] sm:$0xff] }
 0x1f4   :  { %v2083_v2 = vadd.f32 %v2082_v55, %v2076_v57  ;;  %v4929_v18 = vadd.f32 %v1740_v48, %v1733_v6  ;;  %v1616_v56 = vsub.f32 %v4865_v61, %v4915_v4  ;;  %v1923_v24 = vmul.f32 %v5142_v3, %v4787_v25  ;;  %3268 = vmatpush3.bf16.msra.mxu0 %v3461_v21  ;;  %v3467_v55 = vld [vmem:[#allocation10 + $0x1e0] sm:$0xff]   ;;  %v5155_v4 = vld [vmem:[#allocation48_spill] sm:$0xff]  ;;  %v3480_v48 = vld [vmem:[#allocation10 + $0x138] sm:$0xff]  }
 0x1f5   :  { %v1852_v35 = vrot.slane %v4370_v58, %v5154_v49  ;;  %v1946_v10 = vrot.slane %v4388_v47, %v3781_v33  ;;  %v1836_v19 = vmul.f32 %v1835_v39, %v1730_v36  ;;  %v1839_v54 = vmul.f32 %v1838_v62, %v1730_v36  ;;  %3269 = vmatprep.subr.bf16.mxu0 %v3463_v28  ;;  %v3469_v36 = vld [vmem:[#allocation10 + $0x1a0] sm:$0xff]   ;;  %v3481_v58 = vld [vmem:[#allocation10 + $0x1b8] sm:$0xff]  }
 0x1f6   :  { %v2116_v57 = vpack.c.bf16 %v2083_v2, %v2083_v2  ;;  %v1845_v23 = vmul.f32 %v1844_v42, %v4929_v18  ;;  %v1924_v61 = vmul.f32 %v1923_v24, %v4848_v5  ;;  %v1929_v3 = vmul.f32 %v5155_v4, %v4884_v29  ;;  %3254 = vmatpush3.bf16.msra.mxu1 %v3476_v31  ;;  %v3485_v33 = vld [vmem:[#allocation10 + $0x218] sm:$0xff]  }
 0x1f7   :  { %v1932_v21 = vmul.f32 %v5155_v4, %v4747_v50  ;;  %v1938_v6 = vmul.f32 %v5156_v30, %v4892_v53  ;;  %v1837_v39 = vadd.f32 %v1836_v19, %v1830_v26  ;;  %3255 = vmatprep.subr.bf16.mxu1 %v3478_v27  ;;  %v2066_v28 = vmul.f32 %v5133_v63, %v4633_v46  ;;  %v3471_v46 = vld [vmem:[#allocation10 + $0x1e8] sm:$0xff]   ;;  %v3482_v4 = vld [vmem:[#allocation10 + $0x200] sm:$0xff]  }
 0x1f8   :  { %2808 = vmatprep.mubr.bf16.mxu1 %v2116_v57  ;;  %v4949_v62 = vadd.f32 %v1845_v23, %v1839_v54  ;;  %v2008_v5 = vmul.f32 %v5146_v52, %v4702_v1  ;;  %v2014_v2 = vmul.f32 %v4668_v13, %v4884_v29  ;;  %3270 = vmatpush3.bf16.msra.mxu0 %v3465_v32 }
 0x1f9   :  { %v2072_v31 = vmul.f32 %v5148_v38, %v4795_v16  ;;  %v1742_v26 = vsub.f32 %v4558_v43, %v5144_v45  ;;  %v1930_v42 = vmul.f32 %v1929_v3, %v1837_v39  ;;  %v1933_v24 = vmul.f32 %v1932_v21, %v1837_v39  ;;  %3271 = vmatprep.subr.bf16.mxu0 %v3467_v55 }
 0x1fa   :  { %v1939_v27 = vmul.f32 %v1938_v6, %v4949_v62  ;;  %v2067_v63 = vmul.f32 %v2066_v28, %v4821_v17  ;;  %v2017_v52 = vmul.f32 %v4668_v13, %v4787_v25  ;;  %3256 = vmatpush3.bf16.msra.mxu1 %v3480_v48  ;;  %v4969_v16 = vsub.f32 %v5147_v9, %v4558_v43  ;;  %v3477_v28 = vld [vmem:[#allocation10 + $0x1b0] sm:$0xff]  }
 0x1fb   :  { %v2073_v32 = vmul.f32 %v2072_v31, %v4894_v51  ;;  %v1743_v57 = vmul.f32 %v1742_v26, %v5151_v8  ;;  %v1931_v45 = vadd.f32 %v1930_v42, %v1924_v61  ;;  %v2009_v19 = vmul.f32 %v2008_v5, %v4867_v34  ;;  %3314 = vmatprep.subr.bf16.mxu1 %v5118_v44  ;;  %v3473_v51 = vld [vmem:[#allocation10 + $0x1a8] sm:$0xff]   ;;  %v3475_v34 = vld [vmem:[#allocation10 + $0x1f0] sm:$0xff]  }
 0x1fc   :  { %v4971_v38 = vadd.f32 %v1939_v27, %v1933_v24  ;;  %v2023_v17 = vmul.f32 %v4831_v59, %v4892_v53  ;;  %v2093_v13 = vmul.f32 %v4839_v41, %v4702_v1  ;;  %3272 = vmatpush3.bf16.msra.mxu0 %v3469_v36  ;;  %v1750_v43 = vmul.f32 %v1749_v60, %v4969_v16  ;;  %v3484_v42 = vld [vmem:[#allocation10 + $0x210] sm:$0xff]  }
 0x1fd   :  { %v2074_v8 = vadd.f32 %v2073_v32, %v2067_v63  ;;  %v1744_v54 = vmul.f32 %v1743_v57, %v4875_v11  ;;  %v2015_v9 = vmul.f32 %v2014_v2, %v1931_v45  ;;  %v2018_v23 = vmul.f32 %v2017_v52, %v1931_v45  ;;  %3273 = vmatprep.subr.bf16.mxu0 %v3471_v46  ;;  %v5157_v27 = vld [vmem:[#allocation17_spill] sm:$0xff]  ;;  %v5158_v46 = vld [vmem:[#allocation18_spill] sm:$0xff]  ;;  %v3487_v52 = vld [vmem:[#allocation10 + $0x228] sm:$0xff]  }
 0x1fe   :  { %v2024_v55 = vmul.f32 %v2023_v17, %v4971_v38  ;;  %v2084_v61 = vmul.f32 %v5149_v20, %v4664_v22  ;;  %v2099_v1 = vmul.f32 %v4843_v14, %v4892_v53  ;;  %v1751_v21 = vmul.f32 %v1750_v43, %v1616_v56 }
 0x1ff   :  { %v2115_v3 = vpack.c.bf16 %v2074_v8, %v2074_v8  ;;  %v1847_v11 = vmul.f32 %v5153_v7, %v4888_v0  ;;  %v2016_v6 = vadd.f32 %v2015_v9, %v2009_v19  ;;  %v2090_v39 = vmul.f32 %v4839_v41, %v4884_v29  ;;  %v3479_v7 = vld [vmem:[#allocation10 + $0x1f8] sm:$0xff]  }
 0x200   :  { %v2025_v60 = vadd.f32 %v2024_v55, %v2018_v23  ;;  %v2085_v48 = vmul.f32 %v2084_v61, %v4902_v12  ;;  %3274 = vmatpush3.bf16.msra.mxu0 %v3473_v51  ;;  %v1752_v22 = vadd.f32 %v1751_v21, %v1744_v54  ;;  %v1853_v53 = vmul.f32 %v1852_v35, %v4969_v16  ;;  %v3483_v12 = vld [vmem:[#allocation10 + $0x208] sm:$0xff]  }
 0x201   :  { %2809 = vmatmul.mubr.bf16.vlgmr.msra.gmra.mrb[12].mxu1 %v2115_v3  ;;  %v1848_v20 = vmul.f32 %v1847_v11, %v4929_v18  ;;  %v2094_v56 = vmul.f32 %v2093_v13, %v2016_v6  ;;  %3275 = vmatprep.subr.bf16.mxu0 %v3475_v34  ;;  %v2091_v5 = vmul.f32 %v2090_v39, %v2016_v6 }
 0x202   :  { %v2100_v0 = vmul.f32 %v2099_v1, %v2025_v60  ;;  %3315 = vmatpush3.bf16.msra.mxu1 %v3482_v4  ;;  %3330 = vmatprep.mubr.msk.bf16.mxu1 %vm3649_vm14, %v5118_v44  ;;  %v1854_v41 = vmul.f32 %v1853_v53, %v1752_v22  ;;  %v1941_v29 = vmul.f32 %v5156_v30, %v4879_v15  ;;  %v5159_v22 = vlaneseq }
 0x203   :  { %3316 = vmatprep.subr.bf16.mxu1 %v5118_v44  ;;  %v1947_v2 = vmul.f32 %v1946_v10, %v4969_v16  ;;  %v2031_v36 = vrot.slane %v4405_v40, %v3785_v37  ;;  %v2092_v26 = vadd.f32 %v2091_v5, %v2085_v48  ;;  %v2026_v37 = vmul.f32 %v4831_v59, %v4747_v50  ;;  %v3486_v40 = vld [vmem:[#allocation10 + $0x220] sm:$0xff]   ;;  %v3488_v50 = vld [vmem:[#allocation10 + $0x230] sm:$0xff]  }
 0x204   :  { %v2101_v18 = vadd.f32 %v2100_v0, %v2094_v56  ;;  %3276 = vmatpush3.bf16.msra.mxu0 %v3477_v28  ;;  %v1855_v49 = vadd.f32 %v1854_v41, %v1848_v20  ;;  %v1942_v35 = vmul.f32 %v1941_v29, %v4949_v62  ;;  %v2107_v63 = vrot.slane %v5158_v46, %v5157_v27 }
 0x205   :  { %3277 = vmatprep.subr.bf16.mxu0 %v3479_v7  ;;  %v2032_v62 = vmul.f32 %v2031_v36, %v4969_v16  ;;  %v2117_v24 = vpack.c.bf16 %v2092_v26, %v2092_v26  ;;  %v2027_v10 = vmul.f32 %v2026_v37, %v4971_v38  ;;  %v2102_v57 = vmul.f32 %v4843_v14, %v4787_v25  ;;  %v3489_v38 = vld [vmem:[#allocation10 + $0x238] sm:$0xff]  }
 0x206   :  { %v2118_v31 = vpack.c.bf16 %v2101_v18, %v2101_v18  ;;  %3317 = vmatpush3.bf16.msra.mxu1 %v3483_v12  ;;  %v1948_v15 = vmul.f32 %v1947_v2, %v1855_v49  ;;  %v2108_v45 = vmul.f32 %v2107_v63, %v4969_v16  ;;  %v2897_v20 = vand.u32 127, %v5159_v22 }
 0x207   :  { %3318 = vmatprep.subr.bf16.mxu1 %v5118_v44  ;;  %v2103_v59 = vmul.f32 %v2102_v57, %v2025_v60 }
 0x208   :  { %2848 = vmatprep.mubr.bf16.mxu0 %v2118_v31  ;;  %3278 = vmatpush3.bf16.msra.mxu0 %v3481_v58  ;;  %v1949_v30 = vadd.f32 %v1948_v15, %v1942_v35  ;;  %vm2898_vm13 = vcmp.lt.s32.totalorder %v2897_v20, 16 }
 0x20a   :  { %3319 = vmatpush3.bf16.msra.mxu1 %v3484_v42  ;;  %v2033_v47 = vmul.f32 %v2032_v62, %v1949_v30 }
 0x20b   :  { %3320 = vmatprep.subr.bf16.mxu1 %v5118_v44  ;;  %2849 = vmatmul.mubr.bf16.vlgmr.msra.gmra.mrb[16].mxu0 %v2117_v24 }
 0x20c   :  { %v2034_v32 = vadd.f32 %v2033_v47, %v2027_v10 }
 0x20e   :  { %3321 = vmatpush3.bf16.msra.mxu1 %v3485_v33  ;;  %v2109_v19 = vmul.f32 %v2108_v45, %v2034_v32 }
 0x20f   :  { %3322 = vmatprep.subr.bf16.mxu1 %v5118_v44 }
 0x210   :  { %v2110_v17 = vadd.f32 %v2109_v19, %v2103_v59 }
 0x212   :  { %3323 = vmatpush3.bf16.msra.mxu1 %v3486_v40  ;;  %v2119_v13 = vpack.c.bf16 %v2110_v17, %v2110_v17 }
 0x213   :  { %3324 = vmatprep.subr.bf16.mxu1 %v5118_v44 }
 0x216   :  { %3325 = vmatpush3.bf16.msra.mxu1 %v3487_v52 }
 0x217   :  { %3326 = vmatprep.subr.bf16.mxu1 %v5118_v44 }
 0x21a   :  { %3327 = vmatpush3.bf16.msra.mxu1 %v3488_v50 }
 0x21b   :  { %3328 = vmatprep.subr.bf16.mxu1 %v5118_v44 }
 0x21e   :  { %3329 = vmatpush3.bf16.msra.mxu1 %v3489_v38 }
 0x221   :  { %3331 = vmatmul.mubr.bf16.vlgmr.msra.gmra.mrb[16].mxu1 %v2119_v13 }
 0x2ae   :  { %v3213_v51 = vpop.f32.mrb[8].mxu1 }
 0x2af   :  { %v3214_v8 = vpop.f32.mrb[9].mxu1 }
 0x2b0   :  { %v3215_v54 = vadd.f32 %v3214_v8, %v3213_v51  ;;  %v3216_v25 = vpop.f32.mrb[10].mxu1 }
 0x2b1   :  { %v3217_v14 = vpop.f32.mrb[11].mxu1 }
 0x2be   :  { %v3235_v16 = vpop.f32.mrb[12].mxu0 }
 0x2bf   :  { %v3236_v43 = vpop.f32.mrb[13].mxu0 }
 0x2c0   :  { %v3237_v9 = vadd.f32 %v3236_v43, %v3235_v16  ;;  %v3238_v23 = vpop.f32.mrb[14].mxu0 }
 0x2c1   :  { %v3239_v55 = vpop.f32.mrb[15].mxu0 }
 0x2c2   :  { %v2771_v34 = vadd.f32 %v3237_v9, %v3215_v54 }
 0x2d4   :  { %v3257_v61 = vpop.f32.mrb[12].mxu1 }
 0x2d5   :  { %v3258_v4 = vpop.f32.mrb[13].mxu1 }
 0x2d6   :  { %v3259_v1 = vadd.f32 %v3258_v4, %v3257_v61  ;;  %v3260_v3 = vpop.f32.mrb[14].mxu1 }
 0x2d7   :  { %v3261_v44 = vpop.f32.mrb[15].mxu1 }
 0x2d8   :  { %v2811_v21 = vadd.f32 %v3259_v1, %v2771_v34 }
 0x2de   :  { %v3279_v11 = vpop.f32.mrb[16].mxu0 }
 0x2df   :  { %v3280_v6 = vpop.f32.mrb[17].mxu0 }
 0x2e0   :  { %v3281_v60 = vadd.f32 %v3280_v6, %v3279_v11  ;;  %v3282_v48 = vpop.f32.mrb[18].mxu0 }
 0x2e1   :  { %v3283_v39 = vpop.f32.mrb[19].mxu0 }
 0x2e2   :  { %v2851_v28 = vadd.f32 %v3281_v60, %v2811_v21 }
 0x2f4   :  { %v2890_v53 = vpop.f32.mrb[16].mxu1 }
 0x2f5   :  { %v2891_v56 = vadd.f32 %v2890_v53, %v2851_v28  ;;  %v3332_v0 = vpop.f32.mrb[17].mxu1 }
 0x2f6   :  { %v2893_v7 = vpop.f32.mrb[18].mxu1 }
 0x2f7   :  { %v3333_v5 = vpop.f32.mrb[19].mxu1  ;;  %v2899_v12 = vsel %vm2898_vm13, %v2891_v56, -inf }
 0x2f8   :  { %2900 = vmax.xlane.f32.xlu0 %v2899_v12 }
 0x385   :  { %v2901_v41 = vpop.xlane.xlu0 %2900 }
 0x386   :  { %v2902_v29 = vsub.f32 %v2899_v12, %v2901_v41 }
 0x388   :  { %v2903_v18 = vmul.f32 1.442695, %v2902_v29 }
 0x38a   :  { %3490 = vpow2.f32 %v2903_v18 }
 0x394   :  { %v3491_v58 = vpop.eup %3490 }
 0x395   :  { %2905 = vadd.xlane.f32.xlu0 %v3491_v58 }
 0x422   :  { %v2906_v49 = vpop.xlane.xlu0 %2905 }
 0x423   :  { %3492 = vlog2.f32 %v2906_v49 }
 0x42d   :  { %v3493_v35 = vpop.eup %3492 }
 0x42e   :  { %v2908_v2 = vmul.f32 0.6931472, %v3493_v35 }
 0x430   :  { %v2909_v36 = vsub.f32 %v2902_v29, %v2908_v2 }
 0x432   :  { %2910 = vst [vmem:[#allocation11] sm:$0xff] %v2909_v36 }
 0x433   :  { %3620 = shalt.err (!%p3617_p2)
}
 0x434   :  { %s3621_s10 = scalar_lea.hbm %s5043_s7, 128 }
 0x435   :  { %p3622_p3 = scmp.ne.s32.totalorder %s5043_s7, %s3621_s10  ;;  %p3625_p4 = scmp.lt.u32.totalorder %s3621_s10, %s5043_s7 }
 0x437   :  { %p3627_p5 = pnand %p3625_p4, %p3622_p3 }
 0x439   :  { %3630 = shalt.err (!%p3627_p5)
}
 0x43a   :  { %2920 = dma.vmem_to_hbm [thread:$0]  %s2918_s28, 128, %s5043_s7, [#allocation4]  }
 0x43b   :  { %3637 = dma.done.wait [#allocation4], 128  }
 0x43c   :  { %3638 = vsyncadd [#allocation4], 4294967168 }
 0x43d   :  { %2924 = vsyncpa [#allocation3], 1 }
 0x43e   :  { %2925 = vsyncpa [#allocation6], 1 }
 0x43f   :  { %2926 = vsyncpa [#allocation9], 1 }
 0x440   :  { %2927 = vsyncpa [#allocation4], 1 }

</bundles_post_ra>
